<compile_context>
chip_gen: v7x
topology: tpu7x:2x2x1
jax: 0.10.0
libtpu: 0.0.40
codegen_flags: <defaults>
</compile_context>

<pallas_src>
import jax
import jax.numpy as jnp
from jax import lax
from jax.experimental import pallas as pl
from jax.experimental.pallas import tpu as pltpu


def _rcu_kernel(xt_ref, xm_ref, xb_ref, w1_ref, b1_ref, w2_ref, b2_ref,
                o_ref, pad1_ref, pad2_ref):
    """One (batch, row-tile) block of the ResidualConvUnit forward.

    xt_ref : (2, W, C)        halo rows above the tile (zeroed at image top)
    xm_ref : (TH, W, C)       the row tile itself
    xb_ref : (2, W, C)        halo rows below the tile (zeroed at image bottom)
    w1_ref : (9*C, C)         conv1 weights, (ky, kx, ci) row-major im2col layout
    b1_ref : (1, C)           conv1 bias (f32)
    w2_ref : (9*C, C)         conv2 weights
    b2_ref : (1, C)           conv2 bias (f32)
    o_ref  : (TH, W, C)       output tile
    pad1_ref: (TH+4, W+2, C)  relu(x) with halo rows, zero-padded in W
    pad2_ref: (TH+2, W+2, C)  relu(conv1 out) with halo rows, zero-padded in W
    """
    TH, W, C = xm_ref.shape
    R1 = TH + 2                                  # conv1 output rows needed
    sdt = pad1_ref.dtype                         # staging dtype (f32 or bf16)

    i = pl.program_id(1)
    is_first = i == 0
    is_last = i == pl.num_programs(1) - 1

    # ---------------- stage 1: relu(x) -> pad1 (zero-padded in W) ------------
    # Only the two W-border columns need explicit zeroing; interior rows are
    # fully overwritten below (no full-buffer memset).
    zcol1 = jnp.zeros((TH + 4, 1, C), sdt)
    pad1_ref[:, 0:1, :] = zcol1
    pad1_ref[:, W + 1:W + 2, :] = zcol1
    pad1_ref[0:2, 1:W + 1, :] = jnp.maximum(xt_ref[...], 0.0).astype(sdt)
    pad1_ref[2:TH + 2, 1:W + 1, :] = jnp.maximum(xm_ref[...], 0.0).astype(sdt)
    pad1_ref[TH + 2:TH + 4, 1:W + 1, :] = jnp.maximum(xb_ref[...], 0.0).astype(sdt)

    # Halo rows outside the image are conv1's zero padding: overwrite just
    # those two rows (pl.when) instead of masking whole tiles.
    @pl.when(is_first)
    def _():
        pad1_ref[0:2, :, :] = jnp.zeros((2, W + 2, C), sdt)

    @pl.when(is_last)
    def _():
        pad1_ref[TH + 2:TH + 4, :, :] = jnp.zeros((2, W + 2, C), sdt)

    # conv1 as three per-ky matmuls: (R1*W, 3C) @ (3C, C), f32 accumulation.
    out1 = b1_ref[...]
    for ky in range(3):
        cols = jnp.concatenate(
            [pad1_ref[ky:ky + R1, kx:kx + W, :].reshape(R1 * W, C)
             for kx in range(3)], axis=-1)
        out1 = out1 + jnp.dot(cols, w1_ref[ky * 3 * C:(ky + 1) * 3 * C, :],
                              preferred_element_type=jnp.float32)
    out1 = jnp.maximum(out1, 0.0).reshape(R1, W, C)

    # ---------------- stage 2: conv2(relu(out1)) + residual ------------------
    zcol2 = jnp.zeros((R1, 1, C), sdt)
    pad2_ref[:, 0:1, :] = zcol2
    pad2_ref[:, W + 1:W + 2, :] = zcol2
    pad2_ref[:, 1:W + 1, :] = out1.astype(sdt)

    # conv1-output rows that fall outside the image are conv2's zero padding:
    # zero exactly one row at each image edge.
    @pl.when(is_first)
    def _():
        pad2_ref[0:1, :, :] = jnp.zeros((1, W + 2, C), sdt)

    @pl.when(is_last)
    def _():
        pad2_ref[R1 - 1:R1, :, :] = jnp.zeros((1, W + 2, C), sdt)

    out2 = b2_ref[...]
    for ky in range(3):
        cols = jnp.concatenate(
            [pad2_ref[ky:ky + TH, kx:kx + W, :].reshape(TH * W, C)
             for kx in range(3)], axis=-1)
        out2 = out2 + jnp.dot(cols, w2_ref[ky * 3 * C:(ky + 1) * 3 * C, :],
                              preferred_element_type=jnp.float32)
    out2 = out2.reshape(TH, W, C)

    # Residual add: x re-read from the ref (not held live across both stages).
    o_ref[...] = (out2 + xm_ref[...]).astype(o_ref.dtype)


def residual_conv_unit(x_nchw, w1, b1, w2, b2, *, tile_h=16, mxu_dtype=None):
    """x_nchw: (B, C, H, W); w*: (C, C, 3, 3); b*: (C,).  Returns NCHW.

    mxu_dtype=jnp.bfloat16 stages the pads / im2col cols and weights in bf16
    (recommended on v6e/v7x; validate with a looser tolerance).  Default None
    keeps everything f32 (v5e-friendly, matches the 1e-4 reference check).
    """
    B, C, H, W = x_nchw.shape
    tile_h = min(tile_h, H)
    if H % tile_h != 0 or tile_h % 2 != 0:
        raise ValueError("H must be divisible by an even tile_h")
    nh = H // tile_h
    half = tile_h // 2

    x = jnp.transpose(x_nchw, (0, 2, 3, 1))          # -> NHWC (C on lanes)
    stage_dtype = jnp.float32 if mxu_dtype is None else mxu_dtype

    # PyTorch conv weight (co, ci, ky, kx) -> im2col ((ky*3+kx)*ci, co),
    # cast once here (never per tap inside the kernel).
    w1_f = jnp.transpose(w1, (2, 3, 1, 0)).reshape(9 * C, C).astype(stage_dtype)
    w2_f = jnp.transpose(w2, (2, 3, 1, 0)).reshape(9 * C, C).astype(stage_dtype)
    b1_r = b1.reshape(1, C).astype(jnp.float32)
    b2_r = b2.reshape(1, C).astype(jnp.float32)

    # Row tile + a 2-row halo block above/below (clamped at the image edges;
    # the kernel zeroes the out-of-image halos with pl.when stores).
    top_map = lambda b, i: (b, jnp.maximum(i * half - 1, 0), 0, 0)
    mid_map = lambda b, i: (b, i, 0, 0)
    bot_map = lambda b, i: (b, jnp.minimum((i + 1) * half, H // 2 - 1), 0, 0)
    const2 = lambda b, i: (0, 0)

    itemsize = x.dtype.itemsize
    sbytes = jnp.dtype(stage_dtype).itemsize

    # Honest HBM traffic estimate: each row tile re-reads a 4-row halo, the
    # weights are fetched once (constant index_map -> resident), output is
    # written once.
    flops = 2 * (2 * B * H * W * (9 * C) * C) + 6 * B * H * W * C
    w_bytes = (w1_f.size + w2_f.size) * sbytes + (b1_r.size + b2_r.size) * 4
    read_bytes = B * nh * (tile_h + 4) * W * C * itemsize + w_bytes
    write_bytes = B * H * W * C * itemsize
    bytes_accessed = int(read_bytes + write_bytes)

    # Per-step VMEM footprint (double-buffered in/out blocks, resident
    # weights, pad scratches, rough cols/acc temporaries) -> vmem limit with
    # 2x headroom, clamped to [32, 48] MiB so it is safe on all generations
    # (v7x physical VMEM is 64 MiB).
    per_step = (
        2 * (tile_h + 4) * W * C * itemsize          # input blocks (mid + halos), x2 buf
        + 2 * tile_h * W * C * itemsize              # output block, x2 buf
        + w_bytes                                    # resident weights / biases
        + ((tile_h + 4) + (tile_h + 2)) * (W + 2) * C * sbytes   # pad1 + pad2
        + 2 * (tile_h + 2) * W * 4 * C * 4           # cols (3C) + f32 acc (C) per stage
    )
    vmem_limit = int(min(max(32 * 1024 * 1024, 2 * per_step), 48 * 1024 * 1024))

    out_nhwc = pl.pallas_call(
        _rcu_kernel,
        out_shape=jax.ShapeDtypeStruct((B, H, W, C), x.dtype),
        grid_spec=pltpu.PrefetchScalarGridSpec(
            num_scalar_prefetch=0,
            grid=(B, nh),
            in_specs=[
                pl.BlockSpec((None, 2, W, C), top_map),
                pl.BlockSpec((None, tile_h, W, C), mid_map),
                pl.BlockSpec((None, 2, W, C), bot_map),
                pl.BlockSpec((9 * C, C), const2),    # weights stay VMEM-resident
                pl.BlockSpec((1, C), const2),
                pl.BlockSpec((9 * C, C), const2),
                pl.BlockSpec((1, C), const2),
            ],
            out_specs=pl.BlockSpec((None, tile_h, W, C), mid_map),
            scratch_shapes=[
                pltpu.VMEM((tile_h + 4, W + 2, C), stage_dtype),
                pltpu.VMEM((tile_h + 2, W + 2, C), stage_dtype),
            ]),
        compiler_params=pltpu.CompilerParams(
            dimension_semantics=("parallel", "parallel"),
            vmem_limit_bytes=vmem_limit),
        cost_estimate=pl.CostEstimate(
            flops=flops, transcendentals=0, bytes_accessed=bytes_accessed),
    )(x, x, x, w1_f, b1_r, w2_f, b2_r)

    return jnp.transpose(out_nhwc, (0, 3, 1, 2))     # back to NCHW


def _reference(x_nchw, w1, b1, w2, b2):
    """Pure-JAX reference (lax conv) mirroring the PyTorch forward."""
    x = jnp.transpose(x_nchw, (0, 2, 3, 1))
    dn = ("NHWC", "HWIO", "NHWC")
    w1h = jnp.transpose(w1, (2, 3, 1, 0))
    w2h = jnp.transpose(w2, (2, 3, 1, 0))
    out = jnp.maximum(x, 0.0)
    out = lax.conv_general_dilated(out, w1h, (1, 1), "SAME",
                                   dimension_numbers=dn) + b1
    out = jnp.maximum(out, 0.0)
    out = lax.conv_general_dilated(out, w2h, (1, 1), "SAME",
                                   dimension_numbers=dn) + b2
    out = out + x
    return jnp.transpose(out, (0, 3, 1, 2))


if __name__ == "__main__":
    # Lane-dense demo config: C = 128 fills the lane axis (real DPT uses 256).
    # H = 32 with tile_h = 16 -> nh = 2, exercising the halo / edge paths.
    B, C, H, W = 2, 128, 32, 16

    key = jax.random.PRNGKey(0)
    kx, kw1, kb1, kw2, kb2 = jax.random.split(key, 5)

    x = jax.random.normal(kx, (B, C, H, W), dtype=jnp.float32)
    # deterministic synthetic parameters (nn.Conv2d shapes, bias=True since bn=False)
    scale = 1.0 / (C * 3 * 3) ** 0.5
    w1 = jax.random.normal(kw1, (C, C, 3, 3), dtype=jnp.float32) * scale
    b1 = jax.random.normal(kb1, (C,), dtype=jnp.float32) * scale
    w2 = jax.random.normal(kw2, (C, C, 3, 3), dtype=jnp.float32) * scale
    b2 = jax.random.normal(kb2, (C,), dtype=jnp.float32) * scale

    out = residual_conv_unit(x, w1, b1, w2, b2, tile_h=16)
    out = jax.block_until_ready(out)

    ref = jax.block_until_ready(_reference(x, w1, b1, w2, b2))
    assert out.shape == (B, C, H, W)
    assert jnp.allclose(out, ref, atol=1e-4, rtol=1e-4), "mismatch vs reference"

    print("KERNEL_OK")
</pallas_src>

<mosaic_0001>
module attributes {stable_mosaic.version = 11 : i64} {
  func.func @_rcu_kernel(%arg0: i32, %arg1: i32, %arg2: memref<1x2x16x128xf32, #tpu.memory_space<vmem>>, %arg3: memref<1x16x16x128xf32, #tpu.memory_space<vmem>>, %arg4: memref<1x2x16x128xf32, #tpu.memory_space<vmem>>, %arg5: memref<1152x128xf32, #tpu.memory_space<vmem>>, %arg6: memref<1x128xf32, #tpu.memory_space<vmem>>, %arg7: memref<1152x128xf32, #tpu.memory_space<vmem>>, %arg8: memref<1x128xf32, #tpu.memory_space<vmem>>, %arg9: memref<1x16x16x128xf32, #tpu.memory_space<vmem>>, %arg10: memref<20x18x128xf32, #tpu.memory_space<vmem>>, %arg11: memref<18x18x128xf32, #tpu.memory_space<vmem>>) attributes {dimension_semantics = [#tpu.dimension_semantics<parallel>, #tpu.dimension_semantics<parallel>], iteration_bounds = array<i64: 2, 2>, scalar_prefetch = 0 : i64, scratch_operands = 2 : i64, tpu.core_type = #tpu.core_type<tc>, window_params = [{transform_indices = @transform_0, window_bounds = array<i64: 1, 2, 16, 128>}, {transform_indices = @transform_1, window_bounds = array<i64: 1, 16, 16, 128>}, {transform_indices = @transform_2, window_bounds = array<i64: 1, 2, 16, 128>}, {pipeline_mode = #tpu.pipeline_mode<synchronous>, transform_indices = @transform_3, window_bounds = array<i64: 1152, 128>}, {pipeline_mode = #tpu.pipeline_mode<synchronous>, transform_indices = @transform_4, window_bounds = array<i64: 1, 128>}, {pipeline_mode = #tpu.pipeline_mode<synchronous>, transform_indices = @transform_5, window_bounds = array<i64: 1152, 128>}, {pipeline_mode = #tpu.pipeline_mode<synchronous>, transform_indices = @transform_6, window_bounds = array<i64: 1, 128>}, {transform_indices = @transform_7, window_bounds = array<i64: 1, 16, 16, 128>}]} {
    %c0_i32 = arith.constant 0 : i32
    %0 = arith.cmpi eq, %arg1, %c0_i32 : i32
    %c1_i32 = arith.constant 1 : i32
    %1 = arith.cmpi eq, %arg1, %c1_i32 : i32
    %cst = arith.constant 0.000000e+00 : f32
    %2 = vector.broadcast %cst : f32 to vector<20x1x128xf32>
    %c0 = arith.constant 0 : index
    %c0_0 = arith.constant 0 : index
    %c0_1 = arith.constant 0 : index
    %3 = vector.load %arg10[%c0, %c0_0, %c0_1] : memref<20x18x128xf32, #tpu.memory_space<vmem>>, vector<20x1x128xf32>
    tpu.vector_store %arg10[%c0, %c0_0, %c0_1], %2 {strides = array<i32>} : memref<20x18x128xf32, #tpu.memory_space<vmem>>, vector<20x1x128xf32>,
    %c0_2 = arith.constant 0 : index
    %c17 = arith.constant 17 : index
    %c0_3 = arith.constant 0 : index
    %4 = vector.load %arg10[%c0_2, %c17, %c0_3] : memref<20x18x128xf32, #tpu.memory_space<vmem>>, vector<20x1x128xf32>
    tpu.vector_store %arg10[%c0_2, %c17, %c0_3], %2 {strides = array<i32>} : memref<20x18x128xf32, #tpu.memory_space<vmem>>, vector<20x1x128xf32>,
    %c0_4 = arith.constant 0 : index
    %c0_5 = arith.constant 0 : index
    %c0_6 = arith.constant 0 : index
    %c0_7 = arith.constant 0 : index
    %5 = vector.load %arg2[%c0_4, %c0_5, %c0_6, %c0_7] : memref<1x2x16x128xf32, #tpu.memory_space<vmem>>, vector<1x2x16x128xf32>
    %6 = vector.shape_cast %5 : vector<1x2x16x128xf32> to vector<2x16x128xf32>
    %cst_8 = arith.constant 0.000000e+00 : f32
    %7 = vector.broadcast %cst_8 : f32 to vector<2x16x128xf32>
    %8 = arith.maximumf %6, %7 : vector<2x16x128xf32>
    %c0_9 = arith.constant 0 : index
    %c1 = arith.constant 1 : index
    %c0_10 = arith.constant 0 : index
    %9 = vector.load %arg10[%c0_9, %c1, %c0_10] : memref<20x18x128xf32, #tpu.memory_space<vmem>>, vector<2x16x128xf32>
    tpu.vector_store %arg10[%c0_9, %c1, %c0_10], %8 {strides = array<i32>} : memref<20x18x128xf32, #tpu.memory_space<vmem>>, vector<2x16x128xf32>,
    %c0_11 = arith.constant 0 : index
    %c0_12 = arith.constant 0 : index
    %c0_13 = arith.constant 0 : index
    %c0_14 = arith.constant 0 : index
    %10 = vector.load %arg3[%c0_11, %c0_12, %c0_13, %c0_14] : memref<1x16x16x128xf32, #tpu.memory_space<vmem>>, vector<1x16x16x128xf32>
    %11 = vector.shape_cast %10 : vector<1x16x16x128xf32> to vector<16x16x128xf32>
    %cst_15 = arith.constant 0.000000e+00 : f32
    %12 = vector.broadcast %cst_15 : f32 to vector<16x16x128xf32>
    %13 = arith.maximumf %11, %12 : vector<16x16x128xf32>
    %c2 = arith.constant 2 : index
    %c1_16 = arith.constant 1 : index
    %c0_17 = arith.constant 0 : index
    %14 = vector.load %arg10[%c2, %c1_16, %c0_17] : memref<20x18x128xf32, #tpu.memory_space<vmem>>, vector<16x16x128xf32>
    tpu.vector_store %arg10[%c2, %c1_16, %c0_17], %13 {strides = array<i32>} : memref<20x18x128xf32, #tpu.memory_space<vmem>>, vector<16x16x128xf32>,
    %c0_18 = arith.constant 0 : index
    %c0_19 = arith.constant 0 : index
    %c0_20 = arith.constant 0 : index
    %c0_21 = arith.constant 0 : index
    %15 = vector.load %arg4[%c0_18, %c0_19, %c0_20, %c0_21] : memref<1x2x16x128xf32, #tpu.memory_space<vmem>>, vector<1x2x16x128xf32>
    %16 = vector.shape_cast %15 : vector<1x2x16x128xf32> to vector<2x16x128xf32>
    %cst_22 = arith.constant 0.000000e+00 : f32
    %17 = vector.broadcast %cst_22 : f32 to vector<2x16x128xf32>
    %18 = arith.maximumf %16, %17 : vector<2x16x128xf32>
    %c18 = arith.constant 18 : index
    %c1_23 = arith.constant 1 : index
    %c0_24 = arith.constant 0 : index
    %19 = vector.load %arg10[%c18, %c1_23, %c0_24] : memref<20x18x128xf32, #tpu.memory_space<vmem>>, vector<2x16x128xf32>
    tpu.vector_store %arg10[%c18, %c1_23, %c0_24], %18 {strides = array<i32>} : memref<20x18x128xf32, #tpu.memory_space<vmem>>, vector<2x16x128xf32>,
    %20 = arith.extui %0 : i1 to i32
    %c0_i32_25 = arith.constant 0 : i32
    %21 = arith.cmpi ne, %20, %c0_i32_25 : i32
    scf.if %21 {
      %cst_122 = arith.constant 0.000000e+00 : f32
      %106 = vector.broadcast %cst_122 : f32 to vector<2x18x128xf32>
      %c0_123 = arith.constant 0 : index
      %c0_124 = arith.constant 0 : index
      %c0_125 = arith.constant 0 : index
      %107 = vector.load %arg10[%c0_123, %c0_124, %c0_125] : memref<20x18x128xf32, #tpu.memory_space<vmem>>, vector<2x18x128xf32>
      tpu.vector_store %arg10[%c0_123, %c0_124, %c0_125], %106 {strides = array<i32>} : memref<20x18x128xf32, #tpu.memory_space<vmem>>, vector<2x18x128xf32>,
    } else {
    }
    %22 = arith.extui %1 : i1 to i32
    %c0_i32_26 = arith.constant 0 : i32
    %23 = arith.cmpi ne, %22, %c0_i32_26 : i32
    scf.if %23 {
      %cst_122 = arith.constant 0.000000e+00 : f32
      %106 = vector.broadcast %cst_122 : f32 to vector<2x18x128xf32>
      %c18_123 = arith.constant 18 : index
      %c0_124 = arith.constant 0 : index
      %c0_125 = arith.constant 0 : index
      %107 = vector.load %arg10[%c18_123, %c0_124, %c0_125] : memref<20x18x128xf32, #tpu.memory_space<vmem>>, vector<2x18x128xf32>
      tpu.vector_store %arg10[%c18_123, %c0_124, %c0_125], %106 {strides = array<i32>} : memref<20x18x128xf32, #tpu.memory_space<vmem>>, vector<2x18x128xf32>,
    } else {
    }
    %c0_27 = arith.constant 0 : index
    %c0_28 = arith.constant 0 : index
    %24 = vector.load %arg6[%c0_27, %c0_28] : memref<1x128xf32, #tpu.memory_space<vmem>>, vector<1x128xf32>
    %c0_29 = arith.constant 0 : index
    %c0_30 = arith.constant 0 : index
    %c0_31 = arith.constant 0 : index
    %25 = vector.load %arg10[%c0_29, %c0_30, %c0_31] : memref<20x18x128xf32, #tpu.memory_space<vmem>>, vector<18x16x128xf32>
    %26 = vector.shape_cast %25 : vector<18x16x128xf32> to vector<288x128xf32>
    %c0_32 = arith.constant 0 : index
    %c1_33 = arith.constant 1 : index
    %c0_34 = arith.constant 0 : index
    %27 = vector.load %arg10[%c0_32, %c1_33, %c0_34] : memref<20x18x128xf32, #tpu.memory_space<vmem>>, vector<18x16x128xf32>
    %28 = vector.shape_cast %27 : vector<18x16x128xf32> to vector<288x128xf32>
    %c0_35 = arith.constant 0 : index
    %c2_36 = arith.constant 2 : index
    %c0_37 = arith.constant 0 : index
    %29 = vector.load %arg10[%c0_35, %c2_36, %c0_37] : memref<20x18x128xf32, #tpu.memory_space<vmem>>, vector<18x16x128xf32>
    %30 = vector.shape_cast %29 : vector<18x16x128xf32> to vector<288x128xf32>
    %31 = tpu.concatenate %26, %28, %30 in 1 : vector<288x128xf32>, vector<288x128xf32>, vector<288x128xf32> -> vector<288x384xf32>
    %c0_38 = arith.constant 0 : index
    %c0_39 = arith.constant 0 : index
    %32 = vector.load %arg5[%c0_38, %c0_39] : memref<1152x128xf32, #tpu.memory_space<vmem>>, vector<384x128xf32>
    %cst_40 = arith.constant dense<0.000000e+00> : vector<288x128xf32>
    %33 = tpu.matmul %31, %32, %cst_40 {dimension_numbers = #tpu.dot_dimension_numbers<[1], [0], [0], [1], [0, 0, 1, 1], [], []>} : vector<288x384xf32>, vector<384x128xf32>, vector<288x128xf32> -> vector<288x128xf32>
    %34 = vector.broadcast %24 : vector<1x128xf32> to vector<288x128xf32>
    %35 = arith.addf %34, %33 : vector<288x128xf32>
    %c1_41 = arith.constant 1 : index
    %c0_42 = arith.constant 0 : index
    %c0_43 = arith.constant 0 : index
    %36 = vector.load %arg10[%c1_41, %c0_42, %c0_43] : memref<20x18x128xf32, #tpu.memory_space<vmem>>, vector<18x16x128xf32>
    %37 = vector.shape_cast %36 : vector<18x16x128xf32> to vector<288x128xf32>
    %c1_44 = arith.constant 1 : index
    %c1_45 = arith.constant 1 : index
    %c0_46 = arith.constant 0 : index
    %38 = vector.load %arg10[%c1_44, %c1_45, %c0_46] : memref<20x18x128xf32, #tpu.memory_space<vmem>>, vector<18x16x128xf32>
    %39 = vector.shape_cast %38 : vector<18x16x128xf32> to vector<288x128xf32>
    %c1_47 = arith.constant 1 : index
    %c2_48 = arith.constant 2 : index
    %c0_49 = arith.constant 0 : index
    %40 = vector.load %arg10[%c1_47, %c2_48, %c0_49] : memref<20x18x128xf32, #tpu.memory_space<vmem>>, vector<18x16x128xf32>
    %41 = vector.shape_cast %40 : vector<18x16x128xf32> to vector<288x128xf32>
    %42 = tpu.concatenate %37, %39, %41 in 1 : vector<288x128xf32>, vector<288x128xf32>, vector<288x128xf32> -> vector<288x384xf32>
    %c384 = arith.constant 384 : index
    %c0_50 = arith.constant 0 : index
    %43 = vector.load %arg5[%c384, %c0_50] : memref<1152x128xf32, #tpu.memory_space<vmem>>, vector<384x128xf32>
    %cst_51 = arith.constant dense<0.000000e+00> : vector<288x128xf32>
    %44 = tpu.matmul %42, %43, %cst_51 {dimension_numbers = #tpu.dot_dimension_numbers<[1], [0], [0], [1], [0, 0, 1, 1], [], []>} : vector<288x384xf32>, vector<384x128xf32>, vector<288x128xf32> -> vector<288x128xf32>
    %45 = arith.addf %35, %44 : vector<288x128xf32>
    %c2_52 = arith.constant 2 : index
    %c0_53 = arith.constant 0 : index
    %c0_54 = arith.constant 0 : index
    %46 = vector.load %arg10[%c2_52, %c0_53, %c0_54] : memref<20x18x128xf32, #tpu.memory_space<vmem>>, vector<18x16x128xf32>
    %47 = vector.shape_cast %46 : vector<18x16x128xf32> to vector<288x128xf32>
    %c2_55 = arith.constant 2 : index
    %c1_56 = arith.constant 1 : index
    %c0_57 = arith.constant 0 : index
    %48 = vector.load %arg10[%c2_55, %c1_56, %c0_57] : memref<20x18x128xf32, #tpu.memory_space<vmem>>, vector<18x16x128xf32>
    %49 = vector.shape_cast %48 : vector<18x16x128xf32> to vector<288x128xf32>
    %c2_58 = arith.constant 2 : index
    %c2_59 = arith.constant 2 : index
    %c0_60 = arith.constant 0 : index
    %50 = vector.load %arg10[%c2_58, %c2_59, %c0_60] : memref<20x18x128xf32, #tpu.memory_space<vmem>>, vector<18x16x128xf32>
    %51 = vector.shape_cast %50 : vector<18x16x128xf32> to vector<288x128xf32>
    %52 = tpu.concatenate %47, %49, %51 in 1 : vector<288x128xf32>, vector<288x128xf32>, vector<288x128xf32> -> vector<288x384xf32>
    %c768 = arith.constant 768 : index
    %c0_61 = arith.constant 0 : index
    %53 = vector.load %arg5[%c768, %c0_61] : memref<1152x128xf32, #tpu.memory_space<vmem>>, vector<384x128xf32>
    %cst_62 = arith.constant dense<0.000000e+00> : vector<288x128xf32>
    %54 = tpu.matmul %52, %53, %cst_62 {dimension_numbers = #tpu.dot_dimension_numbers<[1], [0], [0], [1], [0, 0, 1, 1], [], []>} : vector<288x384xf32>, vector<384x128xf32>, vector<288x128xf32> -> vector<288x128xf32>
    %55 = arith.addf %45, %54 : vector<288x128xf32>
    %cst_63 = arith.constant 0.000000e+00 : f32
    %56 = vector.broadcast %cst_63 : f32 to vector<288x128xf32>
    %57 = arith.maximumf %55, %56 : vector<288x128xf32>
    %58 = vector.shape_cast %57 : vector<288x128xf32> to vector<18x16x128xf32>
    %cst_64 = arith.constant 0.000000e+00 : f32
    %59 = vector.broadcast %cst_64 : f32 to vector<18x1x128xf32>
    %c0_65 = arith.constant 0 : index
    %c0_66 = arith.constant 0 : index
    %c0_67 = arith.constant 0 : index
    %60 = vector.load %arg11[%c0_65, %c0_66, %c0_67] : memref<18x18x128xf32, #tpu.memory_space<vmem>>, vector<18x1x128xf32>
    tpu.vector_store %arg11[%c0_65, %c0_66, %c0_67], %59 {strides = array<i32>} : memref<18x18x128xf32, #tpu.memory_space<vmem>>, vector<18x1x128xf32>,
    %c0_68 = arith.constant 0 : index
    %c17_69 = arith.constant 17 : index
    %c0_70 = arith.constant 0 : index
    %61 = vector.load %arg11[%c0_68, %c17_69, %c0_70] : memref<18x18x128xf32, #tpu.memory_space<vmem>>, vector<18x1x128xf32>
    tpu.vector_store %arg11[%c0_68, %c17_69, %c0_70], %59 {strides = array<i32>} : memref<18x18x128xf32, #tpu.memory_space<vmem>>, vector<18x1x128xf32>,
    %c0_71 = arith.constant 0 : index
    %c1_72 = arith.constant 1 : index
    %c0_73 = arith.constant 0 : index
    %62 = vector.load %arg11[%c0_71, %c1_72, %c0_73] : memref<18x18x128xf32, #tpu.memory_space<vmem>>, vector<18x16x128xf32>
    tpu.vector_store %arg11[%c0_71, %c1_72, %c0_73], %58 {strides = array<i32>} : memref<18x18x128xf32, #tpu.memory_space<vmem>>, vector<18x16x128xf32>,
    %63 = arith.extui %0 : i1 to i32
    %c0_i32_74 = arith.constant 0 : i32
    %64 = arith.cmpi ne, %63, %c0_i32_74 : i32
    scf.if %64 {
      %cst_122 = arith.constant 0.000000e+00 : f32
      %106 = vector.broadcast %cst_122 : f32 to vector<1x18x128xf32>
      %c0_123 = arith.constant 0 : index
      %c0_124 = arith.constant 0 : index
      %c0_125 = arith.constant 0 : index
      %107 = vector.load %arg11[%c0_123, %c0_124, %c0_125] : memref<18x18x128xf32, #tpu.memory_space<vmem>>, vector<1x18x128xf32>
      tpu.vector_store %arg11[%c0_123, %c0_124, %c0_125], %106 {strides = array<i32>} : memref<18x18x128xf32, #tpu.memory_space<vmem>>, vector<1x18x128xf32>,
    } else {
    }
    %65 = arith.extui %1 : i1 to i32
    %c0_i32_75 = arith.constant 0 : i32
    %66 = arith.cmpi ne, %65, %c0_i32_75 : i32
    scf.if %66 {
      %cst_122 = arith.constant 0.000000e+00 : f32
      %106 = vector.broadcast %cst_122 : f32 to vector<1x18x128xf32>
      %c17_123 = arith.constant 17 : index
      %c0_124 = arith.constant 0 : index
      %c0_125 = arith.constant 0 : index
      %107 = vector.load %arg11[%c17_123, %c0_124, %c0_125] : memref<18x18x128xf32, #tpu.memory_space<vmem>>, vector<1x18x128xf32>
      tpu.vector_store %arg11[%c17_123, %c0_124, %c0_125], %106 {strides = array<i32>} : memref<18x18x128xf32, #tpu.memory_space<vmem>>, vector<1x18x128xf32>,
    } else {
    }
    %c0_76 = arith.constant 0 : index
    %c0_77 = arith.constant 0 : index
    %67 = vector.load %arg8[%c0_76, %c0_77] : memref<1x128xf32, #tpu.memory_space<vmem>>, vector<1x128xf32>
    %c0_78 = arith.constant 0 : index
    %c0_79 = arith.constant 0 : index
    %c0_80 = arith.constant 0 : index
    %68 = vector.load %arg11[%c0_78, %c0_79, %c0_80] : memref<18x18x128xf32, #tpu.memory_space<vmem>>, vector<16x16x128xf32>
    %69 = vector.shape_cast %68 : vector<16x16x128xf32> to vector<256x128xf32>
    %c0_81 = arith.constant 0 : index
    %c1_82 = arith.constant 1 : index
    %c0_83 = arith.constant 0 : index
    %70 = vector.load %arg11[%c0_81, %c1_82, %c0_83] : memref<18x18x128xf32, #tpu.memory_space<vmem>>, vector<16x16x128xf32>
    %71 = vector.shape_cast %70 : vector<16x16x128xf32> to vector<256x128xf32>
    %c0_84 = arith.constant 0 : index
    %c2_85 = arith.constant 2 : index
    %c0_86 = arith.constant 0 : index
    %72 = vector.load %arg11[%c0_84, %c2_85, %c0_86] : memref<18x18x128xf32, #tpu.memory_space<vmem>>, vector<16x16x128xf32>
    %73 = vector.shape_cast %72 : vector<16x16x128xf32> to vector<256x128xf32>
    %74 = tpu.concatenate %69, %71, %73 in 1 : vector<256x128xf32>, vector<256x128xf32>, vector<256x128xf32> -> vector<256x384xf32>
    %c0_87 = arith.constant 0 : index
    %c0_88 = arith.constant 0 : index
    %75 = vector.load %arg7[%c0_87, %c0_88] : memref<1152x128xf32, #tpu.memory_space<vmem>>, vector<384x128xf32>
    %cst_89 = arith.constant dense<0.000000e+00> : vector<256x128xf32>
    %76 = tpu.matmul %74, %75, %cst_89 {dimension_numbers = #tpu.dot_dimension_numbers<[1], [0], [0], [1], [0, 0, 1, 1], [], []>} : vector<256x384xf32>, vector<384x128xf32>, vector<256x128xf32> -> vector<256x128xf32>
    %77 = vector.broadcast %67 : vector<1x128xf32> to vector<256x128xf32>
    %78 = arith.addf %77, %76 : vector<256x128xf32>
    %c1_90 = arith.constant 1 : index
    %c0_91 = arith.constant 0 : index
    %c0_92 = arith.constant 0 : index
    %79 = vector.load %arg11[%c1_90, %c0_91, %c0_92] : memref<18x18x128xf32, #tpu.memory_space<vmem>>, vector<16x16x128xf32>
    %80 = vector.shape_cast %79 : vector<16x16x128xf32> to vector<256x128xf32>
    %c1_93 = arith.constant 1 : index
    %c1_94 = arith.constant 1 : index
    %c0_95 = arith.constant 0 : index
    %81 = vector.load %arg11[%c1_93, %c1_94, %c0_95] : memref<18x18x128xf32, #tpu.memory_space<vmem>>, vector<16x16x128xf32>
    %82 = vector.shape_cast %81 : vector<16x16x128xf32> to vector<256x128xf32>
    %c1_96 = arith.constant 1 : index
    %c2_97 = arith.constant 2 : index
    %c0_98 = arith.constant 0 : index
    %83 = vector.load %arg11[%c1_96, %c2_97, %c0_98] : memref<18x18x128xf32, #tpu.memory_space<vmem>>, vector<16x16x128xf32>
    %84 = vector.shape_cast %83 : vector<16x16x128xf32> to vector<256x128xf32>
    %85 = tpu.concatenate %80, %82, %84 in 1 : vector<256x128xf32>, vector<256x128xf32>, vector<256x128xf32> -> vector<256x384xf32>
    %c384_99 = arith.constant 384 : index
    %c0_100 = arith.constant 0 : index
    %86 = vector.load %arg7[%c384_99, %c0_100] : memref<1152x128xf32, #tpu.memory_space<vmem>>, vector<384x128xf32>
    %cst_101 = arith.constant dense<0.000000e+00> : vector<256x128xf32>
    %87 = tpu.matmul %85, %86, %cst_101 {dimension_numbers = #tpu.dot_dimension_numbers<[1], [0], [0], [1], [0, 0, 1, 1], [], []>} : vector<256x384xf32>, vector<384x128xf32>, vector<256x128xf32> -> vector<256x128xf32>
    %88 = arith.addf %78, %87 : vector<256x128xf32>
    %c2_102 = arith.constant 2 : index
    %c0_103 = arith.constant 0 : index
    %c0_104 = arith.constant 0 : index
    %89 = vector.load %arg11[%c2_102, %c0_103, %c0_104] : memref<18x18x128xf32, #tpu.memory_space<vmem>>, vector<16x16x128xf32>
    %90 = vector.shape_cast %89 : vector<16x16x128xf32> to vector<256x128xf32>
    %c2_105 = arith.constant 2 : index
    %c1_106 = arith.constant 1 : index
    %c0_107 = arith.constant 0 : index
    %91 = vector.load %arg11[%c2_105, %c1_106, %c0_107] : memref<18x18x128xf32, #tpu.memory_space<vmem>>, vector<16x16x128xf32>
    %92 = vector.shape_cast %91 : vector<16x16x128xf32> to vector<256x128xf32>
    %c2_108 = arith.constant 2 : index
    %c2_109 = arith.constant 2 : index
    %c0_110 = arith.constant 0 : index
    %93 = vector.load %arg11[%c2_108, %c2_109, %c0_110] : memref<18x18x128xf32, #tpu.memory_space<vmem>>, vector<16x16x128xf32>
    %94 = vector.shape_cast %93 : vector<16x16x128xf32> to vector<256x128xf32>
    %95 = tpu.concatenate %90, %92, %94 in 1 : vector<256x128xf32>, vector<256x128xf32>, vector<256x128xf32> -> vector<256x384xf32>
    %c768_111 = arith.constant 768 : index
    %c0_112 = arith.constant 0 : index
    %96 = vector.load %arg7[%c768_111, %c0_112] : memref<1152x128xf32, #tpu.memory_space<vmem>>, vector<384x128xf32>
    %cst_113 = arith.constant dense<0.000000e+00> : vector<256x128xf32>
    %97 = tpu.matmul %95, %96, %cst_113 {dimension_numbers = #tpu.dot_dimension_numbers<[1], [0], [0], [1], [0, 0, 1, 1], [], []>} : vector<256x384xf32>, vector<384x128xf32>, vector<256x128xf32> -> vector<256x128xf32>
    %98 = arith.addf %88, %97 : vector<256x128xf32>
    %99 = vector.shape_cast %98 : vector<256x128xf32> to vector<16x16x128xf32>
    %c0_114 = arith.constant 0 : index
    %c0_115 = arith.constant 0 : index
    %c0_116 = arith.constant 0 : index
    %c0_117 = arith.constant 0 : index
    %100 = vector.load %arg3[%c0_114, %c0_115, %c0_116, %c0_117] : memref<1x16x16x128xf32, #tpu.memory_space<vmem>>, vector<1x16x16x128xf32>
    %101 = vector.shape_cast %100 : vector<1x16x16x128xf32> to vector<16x16x128xf32>
    %102 = arith.addf %99, %101 : vector<16x16x128xf32>
    %c0_118 = arith.constant 0 : index
    %c0_119 = arith.constant 0 : index
    %c0_120 = arith.constant 0 : index
    %c0_121 = arith.constant 0 : index
    %103 = vector.load %arg9[%c0_118, %c0_119, %c0_120, %c0_121] : memref<1x16x16x128xf32, #tpu.memory_space<vmem>>, vector<1x16x16x128xf32>
    %104 = vector.shape_cast %103 : vector<1x16x16x128xf32> to vector<16x16x128xf32>
    %105 = vector.shape_cast %102 : vector<16x16x128xf32> to vector<1x16x16x128xf32>
    tpu.vector_store %arg9[%c0_118, %c0_119, %c0_120, %c0_121], %105 {strides = array<i32>} : memref<1x16x16x128xf32, #tpu.memory_space<vmem>>, vector<1x16x16x128xf32>,
    return
  }
  func.func @transform_0(%arg0: i32, %arg1: i32) -> (i32, i32, i32, i32) {
    %c8_i32 = arith.constant 8 : i32
    %0 = arith.muli %arg1, %c8_i32 : i32
    %c1_i32 = arith.constant 1 : i32
    %1 = arith.subi %0, %c1_i32 : i32
    %c0_i32 = arith.constant 0 : i32
    %2 = arith.maxsi %1, %c0_i32 : i32
    %c0_i32_0 = arith.constant 0 : i32
    %c0_i32_1 = arith.constant 0 : i32
    %c0_i32_2 = arith.constant 0 : i32
    return %arg0, %2, %c0_i32_0, %c0_i32_1 : i32, i32, i32, i32
  }
  func.func @transform_1(%arg0: i32, %arg1: i32) -> (i32, i32, i32, i32) {
    %c0_i32 = arith.constant 0 : i32
    %c0_i32_0 = arith.constant 0 : i32
    %c0_i32_1 = arith.constant 0 : i32
    return %arg0, %arg1, %c0_i32, %c0_i32_0 : i32, i32, i32, i32
  }
  func.func @transform_2(%arg0: i32, %arg1: i32) -> (i32, i32, i32, i32) {
    %c1_i32 = arith.constant 1 : i32
    %0 = arith.addi %arg1, %c1_i32 : i32
    %c8_i32 = arith.constant 8 : i32
    %1 = arith.muli %0, %c8_i32 : i32
    %c15_i32 = arith.constant 15 : i32
    %2 = arith.minsi %1, %c15_i32 : i32
    %c0_i32 = arith.constant 0 : i32
    %c0_i32_0 = arith.constant 0 : i32
    %c0_i32_1 = arith.constant 0 : i32
    return %arg0, %2, %c0_i32, %c0_i32_0 : i32, i32, i32, i32
  }
  func.func @transform_3(%arg0: i32, %arg1: i32) -> (i32, i32) {
    %c0_i32 = arith.constant 0 : i32
    %c0_i32_0 = arith.constant 0 : i32
    %c0_i32_1 = arith.constant 0 : i32
    return %c0_i32, %c0_i32_0 : i32, i32
  }
  func.func @transform_4(%arg0: i32, %arg1: i32) -> (i32, i32) {
    %c0_i32 = arith.constant 0 : i32
    %c0_i32_0 = arith.constant 0 : i32
    %c0_i32_1 = arith.constant 0 : i32
    return %c0_i32, %c0_i32_0 : i32, i32
  }
  func.func @transform_5(%arg0: i32, %arg1: i32) -> (i32, i32) {
    %c0_i32 = arith.constant 0 : i32
    %c0_i32_0 = arith.constant 0 : i32
    %c0_i32_1 = arith.constant 0 : i32
    return %c0_i32, %c0_i32_0 : i32, i32
  }
  func.func @transform_6(%arg0: i32, %arg1: i32) -> (i32, i32) {
    %c0_i32 = arith.constant 0 : i32
    %c0_i32_0 = arith.constant 0 : i32
    %c0_i32_1 = arith.constant 0 : i32
    return %c0_i32, %c0_i32_0 : i32, i32
  }
  func.func @transform_7(%arg0: i32, %arg1: i32) -> (i32, i32, i32, i32) {
    %c0_i32 = arith.constant 0 : i32
    %c0_i32_0 = arith.constant 0 : i32
    %c0_i32_1 = arith.constant 0 : i32
    return %arg0, %arg1, %c0_i32, %c0_i32_0 : i32, i32, i32, i32
  }
}

</mosaic_0001>

<bundles_post_ra>
// kernel: tpu_custom_call.1
= control target key start
LH: loop header
LB: loop body
LE: loop exit
PB: predicated region body
PF: predicated region fallthrough
CT: control target
= control target key end

     0   :  { %s9405_s0 = inlined_call_operand.hbm [shape: f32[2,32,16,128], index: 0, kind: input, shape index: {}]   ;;  %s9406_s1 = inlined_call_operand.hbm [shape: f32[2,32,16,128], index: 1, kind: input, shape index: {}]   ;;  %s9407_s2 = inlined_call_operand.hbm [shape: f32[2,32,16,128], index: 2, kind: input, shape index: {}]   ;;  %s9408_s3 = inlined_call_operand.hbm [shape: f32[1152,128], index: 3, kind: input, shape index: {}]   ;;  %s9409_s4 = inlined_call_operand.vmem [shape: f32[1,128], index: 4, kind: input, shape index: {}]   ;;  %s9410_s5 = inlined_call_operand.hbm [shape: f32[1152,128], index: 5, kind: input, shape index: {}]   ;;  %s9411_s6 = inlined_call_operand.vmem [shape: f32[1,128], index: 6, kind: input, shape index: {}]   ;;  %s9412_s7 = inlined_call_operand.hbm [shape: f32[2,32,16,128], index: 7, kind: output, shape index: {}]  }
   0x1   :  { %9462 = sst [smem:[#allocation46_spill]] %s9406_s1 }
   0x2   :  { %9463 = sst [smem:[#allocation47_spill]] %s9407_s2 }
   0x3   :  { %9464 = sst [smem:[#allocation48_spill]] %s9408_s3 }
   0x4   :  { %9465 = sst [smem:[#allocation49_spill]] %s9409_s4 }
   0x5   :  { %9466 = sst [smem:[#allocation50_spill]] %s9410_s5 }
   0x6   :  { %9467 = sst [smem:[#allocation51_spill]] %s9411_s6 }
   0x7   :  { %9468 = sst [smem:[#allocation52_spill]] %s9412_s7 }
   0x8   :  { %12 = vsyncpa [#allocation5], 0 }
   0x9   :  { %14 = vsyncpa [#allocation5 + $0x1], 0 }
   0xa   :  { %15 = vsyncpa [#allocation8], 0 }
   0xb   :  { %17 = vsyncpa [#allocation8 + $0x1], 0 }
   0xc   :  { %18 = vsyncpa [#allocation11], 0 }
   0xd   :  { %19 = vsyncpa [#allocation6], 0 }
   0xe   :  { %21 = vsyncpa [#allocation6 + $0x1], 0  ;;  %s6850_s24 = smov 0   ;;  %s6852_s25 = smov 0  }
   0xf   :  { %s6854_s26 = smov 0   ;;  %s6856_s27 = smov 0  }
  0x10   :  { %s6858_s28 = smov 0   ;;  %s6860_s29 = smov 0  }
  0x11   :  { %s6862_s30 = smov 0   ;;  %s6864_s8 = smov 0  }
  0x12   :  { %s6866_s9 = smov 0   ;;  %s6868_s10 = smov 0  }
  0x13   :  { %s6870_s11 = smov 0   ;;  %s6872_s12 = smov 0  }
  0x14   :  { %s6874_s13 = smov 0   ;;  %s6876_s14 = smov 0  }
  0x15 LB: > { %9469 = sst [smem:[#allocation19_spill]] %s6752_s27  ;;  %s6921_s15 = sadd.s32 4294967295, %s6792_s14   ;;  %s6792_s14 = sphi %s6876_s14, %s27_s14   ;;  %s6788_s13 = sphi %s6874_s13, %s9612_s13   ;;  %s6784_s12 = sphi %s6872_s12, %s9621_s12   ;;  %s6780_s11 = sphi %s6870_s11, %s9610_s11   ;;  %s6776_s10 = sphi %s6868_s10, %s9609_s10   ;;  %s6772_s9 = sphi %s6866_s9, %s9620_s9   ;;  %s6768_s8 = sphi %s6864_s8, %s9619_s8   ;;  %s6764_s30 = sphi %s6862_s30, %s9618_s30   ;;  %s6760_s29 = sphi %s6860_s29, %s9617_s29   ;;  %s6756_s28 = sphi %s6858_s28, %s9616_s28   ;;  %s6752_s27 = sphi %s6856_s27, %s9606_s27   ;;  %s6748_s26 = sphi %s6854_s26, %s9615_s26   ;;  %s6744_s25 = sphi %s6852_s25, %s9614_s25   ;;  %s6740_s24 = sphi %s6850_s24, %s9613_s24  }
  0x16   : > { %9470 = sst [smem:[#allocation20_spill]] %s6756_s28  ;;  %p4991_p0 = scmp.ge.s32.totalorder %s6792_s14, 1 }
  0x17   : > { %9471 = sst [smem:[#allocation21_spill]] %s6768_s8  ;;  %p9414_p1 = scmp.eq.s32.totalorder %s6921_s15, 0 }
  0x18   : > { %9472 = sst [smem:[#allocation22_spill]] %s6776_s10  ;;  %p256_p3 = scmp.lt.s32.totalorder %s6792_s14, 5 }
  0x19   : > { %9473 = sst [smem:[#allocation23_spill]] %s6780_s11  ;;  %s6794_s17 = smov [#allocation10]  }
  0x1a   : > { %9474 = sst [smem:[#allocation24_spill]] %s6784_s12  ;;  %p6927_p4 = pnand %p4991_p0, %p256_p3 }
  0x1b   : > { %9475 = sst [smem:[#allocation25_spill]] %s6788_s13  ;;  %s268_s18 = sshll.u32 %s6794_s17, 4  ;;  %s269_s18 = int_to_ptr.vmem [resolvable:$true] %s268_s18 }
  0x1c   : > { %s9476_s16 = scalar_select %p6927_p4, 1, 0 }
  0x1d   : > { %p6337_p5 = pneg %p6927_p4  ;;  %s9479_s3 = sld [smem:[#allocation48_spill]] }
  0x1e   : > { %9477 = sst [smem:[#allocation26_spill]] %s9476_s16 }
  0x1f   : > { %p6935_p6 = pnand %p6337_p5, %p9414_p1 }
  0x21   : > { %p9434_p8 = pneg %p6935_p6 }
  0x23   : > { %s6488_s22 = scalar_lea.hbm %s9479_s3, 18432 }
  0x24   : > { %p6489_p7 = scmp.ne.s32.totalorder %s9479_s3, %s6488_s22  ;;  %p6495_p11 = scmp.lt.u32.totalorder %s6488_s22, %s9479_s3 }
  0x26   : > { %p6491_p9 = pnand %p9434_p8, %p6489_p7 }
  0x28   : > { %p6492_p10 = pneg %p6491_p9 }
  0x2a   : > { %p6497_p12 = pnand %p6495_p11, %p6492_p10 }
  0x2c   : > { %6500 = shalt.err (!%p6497_p12)
}
  0x2d   : > { %s6501_s20 = scalar_lea.vmem %s269_s18, 18432  ;;  %p6509_p5 = scmp.lt.s32.totalorder %s269_s18, %s269_s18 }
  0x2e   : > { %p6502_p13 = scmp.ne.s32.totalorder %s269_s18, %s6501_s20  ;;  %p6510_p1 = scmp.lt.s32.totalorder %s6501_s20, %s6501_s20 }
  0x30   : > { %p6504_p0 = pnand %p6502_p13, %p9434_p8  ;;  %p6511_p2 = por %p6510_p1, %p6509_p5 }
  0x32   : > { %p6505_p3 = pneg %p6504_p0 }
  0x34   : > { %p6512_p4 = pnand %p6511_p2, %p6505_p3 }
  0x36   : > { %6515 = shalt.err (!%p6512_p4)
}
  0x37   : > { %s9416_s7 = smov 128   ;;  %s9418_s11 = smov 8  }
  0x38   : > { %6340 = dma.hbm_to_vmem [thread:$0]  (!%p6935_p6), %s9479_s3, 18432, %s269_s18, [#allocation11], %s9416_s7, %s9416_s7, %s9418_s11  }
  0x39   : > { %s4984_s23 = sadd.s32 4294967294, %s6792_s14   ;;  %s36_s17 = sadd.s32 1, %s6784_s12 }
  0x3a   : > { %p37_p1 = scmp.ge.s32.totalorder %s36_s17, 2  ;;  %s39_s20 = sadd.s32 1, %s6788_s13 }
  0x3b   : > { %p9433_p2 = scmp.eq.s32.totalorder %s6792_s14, 0  ;;  %p91_p4 = scmp.ne.s32.totalorder %s6760_s29, %s6756_s28 }
  0x3c   : > { %s9623_s17 = smov (%p37_p1, %s36_s17), 0  ;;  %s9625_s20 = smov (!%p37_p1, %s39_s20), %s6788_s13 }
  0x3d   : > { %9480 = sst [smem:[#allocation27_spill]] %s9623_s17  ;;  %p97_p7 = scmp.ne.s32.totalorder %s6756_s28, %s6752_s27 }
  0x3e   : > { %p249_p9 = scmp.eq.s32.totalorder %s4984_s23, 3  ;;  %p6982_p10 = por %p91_p4, %p9433_p2 }
  0x3f   : > { %p9482_p11 = scmp.eq.s32.totalorder %s6921_s15, 3  ;;  %p9485_p13 = scmp.eq.s32.totalorder %s6921_s15, 0 }
  0x40   : > { %p6998_p3 = por %p249_p9, %p97_p7  ;;  %p9432_p5 = scmp.lt.s32.totalorder %s6792_s14, 4 }
  0x41   : > { %p6988_p12 = por %p9482_p11, %p91_p4  ;;  %p6994_p0 = por %p97_p7, %p9485_p13 }
  0x42   : > { %s9488_s6 = scalar_select %p6998_p3, 1, 0 }
  0x43   : > { %s9483_s21 = scalar_select %p6988_p12, 1, 0 }
  0x44   : > { %s9486_s22 = scalar_select %p6994_p0, 1, 0 }
  0x45   : > { %9484 = sst [smem:[#allocation28_spill]] %s9483_s21  ;;  %s7004_s23 = sshll.u32 %s6788_s13, 6 }
  0x46   : > { %9487 = sst [smem:[#allocation29_spill]] %s9486_s22  ;;  %s329_s4 = sand.u32 1, %s6792_s14  }
  0x47   : > { %9489 = sst [smem:[#allocation30_spill]] %s9488_s6  ;;  %s331_s7 = sand.u32 1, %s6760_s29  }
  0x48   : > { %s5002_s11 = sshll.u32 %s331_s7, 8  ;;  %s5038_s3 = sshll.u32 %s6784_s12, 5 }
  0x49   : > { %s340_s27 = sadd.s32 %s5038_s3, %s7004_s23  ;;  %s333_s10 = scalar_lea.vmem [#allocation7], %s5002_s11 }
  0x4a   : > { %s343_s21 = sshll.u32 %s333_s10, 4  ;;  %s5006_s28 = sshll.u32 %s340_s27, 7  ;;  %s7010_s21 = int_to_ptr.vmem [resolvable:$true] %s343_s21 }
  0x4b   : > { %s9490_s1 = sld [smem:[#allocation46_spill]]  ;;  %p7021_p1 = pnand %p9432_p5, %p6982_p10 }
  0x4c   : > { %s6797_s3 = smov [#allocation12]   ;;  %s7027_s10 = scalar_lea.sflag [#allocation8], %s329_s4 }
  0x4d   : > { %s7025_s27 = sshll.u32 %s6797_s3, 4  ;;  %9492 = sst [smem:[#allocation31_spill]] %s7027_s10  ;;  %s285_s27 = int_to_ptr.vmem [resolvable:$true] %s7025_s27 }
  0x4e   : > { %p6518_p7 = pneg %p7021_p1 }
  0x51   : > { %s7015_s2 = scalar_lea.hbm %s9490_s1, %s5006_s28  ;;  %s6521_s18 = scalar_lea.hbm %s9490_s1, 16384 }
  0x52   : > { %s6516_s16 = scalar_lea.hbm %s7015_s2, 4096  ;;  %p6522_p10 = scmp.lt.u32.totalorder %s7015_s2, %s9490_s1 }
  0x53   : > { %p6517_p4 = scmp.ne.s32.totalorder %s7015_s2, %s6516_s16  ;;  %p6523_p13 = scmp.lt.u32.totalorder %s6521_s18, %s6516_s16 }
  0x54   : > { %p6525_p2 = scmp.lt.u32.totalorder %s6516_s16, %s7015_s2 }
  0x55   : > { %p6519_p9 = pnand %p6518_p7, %p6517_p4  ;;  %p6524_p5 = por %p6523_p13, %p6522_p10 }
  0x57   : > { %p6520_p11 = pneg %p6519_p9  ;;  %p6526_p8 = por %p6525_p2, %p6524_p5 }
  0x59   : > { %p6527_p3 = pnand %p6526_p8, %p6520_p11 }
  0x5b   : > { %6530 = shalt.err (!%p6527_p3)
}
  0x5c   : > { %s6531_s4 = scalar_lea.vmem %s7010_s21, 4096  ;;  %s6798_s3 = smov [#allocation7]  }
  0x5d   : > { %p6532_p4 = scmp.ne.s32.totalorder %s7010_s21, %s6531_s4  ;;  %s6536_s28 = sshll.u32 %s6798_s3, 4  ;;  %s6537_s28 = int_to_ptr.vmem [resolvable:$false] %s6536_s28 }
  0x5e   : > { %s6538_s6 = scalar_lea.vmem %s6537_s28, 8192  ;;  %p6539_p0 = scmp.lt.s32.totalorder %s7010_s21, %s6537_s28 }
  0x5f   : > { %p6534_p9 = pnand %p6532_p4, %p6518_p7  ;;  %p6540_p10 = scmp.lt.s32.totalorder %s6538_s6, %s6531_s4 }
  0x61   : > { %p6535_p12 = pneg %p6534_p9  ;;  %p6541_p13 = por %p6540_p10, %p6539_p0 }
  0x63   : > { %p6542_p2 = pnand %p6541_p13, %p6535_p12 }
  0x65   : > { %6545 = shalt.err (!%p6542_p2)
}
  0x66   : > { %s9493_s16 = smov 8   ;;  %s9494_s11 = smov 128  }
  0x67   : > { %6350 = dma.hbm_to_vmem [thread:$0]  (!%p7021_p1), %s7015_s2, 4096, %s7010_s21, %s7027_s10, %s9494_s11, %s9494_s11, %s9493_s16  }
  0x68   : > { %s9495_s5 = sld [smem:[#allocation50_spill]]  ;;  %p9496_p12 = pneg %p6935_p6 }
  0x6e   : > { %s6546_s3 = scalar_lea.hbm %s9495_s5, 18432 }
  0x6f   : > { %p6547_p8 = scmp.ne.s32.totalorder %s9495_s5, %s6546_s3  ;;  %p6553_p5 = scmp.lt.u32.totalorder %s6546_s3, %s9495_s5 }
  0x71   : > { %p6549_p0 = pnand %p6547_p8, %p9496_p12 }
  0x73   : > { %p6550_p3 = pneg %p6549_p0 }
  0x75   : > { %p6555_p7 = pnand %p6553_p5, %p6550_p3 }
  0x77   : > { %6558 = shalt.err (!%p6555_p7)
}
  0x78   : > { %s6559_s2 = scalar_lea.vmem %s285_s27, 18432  ;;  %p9497_p11 = pmov %p9496_p12 }
  0x79   : > { %p6560_p1 = scmp.ne.s32.totalorder %s285_s27, %s6559_s2  ;;  %p6567_p10 = scmp.lt.s32.totalorder %s285_s27, %s285_s27 }
  0x7a   : > { %p6568_p13 = scmp.lt.s32.totalorder %s6559_s2, %s6559_s2 }
  0x7b   : > { %p6562_p4 = pnand %p6560_p1, %p9497_p11 }
  0x7c   : > { %p6569_p2 = por %p6568_p13, %p6567_p10 }
  0x7d   : > { %p6563_p9 = pneg %p6562_p4 }
  0x7f   : > { %p6570_p8 = pnand %p6569_p2, %p6563_p9 }
  0x81   : > { %6573 = shalt.err (!%p6570_p8)
}
  0x82   : > { %6343 = dma.hbm_to_vmem [thread:$0]  (!%p6935_p6), %s9495_s5, 18432, %s285_s27, [#allocation11], %s9494_s11, %s9494_s11, %s9493_s16  }
  0x83   : > { %p41_p12 = scmp.ge.s32.totalorder %s9625_s20, 2  ;;  %s4985_s19 = sshll.u32 %s6784_s12, 3 }
  0x84   : > { %s4986_s22 = sadd.s32 4294967295, %s4985_s19  ;;  %s4987_s3 = sshll.u32 %s9623_s17, 3 }
  0x85   : > { %s9627_s20 = smov (%p41_p12, %s9625_s20), 0  ;;  %p45_p0 = scmp.gt.s32.totalorder %s4986_s22, 0 }
  0x86   : > { %9498 = sst [smem:[#allocation32_spill]] %s9627_s20  ;;  %s4988_s4 = sadd.s32 4294967295, %s4987_s3 }
  0x87   : > { %p49_p3 = scmp.gt.s32.totalorder %s4988_s4, 0  ;;  %s7090_s28 = ssub.s32 %s6788_s13, %s9627_s20 }
  0x88   : > { %s9629_s22 = smov (!%p45_p0, %s4986_s22), 0  ;;  %s56_s27 = sadd.s32 1, %s6772_s9 }
  0x89   : > { %s9631_s4 = smov (!%p49_p3, %s4988_s4), 0  ;;  %p63_p6 = scmp.ne.s32.totalorder %s6772_s9, %s6768_s8 }
  0x8a   : > { %s52_s7 = ssub.s32 %s9629_s22, %s9631_s4  ;;  %p69_p5 = scmp.ne.s32.totalorder %s6768_s8, %s6764_s30 }
  0x8b   : > { %s53_s6 = sor.u32 %s52_s7, %s7090_s28  ;;  %p9499_p7 = scmp.eq.s32.totalorder %s6792_s14, 0 }
  0x8c   : > { %p54_p11 = scmp.eq.s32.totalorder %s53_s6, 0  ;;  %p9501_p4 = scmp.eq.s32.totalorder %s6921_s15, 0 }
  0x8d   : > { %p7100_p1 = por %p9499_p7, %p63_p6  ;;  %s9504_s18 = ssub.s32 %s6784_s12, %s9623_s17 }
  0x8e   : > { %p7106_p9 = por %p9501_p4, %p69_p5  ;;  %s81_s1 = sor.u32 %s9504_s18, %s7090_s28 }
  0x8f   : > { %s7114_s5 = sadd.s32 8, %s4985_s19  ;;  %p82_p10 = scmp.eq.s32.totalorder %s81_s1, 0 }
  0x90   : > { %s9502_s21 = scalar_select %p7106_p9, 1, 0 }
  0x91   : > { %s7117_s30 = scalar_select %p54_p11, %s6772_s9, %s56_s27  }
  0x92   : > { %9503 = sst [smem:[#allocation33_spill]] %s9502_s21  ;;  %s7120_s4 = sadd.s32 8, %s4987_s3 }
  0x93   : > { %s301_s7 = sand.u32 1, %s6772_s9   ;;  %s9505_s6 = sadd.s32 1, %s6760_s29 }
  0x94   : > { %s7126_s20 = scalar_select %p82_p10, %s6760_s29, %s9505_s6  }
  0x95   : > { %s4995_s13 = sshll.u32 %s301_s7, 5  ;;  %s5037_s17 = sshll.u32 %s9629_s22, 2 }
  0x96   : > { %s316_s18 = sadd.s32 %s5037_s17, %s7004_s23  ;;  %s305_s12 = scalar_lea.vmem [#allocation4], %s4995_s13 }
  0x97   : > { %s5001_s19 = sshll.u32 %s316_s18, 7  ;;  %s319_s21 = sshll.u32 %s305_s12, 4  ;;  %s7135_s21 = int_to_ptr.vmem [resolvable:$true] %s319_s21 }
  0x98   : > { %s7133_s27 = scalar_lea.hbm %s9405_s0, %s5001_s19  ;;  %p9506_p8 = scmp.lt.s32.totalorder %s6792_s14, 4 }
  0x99   : > { %s7145_s12 = scalar_lea.sflag [#allocation5], %s301_s7  ;;  %s6574_s13 = scalar_lea.hbm %s7133_s27, 512 }
  0x9a   : > { %p7141_p12 = pnand %p9506_p8, %p7100_p1  ;;  %p6575_p0 = scmp.ne.s32.totalorder %s7133_s27, %s6574_s13 }
  0x9b   : > { %s6579_s10 = scalar_lea.hbm %s9405_s0, 16384  ;;  %p6580_p7 = scmp.lt.u32.totalorder %s7133_s27, %s9405_s0 }
  0x9c   : > { %p6576_p3 = pneg %p7141_p12  ;;  %p6581_p1 = scmp.lt.u32.totalorder %s6579_s10, %s6574_s13 }
  0x9d   : > { %p6583_p4 = scmp.lt.u32.totalorder %s6574_s13, %s7133_s27 }
  0x9e   : > { %p6577_p6 = pnand %p6576_p3, %p6575_p0  ;;  %p6582_p11 = por %p6581_p1, %p6580_p7 }
  0xa0   : > { %p6578_p5 = pneg %p6577_p6  ;;  %p6584_p10 = por %p6583_p4, %p6582_p11 }
  0xa2   : > { %p6585_p8 = pnand %p6584_p10, %p6578_p5 }
  0xa4   : > { %6588 = shalt.err (!%p6585_p8)
}
  0xa5   : > { %s6589_s2 = scalar_lea.vmem %s7135_s21, 512  ;;  %s6799_s7 = smov [#allocation4]  }
  0xa6   : > { %p6590_p0 = scmp.ne.s32.totalorder %s7135_s21, %s6589_s2  ;;  %s6594_s6 = sshll.u32 %s6799_s7, 4  ;;  %s6595_s6 = int_to_ptr.vmem [resolvable:$false] %s6594_s6 }
  0xa7   : > { %s6596_s18 = scalar_lea.vmem %s6595_s6, 1024  ;;  %p6597_p13 = scmp.lt.s32.totalorder %s7135_s21, %s6595_s6 }
  0xa8   : > { %p6592_p6 = pnand %p6590_p0, %p6576_p3  ;;  %p6598_p7 = scmp.lt.s32.totalorder %s6596_s18, %s6589_s2 }
  0xaa   : > { %p6593_p2 = pneg %p6592_p6  ;;  %p6599_p1 = por %p6598_p7, %p6597_p13 }
  0xac   : > { %p6600_p11 = pnand %p6599_p1, %p6593_p2 }
  0xae   : > { %6603 = shalt.err (!%p6600_p11)
}
  0xaf   : > { %6347 = dma.hbm_to_vmem [thread:$0]  (!%p7141_p12), %s7133_s27, 512, %s7135_s21, %s7145_s12, %s9494_s11, %s9494_s11, %s9493_s16  }
  0xb0   : > { %p9508_p13 = scmp.lt.s32.totalorder %s7114_s5, 15  ;;  %p9509_p2 = scmp.lt.s32.totalorder %s7120_s4, 15 }
  0xb1   : > { %s120_s19 = sadd.s32 1, %s6748_s26  ;;  %p127_p3 = scmp.ne.s32.totalorder %s6748_s26, %s6744_s25 }
  0xb2   : > { %s9633_s5 = smov (!%p9508_p13, %s7114_s5), 15  ;;  %s9635_s4 = smov (!%p9509_p2, %s7120_s4), 15 }
  0xb3   : > { %s116_s1 = ssub.s32 %s9633_s5, %s9635_s4  ;;  %p133_p5 = scmp.ne.s32.totalorder %s6744_s25, %s6740_s24 }
  0xb4   : > { %s117_s13 = sor.u32 %s116_s1, %s7090_s28  ;;  %p9510_p4 = scmp.eq.s32.totalorder %s6792_s14, 0 }
  0xb5   : > { %p118_p8 = scmp.eq.s32.totalorder %s117_s13, 0  ;;  %p9512_p0 = scmp.eq.s32.totalorder %s6921_s15, 0 }
  0xb6   : > { %p7190_p10 = por %p127_p3, %p9510_p4  ;;  %s355_s27 = sand.u32 1, %s6748_s26  }
  0xb7   : > { %p7196_p6 = por %p133_p5, %p9512_p0  ;;  %s5041_s12 = sshll.u32 %s9633_s5, 2 }
  0xb8   : > { %s7202_s17 = scalar_select %p118_p8, %s6748_s26, %s120_s19  }
  0xb9   : > { %s9513_s21 = scalar_select %p7196_p6, 1, 0 }
  0xba   : > { %s5007_s4 = sshll.u32 %s355_s27, 5  ;;  %s368_s10 = sadd.s32 %s5041_s12, %s7004_s23 }
  0xbb   : > { %s5012_s24 = sshll.u32 %s368_s10, 7  ;;  %s9514_s3 = sld [smem:[#allocation47_spill]] }
  0xbc   : > { %s357_s7 = scalar_lea.vmem [#allocation9], %s5007_s4  ;;  %p9515_p12 = scmp.lt.s32.totalorder %s6792_s14, 4 }
  0xbd   : > { %s371_s6 = sshll.u32 %s357_s7, 4  ;;  %s7210_s6 = int_to_ptr.vmem [resolvable:$true] %s371_s6 }
  0xbe   : > { %p7216_p7 = pnand %p9515_p12, %p7190_p10 }
  0xc0   : > { %p6606_p11 = pneg %p7216_p7 }
  0xc1   : > { %s7208_s2 = scalar_lea.hbm %s9514_s3, %s5012_s24  ;;  %s6609_s1 = scalar_lea.hbm %s9514_s3, 16384 }
  0xc2   : > { %s6604_s23 = scalar_lea.hbm %s7208_s2, 512  ;;  %p6610_p3 = scmp.lt.u32.totalorder %s7208_s2, %s9514_s3 }
  0xc3   : > { %p6605_p1 = scmp.ne.s32.totalorder %s7208_s2, %s6604_s23  ;;  %p6611_p5 = scmp.lt.u32.totalorder %s6609_s1, %s6604_s23 }
  0xc4   : > { %p6613_p10 = scmp.lt.u32.totalorder %s6604_s23, %s7208_s2 }
  0xc5   : > { %p6607_p13 = pnand %p6606_p11, %p6605_p1  ;;  %p6612_p4 = por %p6611_p5, %p6610_p3 }
  0xc7   : > { %p6608_p2 = pneg %p6607_p13  ;;  %p6614_p8 = por %p6613_p10, %p6612_p4 }
  0xc9   : > { %p6615_p0 = pnand %p6614_p8, %p6608_p2 }
  0xcb   : > { %6618 = shalt.err (!%p6615_p0)
}
  0xcc   : > { %s6619_s27 = scalar_lea.vmem %s7210_s6, 512  ;;  %s6800_s12 = smov [#allocation9]  }
  0xcd   : > { %p6620_p12 = scmp.ne.s32.totalorder %s7210_s6, %s6619_s27  ;;  %s6624_s4 = sshll.u32 %s6800_s12, 4  ;;  %s6625_s4 = int_to_ptr.vmem [resolvable:$false] %s6624_s4 }
  0xce   : > { %s6626_s10 = scalar_lea.vmem %s6625_s4, 1024  ;;  %p6627_p6 = scmp.lt.s32.totalorder %s7210_s6, %s6625_s4 }
  0xcf   : > { %p6622_p1 = pnand %p6620_p12, %p6606_p11  ;;  %p6628_p3 = scmp.lt.s32.totalorder %s6626_s10, %s6619_s27 }
  0xd1   : > { %p6623_p13 = pneg %p6622_p1  ;;  %p6629_p5 = por %p6628_p3, %p6627_p6 }
  0xd3   : > { %p6630_p4 = pnand %p6629_p5, %p6623_p13 }
  0xd5   : > { %6633 = shalt.err (!%p6630_p4)
}
  0xd6   : > { %s9517_s24 = sld [smem:[#allocation31_spill]]  ;;  %s9518_s28 = sld [smem:[#allocation26_spill]] }
  0xdc   : > { %6353 = dma.hbm_to_vmem [thread:$0]  (!%p7216_p7), %s7208_s2, 512, %s7210_s6, %s9517_s24, %s9494_s11, %s9494_s11, %s9493_s16  }
  0xdd   : > { %p9519_p11 = scmp.ne.s32.totalorder %s9518_s28, 0 }
  0xdf   : > { %383 = sbr.rel (%p9519_p11) target bundleno = 1551 (0x60f), region = 48 }
  0xe6   : > { %s9520_s22 = sld [smem:[#allocation21_spill]] }
  0xec   : > { %s385_s23 = sand.u32 1, %s9520_s22  }
  0xed   : > { %s5014_s18 = sshll.u32 %s385_s23, 5  ;;  %s386_s19 = scalar_lea.sflag [#allocation5], %s385_s23 }
  0xee   : > { %s7252_s1 = scalar_lea.vmem [#allocation4], %s5014_s18 }
  0xef   : > { %6719 = dma.done.wait (%p7106_p9), %s386_s19, 512  }
  0xf0   : > { %6721 = vsyncadd (%p7106_p9), %s386_s19, 4294966784  ;;  %s9522_s5 = sld [smem:[#allocation20_spill]]  ;;  %s9523_s13 = sld [smem:[#allocation29_spill]] }
  0xf1   : > { %s394_s16 = sand.u32 1, %s6921_s15  }
  0xf2   : > { %s395_s6 = scalar_lea.sflag [#allocation8], %s394_s16 }
  0xf6   : > { %s396_s11 = sand.u32 1, %s9522_s5   ;;  %p9524_p6 = scmp.ne.s32.totalorder %s9523_s13, 0 }
  0xf7   : > { %s7262_s2 = sshll.u32 %s396_s11, 8 }
  0xf8   : > { %s7265_s8 = scalar_lea.vmem [#allocation7], %s7262_s2 }
  0xf9   : > { %6723 = dma.done.wait (%p9524_p6), %s395_s6, 4096  }
  0xfa   : > { %6725 = vsyncadd (%p9524_p6), %s395_s6, 4294963200  ;;  %s405_s27 = sand.u32 1, %s6744_s25   ;;  %p9525_p9 = scmp.ne.s32.totalorder %s9513_s21, 0 }
  0xfb   : > { %s5016_s12 = sshll.u32 %s405_s27, 5 }
  0xfc   : > { %s7272_s4 = scalar_lea.vmem [#allocation9], %s5016_s12 }
  0xfd   : > { %6727 = dma.done.wait (%p9525_p9), %s395_s6, 512  }
  0xfe   : > { %6729 = vsyncadd (%p9525_p9), %s395_s6, 4294966784  ;;  %p9526_p7 = scmp.eq.s32.totalorder %s6921_s15, 0 }
 0x100   : > { %6731 = dma.done.wait (%p9526_p7), [#allocation11], 36864   ;;  %p9527_p2 = pmov %p9526_p7 }
 0x101   : > { %v6801_v0 = vmov 0.0   ;;  %v510_v1 = vld [vmem:[%s7252_s1] sm:$0xff]  ;;  %v511_v2 = vld [vmem:[%s7252_s1 + $0x8] sm:$0xff]  ;;  %v512_v3 = vld [vmem:[%s7252_s1 + $0x10] sm:$0xff]  ;;  %s7363_s15 = scalar_lea.vmem [#allocation13], %s7262_s2  ;;  %s9528_s21 = sld [smem:[#allocation22_spill]] }
 0x102   : > { %6733 = vsyncadd (%p9527_p2), [#allocation11], 4294930432  ;;  %470 = vst [vmem:[#allocation2] sm:$0x1] %v6801_v0  ;;  %v514_v4 = vmax.f32 %v510_v1, 0.0  ;;  %v515_v5 = vmax.f32 %v511_v2, 0.0 }
 0x103   : > { %471 = vst [vmem:[#allocation2 + $0x18] sm:$0x1] %v6801_v0  ;;  %472 = vst [vmem:[#allocation2 + $0x30] sm:$0x1] %v6801_v0  ;;  %v516_v6 = vmax.f32 %v512_v3, 0.0  ;;  %v513_v7 = vld [vmem:[%s7252_s1 + $0x18] sm:$0xff] }
 0x104   : > { %473 = vst [vmem:[#allocation2 + $0x48] sm:$0x1] %v6801_v0  ;;  %474 = vst [vmem:[#allocation2 + $0x60] sm:$0x1] %v6801_v0  ;;  %v522_v8 = vld [vmem:[%s7265_s8] sm:$0xff]  ;;  %v523_v9 = vld [vmem:[%s7265_s8 + $0x8] sm:$0xff] }
 0x105   : > { %475 = vst [vmem:[#allocation2 + $0x78] sm:$0x1] %v6801_v0  ;;  %476 = vst [vmem:[#allocation2 + $0x90] sm:$0x1] %v6801_v0  ;;  %v517_v10 = vmax.f32 %v513_v7, 0.0  ;;  %v554_v11 = vmax.f32 %v522_v8, 0.0 }
 0x106   : > { %477 = vst [vmem:[#allocation2 + $0xa8] sm:$0x1] %v6801_v0  ;;  %478 = vst [vmem:[#allocation2 + $0xc0] sm:$0x1] %v6801_v0  ;;  %v555_v12 = vmax.f32 %v523_v9, 0.0  ;;  %v524_v13 = vld [vmem:[%s7265_s8 + $0x10] sm:$0xff] }
 0x107   : > { %479 = vst [vmem:[#allocation2 + $0xd8] sm:$0x1] %v6801_v0  ;;  %480 = vst [vmem:[#allocation2 + $0xf0] sm:$0x1] %v6801_v0  ;;  %v525_v14 = vld [vmem:[%s7265_s8 + $0x18] sm:$0xff]  ;;  %v526_v15 = vld [vmem:[%s7265_s8 + $0x20] sm:$0xff] }
 0x108   : > { %481 = vst [vmem:[#allocation2 + $0x108] sm:$0x1] %v6801_v0  ;;  %482 = vst [vmem:[#allocation2 + $0x120] sm:$0x1] %v6801_v0  ;;  %v556_v16 = vmax.f32 %v524_v13, 0.0  ;;  %v557_v17 = vmax.f32 %v525_v14, 0.0 }
 0x109   : > { %483 = vst [vmem:[#allocation2 + $0x138] sm:$0x1] %v6801_v0  ;;  %484 = vst [vmem:[#allocation2 + $0x150] sm:$0x1] %v6801_v0  ;;  %v558_v18 = vmax.f32 %v526_v15, 0.0  ;;  %v527_v19 = vld [vmem:[%s7265_s8 + $0x28] sm:$0xff] }
 0x10a   : > { %485 = vst [vmem:[#allocation2 + $0x168] sm:$0x1] %v6801_v0  ;;  %486 = vst [vmem:[#allocation2 + $0x180] sm:$0x1] %v6801_v0  ;;  %v528_v20 = vld [vmem:[%s7265_s8 + $0x30] sm:$0xff]  ;;  %v529_v21 = vld [vmem:[%s7265_s8 + $0x38] sm:$0xff] }
 0x10b   : > { %487 = vst [vmem:[#allocation2 + $0x198] sm:$0x1] %v6801_v0  ;;  %488 = vst [vmem:[#allocation2 + $0x1b0] sm:$0x1] %v6801_v0  ;;  %v559_v22 = vmax.f32 %v527_v19, 0.0  ;;  %v560_v23 = vmax.f32 %v528_v20, 0.0 }
 0x10c   : > { %489 = vst [vmem:[#allocation2 + $0x1c8] sm:$0x1] %v6801_v0  ;;  %490 = vst [vmem:[#allocation2 + $0x11] sm:$0x1] %v6801_v0  ;;  %v561_v24 = vmax.f32 %v529_v21, 0.0  ;;  %v530_v25 = vld [vmem:[%s7265_s8 + $0x40] sm:$0xff] }
 0x10d   : > { %491 = vst [vmem:[#allocation2 + $0x29] sm:$0x1] %v6801_v0  ;;  %492 = vst [vmem:[#allocation2 + $0x41] sm:$0x1] %v6801_v0  ;;  %v531_v26 = vld [vmem:[%s7265_s8 + $0x48] sm:$0xff]  ;;  %v532_v27 = vld [vmem:[%s7265_s8 + $0x50] sm:$0xff] }
 0x10e   : > { %493 = vst [vmem:[#allocation2 + $0x59] sm:$0x1] %v6801_v0  ;;  %494 = vst [vmem:[#allocation2 + $0x71] sm:$0x1] %v6801_v0  ;;  %v562_v28 = vmax.f32 %v530_v25, 0.0  ;;  %v563_v29 = vmax.f32 %v531_v26, 0.0 }
 0x10f   : > { %495 = vst [vmem:[#allocation2 + $0x89] sm:$0x1] %v6801_v0  ;;  %496 = vst [vmem:[#allocation2 + $0xa1] sm:$0x1] %v6801_v0  ;;  %v564_v30 = vmax.f32 %v532_v27, 0.0  ;;  %v533_v31 = vld [vmem:[%s7265_s8 + $0x58] sm:$0xff] }
 0x110   : > { %497 = vst [vmem:[#allocation2 + $0xb9] sm:$0x1] %v6801_v0  ;;  %498 = vst [vmem:[#allocation2 + $0xd1] sm:$0x1] %v6801_v0  ;;  %v534_v32 = vld [vmem:[%s7265_s8 + $0x60] sm:$0xff]  ;;  %v535_v33 = vld [vmem:[%s7265_s8 + $0x68] sm:$0xff] }
 0x111   : > { %499 = vst [vmem:[#allocation2 + $0xe9] sm:$0x1] %v6801_v0  ;;  %500 = vst [vmem:[#allocation2 + $0x101] sm:$0x1] %v6801_v0  ;;  %v565_v34 = vmax.f32 %v533_v31, 0.0  ;;  %v566_v35 = vmax.f32 %v534_v32, 0.0 }
 0x112   : > { %501 = vst [vmem:[#allocation2 + $0x119] sm:$0x1] %v6801_v0  ;;  %502 = vst [vmem:[#allocation2 + $0x131] sm:$0x1] %v6801_v0  ;;  %v567_v36 = vmax.f32 %v535_v33, 0.0  ;;  %v536_v37 = vld [vmem:[%s7265_s8 + $0x70] sm:$0xff] }
 0x113   : > { %503 = vst [vmem:[#allocation2 + $0x149] sm:$0x1] %v6801_v0  ;;  %504 = vst [vmem:[#allocation2 + $0x161] sm:$0x1] %v6801_v0  ;;  %v537_v38 = vld [vmem:[%s7265_s8 + $0x78] sm:$0xff]  ;;  %v538_v39 = vld [vmem:[%s7265_s8 + $0x80] sm:$0xff] }
 0x114   : > { %505 = vst [vmem:[#allocation2 + $0x179] sm:$0x1] %v6801_v0  ;;  %506 = vst [vmem:[#allocation2 + $0x191] sm:$0x1] %v6801_v0  ;;  %v568_v40 = vmax.f32 %v536_v37, 0.0  ;;  %v569_v41 = vmax.f32 %v537_v38, 0.0 }
 0x115   : > { %507 = vst [vmem:[#allocation2 + $0x1a9] sm:$0x1] %v6801_v0  ;;  %508 = vst [vmem:[#allocation2 + $0x1c1] sm:$0x1] %v6801_v0  ;;  %v570_v42 = vmax.f32 %v538_v39, 0.0  ;;  %v539_v43 = vld [vmem:[%s7265_s8 + $0x88] sm:$0xff] }
 0x116   : > { %509 = vst [vmem:[#allocation2 + $0x1d9] sm:$0x1] %v6801_v0  ;;  %518 = vst [vmem:[#allocation2 + $0x1] sm:$0xff] %v514_v4  ;;  %v540_v44 = vld [vmem:[%s7265_s8 + $0x90] sm:$0xff]  ;;  %v541_v45 = vld [vmem:[%s7265_s8 + $0x98] sm:$0xff]  ;;  %v571_v46 = vmax.f32 %v539_v43, 0.0 }
 0x117   : > { %519 = vst [vmem:[#allocation2 + $0x9] sm:$0xff] %v515_v5  ;;  %520 = vst [vmem:[#allocation2 + $0x19] sm:$0xff] %v516_v6  ;;  %v572_v47 = vmax.f32 %v540_v44, 0.0  ;;  %v573_v48 = vmax.f32 %v541_v45, 0.0  ;;  %v542_v49 = vld [vmem:[%s7265_s8 + $0xa0] sm:$0xff]  ;;  %v543_v50 = vld [vmem:[%s7265_s8 + $0xa8] sm:$0xff] }
 0x118   : > { %521 = vst [vmem:[#allocation2 + $0x21] sm:$0xff] %v517_v10  ;;  %587 = vst [vmem:[#allocation2 + $0x31] sm:$0xff] %v554_v11  ;;  %v544_v51 = vld [vmem:[%s7265_s8 + $0xb0] sm:$0xff]  ;;  %v574_v52 = vmax.f32 %v542_v49, 0.0  ;;  %v575_v53 = vmax.f32 %v543_v50, 0.0  ;;  %v545_v55 = vld [vmem:[%s7265_s8 + $0xb8] sm:$0xff] }
 0x119   : > { %588 = vst [vmem:[#allocation2 + $0x39] sm:$0xff] %v555_v12  ;;  %589 = vst [vmem:[#allocation2 + $0x49] sm:$0xff] %v556_v16  ;;  %v576_v54 = vmax.f32 %v544_v51, 0.0  ;;  %v546_v56 = vld [vmem:[%s7265_s8 + $0xc0] sm:$0xff]  ;;  %v547_v57 = vld [vmem:[%s7265_s8 + $0xc8] sm:$0xff]  ;;  %v577_v58 = vmax.f32 %v545_v55, 0.0 }
 0x11a   : > { %590 = vst [vmem:[#allocation2 + $0x51] sm:$0xff] %v557_v17  ;;  %591 = vst [vmem:[#allocation2 + $0x61] sm:$0xff] %v558_v18  ;;  %v578_v59 = vmax.f32 %v546_v56, 0.0  ;;  %v579_v60 = vmax.f32 %v547_v57, 0.0  ;;  %v548_v61 = vld [vmem:[%s7265_s8 + $0xd0] sm:$0xff]  ;;  %v549_v62 = vld [vmem:[%s7265_s8 + $0xd8] sm:$0xff] }
 0x11b   : > { %592 = vst [vmem:[#allocation2 + $0x69] sm:$0xff] %v559_v22  ;;  %593 = vst [vmem:[#allocation2 + $0x79] sm:$0xff] %v560_v23  ;;  %v550_v63 = vld [vmem:[%s7265_s8 + $0xe0] sm:$0xff]  ;;  %v580_v1 = vmax.f32 %v548_v61, 0.0  ;;  %v581_v2 = vmax.f32 %v549_v62, 0.0  ;;  %v551_v4 = vld [vmem:[%s7265_s8 + $0xe8] sm:$0xff] }
 0x11c   : > { %594 = vst [vmem:[#allocation2 + $0x81] sm:$0xff] %v561_v24  ;;  %595 = vst [vmem:[#allocation2 + $0x91] sm:$0xff] %v562_v28  ;;  %v582_v3 = vmax.f32 %v550_v63, 0.0  ;;  %v552_v5 = vld [vmem:[%s7265_s8 + $0xf0] sm:$0xff]  ;;  %v553_v6 = vld [vmem:[%s7265_s8 + $0xf8] sm:$0xff]  ;;  %v583_v7 = vmax.f32 %v551_v4, 0.0 }
 0x11d   : > { %596 = vst [vmem:[#allocation2 + $0x99] sm:$0xff] %v563_v29  ;;  %597 = vst [vmem:[#allocation2 + $0xa9] sm:$0xff] %v564_v30  ;;  %v584_v8 = vmax.f32 %v552_v5, 0.0  ;;  %v585_v9 = vmax.f32 %v553_v6, 0.0  ;;  %v619_v10 = vld [vmem:[%s7272_s4] sm:$0xff]  ;;  %v620_v11 = vld [vmem:[%s7272_s4 + $0x8] sm:$0xff] }
 0x11e   : > { %598 = vst [vmem:[#allocation2 + $0xb1] sm:$0xff] %v565_v34  ;;  %599 = vst [vmem:[#allocation2 + $0xc1] sm:$0xff] %v566_v35  ;;  %v621_v12 = vld [vmem:[%s7272_s4 + $0x10] sm:$0xff]  ;;  %v623_v13 = vmax.f32 %v619_v10, 0.0  ;;  %v624_v14 = vmax.f32 %v620_v11, 0.0  ;;  %v622_v16 = vld [vmem:[%s7272_s4 + $0x18] sm:$0xff] }
 0x11f   : > { %600 = vst [vmem:[#allocation2 + $0xc9] sm:$0xff] %v567_v36  ;;  %601 = vst [vmem:[#allocation2 + $0xd9] sm:$0xff] %v568_v40  ;;  %v625_v15 = vmax.f32 %v621_v12, 0.0  ;;  %v626_v17 = vmax.f32 %v622_v16, 0.0  ;;  %p5020_p10 = scmp.ne.s32.totalorder %s9528_s21, 0 }
 0x120   : > { %602 = vst [vmem:[#allocation2 + $0xe1] sm:$0xff] %v569_v41  ;;  %603 = vst [vmem:[#allocation2 + $0xf1] sm:$0xff] %v570_v42  ;;  %v6802_v18 = vmov (!%p5020_p10), 0.0  }
 0x121   : > { %604 = vst [vmem:[#allocation2 + $0xf9] sm:$0xff] %v571_v46  ;;  %605 = vst [vmem:[#allocation2 + $0x109] sm:$0xff] %v572_v47 }
 0x122   : > { %606 = vst [vmem:[#allocation2 + $0x111] sm:$0xff] %v573_v48  ;;  %607 = vst [vmem:[#allocation2 + $0x121] sm:$0xff] %v574_v52 }
 0x123   : > { %608 = vst [vmem:[#allocation2 + $0x129] sm:$0xff] %v575_v53  ;;  %609 = vst [vmem:[#allocation2 + $0x139] sm:$0xff] %v576_v54 }
 0x124   : > { %610 = vst [vmem:[#allocation2 + $0x141] sm:$0xff] %v577_v58  ;;  %611 = vst [vmem:[#allocation2 + $0x151] sm:$0xff] %v578_v59  ;;  %634 = sbr.rel (%p5020_p10) target bundleno = 302 (0x12e), region = 72 }
 0x125   : > { %612 = vst [vmem:[#allocation2 + $0x159] sm:$0xff] %v579_v60  ;;  %613 = vst [vmem:[#allocation2 + $0x169] sm:$0xff] %v580_v1 }
 0x126   : > { %614 = vst [vmem:[#allocation2 + $0x171] sm:$0xff] %v581_v2  ;;  %615 = vst [vmem:[#allocation2 + $0x181] sm:$0xff] %v582_v3 }
 0x127   : > { %616 = vst [vmem:[#allocation2 + $0x189] sm:$0xff] %v583_v7  ;;  %617 = vst [vmem:[#allocation2 + $0x199] sm:$0xff] %v584_v8 }
 0x128   : > { %618 = vst [vmem:[#allocation2 + $0x1a1] sm:$0xff] %v585_v9  ;;  %628 = vst [vmem:[#allocation2 + $0x1b1] sm:$0xff] %v623_v13 }
 0x129   : > { %629 = vst [vmem:[#allocation2 + $0x1b9] sm:$0xff] %v624_v14  ;;  %630 = vst [vmem:[#allocation2 + $0x1c9] sm:$0xff] %v625_v15 }
 0x12a   : > { %631 = vst [vmem:[#allocation2 + $0x1d1] sm:$0xff] %v626_v17  ;;  %635 = vst [vmem:[#allocation2] sm:$0xff] (!%p5020_p10), %v6802_v18 }
 0x12b   : > { %636 = vst [vmem:[#allocation2 + $0x8] sm:$0xff] %v6802_v18  ;;  %637 = vst [vmem:[#allocation2 + $0x10] sm:$0x3] %v6802_v18 }
 0x12c   : > { %638 = vst [vmem:[#allocation2 + $0x18] sm:$0xff] %v6802_v18  ;;  %639 = vst [vmem:[#allocation2 + $0x20] sm:$0xff] %v6802_v18 }
 0x12d   : > { %640 = vst [vmem:[#allocation2 + $0x28] sm:$0x3] %v6802_v18 }
 0x12e PF: > { %s9529_s10 = sld [smem:[#allocation22_spill]] }
 0x134   : > { %p5021_p8 = scmp.ne.s32.totalorder %s9529_s10, 1 }
 0x135   : > { %v6803_v19 = vmov (!%p5021_p8), 0.0  }
 0x136   : > { %643 = sbr.rel (%p5021_p8) target bundleno = 317 (0x13d), region = 76  ;;  %644 = vst [vmem:[#allocation2 + $0x1b0] sm:$0xff] (!%p5021_p8), %v6803_v19  ;;  %645 = vst [vmem:[#allocation2 + $0x1b8] sm:$0xff] (!%p5021_p8), %v6803_v19 }
 0x137   : > { %646 = vst [vmem:[#allocation2 + $0x1c0] sm:$0x3] (!%p5021_p8), %v6803_v19  ;;  %647 = vst [vmem:[#allocation2 + $0x1c8] sm:$0xff] (!%p5021_p8), %v6803_v19 }
 0x138   : > { %648 = vst [vmem:[#allocation2 + $0x1d0] sm:$0xff] (!%p5021_p8), %v6803_v19  ;;  %649 = vst [vmem:[#allocation2 + $0x1d8] sm:$0x3] (!%p5021_p8), %v6803_v19 }
 0x13d PF: > { %v759_v20 = vld [vmem:[#allocation10] sm:$0xff]  ;;  %v760_v21 = vld [vmem:[#allocation10 + $0x8] sm:$0xff]  ;;  %2740 = vst [vmem:[#allocation3] sm:$0x1] %v6801_v0  ;;  %2741 = vst [vmem:[#allocation3 + $0x18] sm:$0x1] %v6801_v0 }
 0x13e   : > { %v791_v22 = vld [vmem:[#allocation10 + $0x100] sm:$0xff]  ;;  %2742 = vst [vmem:[#allocation3 + $0x30] sm:$0x1] %v6801_v0  ;;  %2743 = vst [vmem:[#allocation3 + $0x48] sm:$0x1] %v6801_v0  ;;  %v9455_v23 = vmov 0.0|0.0   ;;  %v5842_v24 = vpack.c.bf16 %v760_v21, %v759_v20 }
 0x13f   : > { %2744 = vst [vmem:[#allocation3 + $0x60] sm:$0x1] %v6801_v0  ;;  %2745 = vst [vmem:[#allocation3 + $0x78] sm:$0x1] %v6801_v0  ;;  %5841 = vmatprep.subr.bf16.mxu0 %v9455_v23  ;;  %v792_v25 = vld [vmem:[#allocation10 + $0x108] sm:$0xff]  ;;  %v761_v26 = vld [vmem:[#allocation10 + $0x10] sm:$0xff] }
 0x140   : > { %2746 = vst [vmem:[#allocation3 + $0x90] sm:$0x1] %v6801_v0  ;;  %2747 = vst [vmem:[#allocation3 + $0xa8] sm:$0x1] %v6801_v0  ;;  %v762_v27 = vld [vmem:[#allocation10 + $0x18] sm:$0xff]  ;;  %v5889_v28 = vpack.c.bf16 %v792_v25, %v791_v22  ;;  %v793_v29 = vld [vmem:[#allocation10 + $0x110] sm:$0xff]  ;;  %5843 = vmatpush1.bf16.msra.mxu0 %v5842_v24 }
 0x141   : > { %2748 = vst [vmem:[#allocation3 + $0xc0] sm:$0x1] %v6801_v0  ;;  %2749 = vst [vmem:[#allocation3 + $0xd8] sm:$0x1] %v6801_v0  ;;  %v794_v30 = vld [vmem:[#allocation10 + $0x118] sm:$0xff]  ;;  %v5845_v31 = vpack.c.bf16 %v762_v27, %v761_v26  ;;  %v795_v33 = vld [vmem:[#allocation10 + $0x120] sm:$0xff]  ;;  %5844 = vmatprep.subr.bf16.mxu0 %v9455_v23 }
 0x142   : > { %2750 = vst [vmem:[#allocation3 + $0xf0] sm:$0x1] %v6801_v0  ;;  %2751 = vst [vmem:[#allocation3 + $0x108] sm:$0x1] %v6801_v0  ;;  %v5893_v32 = vpack.c.bf16 %v794_v30, %v793_v29  ;;  %v796_v34 = vld [vmem:[#allocation10 + $0x128] sm:$0xff]  ;;  %5890 = vmatprep.subr.bf16.mxu1 %v5889_v28  ;;  %v763_v35 = vld [vmem:[#allocation10 + $0x20] sm:$0xff] }
 0x143   : > { %2752 = vst [vmem:[#allocation3 + $0x120] sm:$0x1] %v6801_v0  ;;  %2753 = vst [vmem:[#allocation3 + $0x138] sm:$0x1] %v6801_v0  ;;  %5892 = vmatpush3.bf16.msra.mxu1 %v5889_v28  ;;  %v5897_v36 = vpack.c.bf16 %v796_v34, %v795_v33  ;;  %v797_v38 = vld [vmem:[#allocation10 + $0x130] sm:$0xff]  ;;  %v798_v39 = vld [vmem:[#allocation10 + $0x138] sm:$0xff] }
 0x144   : > { %2754 = vst [vmem:[#allocation3 + $0x150] sm:$0x1] %v6801_v0  ;;  %2755 = vst [vmem:[#allocation3 + $0x168] sm:$0x1] %v6801_v0  ;;  %5894 = vmatprep.subr.bf16.mxu1 %v5893_v32  ;;  %5846 = vmatpush1.bf16.msra.mxu0 %v5845_v31  ;;  %v765_v40 = vld [vmem:[#allocation10 + $0x30] sm:$0xff]  ;;  %v766_v41 = vld [vmem:[#allocation10 + $0x38] sm:$0xff]  ;;  %v5901_v42 = vpack.c.bf16 %v798_v39, %v797_v38 }
 0x145   : > { %2756 = vst [vmem:[#allocation3 + $0x180] sm:$0x1] %v6801_v0  ;;  %2757 = vst [vmem:[#allocation3 + $0x198] sm:$0x1] %v6801_v0  ;;  %5847 = vmatprep.subr.bf16.mxu0 %v9455_v23  ;;  %v723_v43 = vld [vmem:[#allocation2 + $0x2] sm:$0xff]  ;;  %v5851_v44 = vpack.c.bf16 %v766_v41, %v765_v40  ;;  %v799_v45 = vld [vmem:[#allocation10 + $0x140] sm:$0xff] }
 0x146   : > { %2758 = vst [vmem:[#allocation3 + $0x11] sm:$0x1] %v6801_v0  ;;  %2759 = vst [vmem:[#allocation3 + $0x29] sm:$0x1] %v6801_v0  ;;  %v800_v46 = vld [vmem:[#allocation10 + $0x148] sm:$0xff]  ;;  %5375 = vmatprep.mubr.f32.mxu1 %v723_v43  ;;  %v767_v47 = vld [vmem:[#allocation10 + $0x40] sm:$0xff] }
 0x147   : > { %2760 = vst [vmem:[#allocation3 + $0x41] sm:$0x1] %v6801_v0  ;;  %2761 = vst [vmem:[#allocation3 + $0x59] sm:$0x1] %v6801_v0  ;;  %5896 = vmatpush3.bf16.msra.mxu1 %v5893_v32  ;;  %v768_v48 = vld [vmem:[#allocation10 + $0x48] sm:$0xff]  ;;  %v5905_v49 = vpack.c.bf16 %v800_v46, %v799_v45  ;;  %v801_v51 = vld [vmem:[#allocation10 + $0x150] sm:$0xff] }
 0x148   : > { %2762 = vst [vmem:[#allocation3 + $0x71] sm:$0x1] %v6801_v0  ;;  %2763 = vst [vmem:[#allocation3 + $0x89] sm:$0x1] %v6801_v0  ;;  %5898 = vmatprep.subr.bf16.mxu1 %v5897_v36  ;;  %v5854_v50 = vpack.c.bf16 %v768_v48, %v767_v47  ;;  %v802_v52 = vld [vmem:[#allocation10 + $0x158] sm:$0xff]  ;;  %v769_v53 = vld [vmem:[#allocation10 + $0x50] sm:$0xff] }
 0x149   : > { %2764 = vst [vmem:[#allocation3 + $0xa1] sm:$0x1] %v6801_v0  ;;  %2765 = vst [vmem:[#allocation3 + $0xb9] sm:$0x1] %v6801_v0  ;;  %v770_v54 = vld [vmem:[#allocation10 + $0x58] sm:$0xff]  ;;  %v5909_v55 = vpack.c.bf16 %v802_v52, %v801_v51  ;;  %v803_v57 = vld [vmem:[#allocation10 + $0x160] sm:$0xff] }
 0x14a   : > { %2766 = vst [vmem:[#allocation3 + $0xd1] sm:$0x1] %v6801_v0  ;;  %2767 = vst [vmem:[#allocation3 + $0xe9] sm:$0x1] %v6801_v0  ;;  %v5857_v56 = vpack.c.bf16 %v770_v54, %v769_v53  ;;  %v804_v58 = vld [vmem:[#allocation10 + $0x168] sm:$0xff]  ;;  %v771_v59 = vld [vmem:[#allocation10 + $0x60] sm:$0xff] }
 0x14b   : > { %2768 = vst [vmem:[#allocation3 + $0x101] sm:$0x1] %v6801_v0  ;;  %2769 = vst [vmem:[#allocation3 + $0x119] sm:$0x1] %v6801_v0  ;;  %5900 = vmatpush3.bf16.msra.mxu1 %v5897_v36  ;;  %v772_v60 = vld [vmem:[#allocation10 + $0x68] sm:$0xff]  ;;  %v5913_v61 = vpack.c.bf16 %v804_v58, %v803_v57  ;;  %v805_v63 = vld [vmem:[#allocation10 + $0x170] sm:$0xff] }
 0x14c   : > { %2770 = vst [vmem:[#allocation3 + $0x131] sm:$0x1] %v6801_v0  ;;  %2771 = vst [vmem:[#allocation3 + $0x149] sm:$0x1] %v6801_v0  ;;  %5902 = vmatprep.subr.bf16.mxu1 %v5901_v42  ;;  %v5860_v62 = vpack.c.bf16 %v772_v60, %v771_v59  ;;  %v806_v1 = vld [vmem:[#allocation10 + $0x178] sm:$0xff]  ;;  %v773_v2 = vld [vmem:[#allocation10 + $0x70] sm:$0xff] }
 0x14d   : > { %2772 = vst [vmem:[#allocation3 + $0x161] sm:$0x1] %v6801_v0  ;;  %2773 = vst [vmem:[#allocation3 + $0x179] sm:$0x1] %v6801_v0  ;;  %v774_v3 = vld [vmem:[#allocation10 + $0x78] sm:$0xff]  ;;  %v5917_v4 = vpack.c.bf16 %v806_v1, %v805_v63  ;;  %v775_v7 = vld [vmem:[#allocation10 + $0x80] sm:$0xff] }
 0x14e   : > { %2774 = vst [vmem:[#allocation3 + $0x191] sm:$0x1] %v6801_v0  ;;  %2775 = vst [vmem:[#allocation3 + $0x1a9] sm:$0x1] %v6801_v0  ;;  %v764_v0 = vld [vmem:[#allocation10 + $0x28] sm:$0xff]  ;;  %v687_v5 = vld [vmem:[#allocation2 + $0x1] sm:$0xff]  ;;  %v5863_v6 = vpack.c.bf16 %v774_v3, %v773_v2 }
 0x14f   : > { %v5848_v37 = vpack.c.bf16 %v764_v0, %v763_v35  ;;  %5904 = vmatpush3.bf16.msra.mxu1 %v5901_v42  ;;  %871 = vmatprep.mubr.f32.mxu0 %v687_v5  ;;  %v776_v8 = vld [vmem:[#allocation10 + $0x88] sm:$0xff]  ;;  %v1448_v9 = vld [vmem:[#allocation10 + $0x180] sm:$0xff]  ;;  %v777_v12 = vld [vmem:[#allocation10 + $0x90] sm:$0xff]  ;;  %s9560_s22 = sld [smem:[#allocation49_spill]] }
 0x150   : > { %5906 = vmatprep.subr.bf16.mxu1 %v5905_v49  ;;  %v1449_v10 = vld [vmem:[#allocation10 + $0x188] sm:$0xff]  ;;  %v5866_v11 = vpack.c.bf16 %v776_v8, %v775_v7  ;;  %v778_v13 = vld [vmem:[#allocation10 + $0x98] sm:$0xff]  ;;  %v1450_v17 = vld [vmem:[#allocation10 + $0x190] sm:$0xff] }
 0x151   : > { %5849 = vmatpush1.bf16.msra.mxu0 %v5848_v37  ;;  %v724_v14 = vld [vmem:[#allocation2 + $0xa] sm:$0xff]  ;;  %v5922_v15 = vpack.c.bf16 %v1449_v10, %v1448_v9  ;;  %v725_v16 = vld [vmem:[#allocation2 + $0x1a] sm:$0xff]  ;;  %v5869_v19 = vpack.c.bf16 %v778_v13, %v777_v12  ;;  %v726_v22 = vld [vmem:[#allocation2 + $0x22] sm:$0xff] }
 0x152   : > { %5850 = vmatprep.subr.bf16.mxu0 %v9455_v23  ;;  %v1451_v18 = vld [vmem:[#allocation10 + $0x198] sm:$0xff]  ;;  %v779_v20 = vld [vmem:[#allocation10 + $0xa0] sm:$0xff]  ;;  %v780_v21 = vld [vmem:[#allocation10 + $0xa8] sm:$0xff] }
 0x153   : > { %5908 = vmatpush3.bf16.msra.mxu1 %v5905_v49  ;;  %v5925_v24 = vpack.c.bf16 %v1451_v18, %v1450_v17  ;;  %v727_v25 = vld [vmem:[#allocation2 + $0x32] sm:$0xff]  ;;  %v5872_v28 = vpack.c.bf16 %v780_v21, %v779_v20  ;;  %v781_v29 = vld [vmem:[#allocation10 + $0xb0] sm:$0xff]  ;;  %v782_v30 = vld [vmem:[#allocation10 + $0xb8] sm:$0xff] }
 0x154   : > { %5910 = vmatprep.subr.bf16.mxu1 %v5909_v55  ;;  %v1452_v26 = vld [vmem:[#allocation10 + $0x1a0] sm:$0xff]  ;;  %v1453_v27 = vld [vmem:[#allocation10 + $0x1a8] sm:$0xff]  ;;  %v1454_v34 = vld [vmem:[#allocation10 + $0x1b0] sm:$0xff]  ;;  %v5875_v0 = vpack.c.bf16 %v782_v30, %v781_v29 }
 0x155   : > { %5852 = vmatpush1.bf16.msra.mxu0 %v5851_v44  ;;  %v728_v31 = vld [vmem:[#allocation2 + $0x3a] sm:$0xff]  ;;  %v5928_v32 = vpack.c.bf16 %v1453_v27, %v1452_v26  ;;  %v729_v33 = vld [vmem:[#allocation2 + $0x4a] sm:$0xff]  ;;  %v730_v38 = vld [vmem:[#allocation2 + $0x52] sm:$0xff] }
 0x156   : > { %5853 = vmatprep.subr.bf16.mxu0 %v9455_v23  ;;  %v1455_v35 = vld [vmem:[#allocation10 + $0x1b8] sm:$0xff]  ;;  %v783_v36 = vld [vmem:[#allocation10 + $0xc0] sm:$0xff]  ;;  %v784_v37 = vld [vmem:[#allocation10 + $0xc8] sm:$0xff] }
 0x157   : > { %5912 = vmatpush3.bf16.msra.mxu1 %v5909_v55  ;;  %v5931_v39 = vpack.c.bf16 %v1455_v35, %v1454_v34  ;;  %v731_v40 = vld [vmem:[#allocation2 + $0x62] sm:$0xff]  ;;  %v1456_v41 = vld [vmem:[#allocation10 + $0x1c0] sm:$0xff]  ;;  %v1457_v42 = vld [vmem:[#allocation10 + $0x1c8] sm:$0xff]  ;;  %v5878_v43 = vpack.c.bf16 %v784_v37, %v783_v36 }
 0x158   : > { %5914 = vmatprep.subr.bf16.mxu1 %v5913_v61  ;;  %v785_v44 = vld [vmem:[#allocation10 + $0xd0] sm:$0xff]  ;;  %v786_v45 = vld [vmem:[#allocation10 + $0xd8] sm:$0xff]  ;;  %v5934_v47 = vpack.c.bf16 %v1457_v42, %v1456_v41  ;;  %v787_v52 = vld [vmem:[#allocation10 + $0xe0] sm:$0xff] }
 0x159   : > { %5855 = vmatpush1.bf16.msra.mxu0 %v5854_v50  ;;  %v7424_v46 = vld [vmem:[#allocation2 + $0x6a] sm:$0xff]  ;;  %v7427_v48 = vld [vmem:[#allocation2 + $0x7a] sm:$0xff]  ;;  %v5881_v51 = vpack.c.bf16 %v786_v45, %v785_v44  ;;  %v7432_v54 = vld [vmem:[#allocation2 + $0x82] sm:$0xff] }
 0x15a   : > { %5856 = vmatprep.subr.bf16.mxu0 %v9455_v23  ;;  %v1458_v49 = vld [vmem:[#allocation10 + $0x1d0] sm:$0xff]  ;;  %v1459_v50 = vld [vmem:[#allocation10 + $0x1d8] sm:$0xff]  ;;  %v788_v53 = vld [vmem:[#allocation10 + $0xe8] sm:$0xff] }
 0x15b   : > { %5916 = vmatpush3.bf16.msra.mxu1 %v5913_v61  ;;  %v5937_v55 = vpack.c.bf16 %v1459_v50, %v1458_v49  ;;  %v1460_v57 = vld [vmem:[#allocation10 + $0x1e0] sm:$0xff]  ;;  %v1461_v58 = vld [vmem:[#allocation10 + $0x1e8] sm:$0xff]  ;;  %v5884_v59 = vpack.c.bf16 %v788_v53, %v787_v52  ;;  %v789_v60 = vld [vmem:[#allocation10 + $0xf0] sm:$0xff] }
 0x15c   : > { %5918 = vmatprep.subr.bf16.mxu1 %v5917_v4  ;;  %v790_v61 = vld [vmem:[#allocation10 + $0xf8] sm:$0xff]  ;;  %v5940_v63 = vpack.c.bf16 %v1461_v58, %v1460_v57  ;;  %v1480_v1 = vld [vmem:[#allocation10 + $0x280] sm:$0xff]  ;;  %v1481_v2 = vld [vmem:[#allocation10 + $0x288] sm:$0xff] }
 0x15d   : > { %5858 = vmatpush1.bf16.msra.mxu0 %v5857_v56  ;;  %v7434_v56 = vld [vmem:[#allocation2 + $0x92] sm:$0xff]  ;;  %v7442_v3 = vld [vmem:[#allocation2 + $0xaa] sm:$0xff]  ;;  %v5969_v7 = vpack.c.bf16 %v1481_v2, %v1480_v1  ;;  %v1482_v10 = vld [vmem:[#allocation10 + $0x290] sm:$0xff] }
 0x15e   : > { %5859 = vmatprep.subr.bf16.mxu0 %v9455_v23  ;;  %v1463_v5 = vld [vmem:[#allocation10 + $0x1f8] sm:$0xff]  ;;  %v7448_v8 = vld [vmem:[#allocation2 + $0xb2] sm:$0xff]  ;;  %v7483_v45 = vld [vmem:[#allocation2 + $0x20] sm:$0xff] }
 0x15f   : > { %5920 = vmatpush3.bf16.msra.mxu1 %v5917_v4  ;;  %v1462_v4 = vld [vmem:[#allocation10 + $0x1f0] sm:$0xff]  ;;  %v1464_v13 = vld [vmem:[#allocation10 + $0x200] sm:$0xff]  ;;  %v1485_v21 = vld [vmem:[#allocation10 + $0x2a8] sm:$0xff] }
 0x160   : > { %5921 = vmatprep.subr.bf16.mxu1 %v9455_v23  ;;  %v5943_v9 = vpack.c.bf16 %v1463_v5, %v1462_v4  ;;  %v7450_v12 = vld [vmem:[#allocation2 + $0xc2] sm:$0xff]  ;;  %v7455_v18 = vld [vmem:[#allocation2 + $0xca] sm:$0xff]  ;;  %v7461_v27 = vld [vmem:[#allocation2 + $0x19] sm:$0xff] }
 0x161   : > { %5861 = vmatpush1.bf16.msra.mxu0 %v5860_v62  ;;  %v7440_v62 = vld [vmem:[#allocation2 + $0x9a] sm:$0xff]  ;;  %v1484_v20 = vld [vmem:[#allocation10 + $0x2a0] sm:$0xff]  ;;  %v652_v26 = vld [vmem:[#allocation2 + $0x8] sm:$0xff] }
 0x162   : > { %5862 = vmatprep.subr.bf16.mxu0 %v9455_v23  ;;  %5376 = vmatmul.mubr.f32.vlgmr.msra.gmra.mrb[0].mxu1 %v724_v14  ;;  %v1465_v14 = vld [vmem:[#allocation10 + $0x208] sm:$0xff]  ;;  %v7464_v29 = vld [vmem:[#allocation2 + $0xe2] sm:$0xff]  ;;  %v1468_v34 = vld [vmem:[#allocation10 + $0x220] sm:$0xff] }
 0x163   : > { %5923 = vmatpush1.bf16.msra.mxu1 %v5922_v15  ;;  %5378 = vmatprep.mubr.f32.mxu1 %v725_v16  ;;  %v651_v15 = vld [vmem:[#allocation2] sm:$0xff]  ;;  %v688_v16 = vld [vmem:[#allocation2 + $0x9] sm:$0xff]  ;;  %v1469_v35 = vld [vmem:[#allocation10 + $0x228] sm:$0xff] }
 0x164   : > { %5924 = vmatprep.subr.bf16.mxu1 %v9455_v23  ;;  %v7473_v36 = vld [vmem:[#allocation2 + $0x21] sm:$0xff]  ;;  %v1489_v41 = vld [vmem:[#allocation10 + $0x2c8] sm:$0xff]  ;;  %v7479_v42 = vld [vmem:[#allocation2 + $0x10a] sm:$0xff] }
 0x165   : > { %5864 = vmatpush1.bf16.msra.mxu0 %v5863_v6  ;;  %v5887_v6 = vpack.c.bf16 %v790_v61, %v789_v60  ;;  %v1471_v44 = vld [vmem:[#allocation10 + $0x238] sm:$0xff]  ;;  %v7489_v50 = vld [vmem:[#allocation2 + $0x112] sm:$0xff]  ;;  %v1490_v52 = vld [vmem:[#allocation10 + $0x2d0] sm:$0xff] }
 0x166   : > { %5865 = vmatprep.subr.bf16.mxu0 %v9455_v23  ;;  %5379 = vmatmul.mubr.f32.gmra.mrb[2].mxu1 %v726_v22  ;;  %v7457_v22 = vld [vmem:[#allocation2 + $0xda] sm:$0xff]  ;;  %v1491_v53 = vld [vmem:[#allocation10 + $0x2d8] sm:$0xff]  ;;  %v1472_v57 = vld [vmem:[#allocation10 + $0x240] sm:$0xff] }
 0x167   : > { %5926 = vmatpush1.bf16.msra.mxu1 %v5925_v24  ;;  %5381 = vmatprep.mubr.f32.mxu1 %v727_v25  ;;  %v1466_v24 = vld [vmem:[#allocation10 + $0x210] sm:$0xff]  ;;  %v1467_v25 = vld [vmem:[#allocation10 + $0x218] sm:$0xff]  ;;  %v1473_v58 = vld [vmem:[#allocation10 + $0x248] sm:$0xff]  ;;  %v5989_v61 = vpack.c.bf16 %v1491_v53, %v1490_v52 }
 0x168   : > { %5927 = vmatprep.subr.bf16.mxu1 %v9455_v23  ;;  %v5949_v30 = vpack.c.bf16 %v1467_v25, %v1466_v24  ;;  %v7499_v60 = vld [vmem:[#allocation2 + $0x39] sm:$0xff]  ;;  %v5958_v1 = vpack.c.bf16 %v1473_v58, %v1472_v57  ;;  %v1492_v2 = vld [vmem:[#allocation10 + $0x2e0] sm:$0xff]  ;;  %v7567_v53 = vld [vmem:[#allocation2 + $0x1a2] sm:$0xff] }
 0x169   : > { %5867 = vmatpush1.bf16.msra.mxu0 %v5866_v11  ;;  %v1483_v11 = vld [vmem:[#allocation10 + $0x298] sm:$0xff]  ;;  %v1493_v4 = vld [vmem:[#allocation10 + $0x2e8] sm:$0xff]  ;;  %9535 = vst [vmem:[#allocation39_spill] sm:$0xff] %v7567_v53  ;;  %v2130_v57 = vld [vmem:[#allocation10 + $0x300] sm:$0xff] }
 0x16a   : > { %5868 = vmatprep.subr.bf16.mxu0 %v9455_v23  ;;  %5382 = vmatmul.mubr.f32.gmra.mrb[4].mxu1 %v728_v31  ;;  %v5973_v17 = vpack.c.bf16 %v1483_v11, %v1482_v10  ;;  %v1486_v31 = vld [vmem:[#allocation10 + $0x2b0] sm:$0xff]  ;;  %v7512_v10 = vld [vmem:[#allocation2 + $0x49] sm:$0xff]  ;;  %v5993_v11 = vpack.c.bf16 %v1493_v4, %v1492_v2  ;;  %v7525_v24 = vld [vmem:[#allocation2 + $0x51] sm:$0xff] }
 0x16b   : > { %5929 = vmatpush1.bf16.msra.mxu1 %v5928_v32  ;;  %5384 = vmatprep.mubr.f32.mxu1 %v729_v33  ;;  %v1487_v32 = vld [vmem:[#allocation10 + $0x2b8] sm:$0xff]  ;;  %v7466_v33 = vld [vmem:[#allocation2 + $0xf2] sm:$0xff]  ;;  %v7505_v5 = vld [vmem:[#allocation2 + $0x13a] sm:$0xff] }
 0x16c   : > { %5930 = vmatprep.subr.bf16.mxu1 %v9455_v23  ;;  %v5981_v37 = vpack.c.bf16 %v1487_v32, %v1486_v31  ;;  %v1478_v31 = vld [vmem:[#allocation10 + $0x270] sm:$0xff]  ;;  %v1479_v32 = vld [vmem:[#allocation10 + $0x278] sm:$0xff]  ;;  %v2131_v58 = vld [vmem:[#allocation10 + $0x308] sm:$0xff] }
 0x16d   : > { %5870 = vmatpush1.bf16.msra.mxu0 %v5869_v19  ;;  %v5946_v19 = vpack.c.bf16 %v1465_v14, %v1464_v13  ;;  %v7515_v13 = vld [vmem:[#allocation2 + $0x142] sm:$0xff]  ;;  %v7564_v52 = vld [vmem:[#allocation2 + $0x79] sm:$0xff]  ;;  %v6002_v2 = vpack.c.bf16 %v2131_v58, %v2130_v57  ;;  %v7609_v57 = vld [vmem:[#allocation2 + $0xb1] sm:$0xff] }
 0x16e   : > { %5871 = vmatprep.subr.bf16.mxu0 %v9455_v23  ;;  %5385 = vmatmul.mubr.f32.gmra.mrb[6].mxu1 %v730_v38  ;;  %v7476_v38 = vld [vmem:[#allocation2 + $0xfa] sm:$0xff]  ;;  %9534 = vst [vmem:[#allocation38_spill] sm:$0xff] %v7564_v52  ;;  %v2162_v58 = vld [vmem:[#allocation10 + $0x400] sm:$0xff] }
 0x16f   : > { %5387 = vmatprep.mubr.f32.mxu1 %v731_v40  ;;  %5932 = vmatpush1.bf16.msra.mxu1 %v5931_v39  ;;  %v5952_v39 = vpack.c.bf16 %v1469_v35, %v1468_v34  ;;  %v1488_v40 = vld [vmem:[#allocation10 + $0x2c0] sm:$0xff]  ;;  %v7538_v35 = vld [vmem:[#allocation2 + $0x61] sm:$0xff] }
 0x170   : > { %5933 = vmatprep.subr.bf16.mxu1 %v9455_v23  ;;  %v5985_v49 = vpack.c.bf16 %v1489_v41, %v1488_v40  ;;  %v7535_v34 = vld [vmem:[#allocation2 + $0x50] sm:$0xff]  ;;  %v7544_v40 = vld [vmem:[#allocation2 + $0x182] sm:$0xff] }
 0x171   : > { %5873 = vmatpush1.bf16.msra.mxu0 %v5872_v28  ;;  %v5977_v28 = vpack.c.bf16 %v1485_v21, %v1484_v20  ;;  %v1477_v20 = vld [vmem:[#allocation10 + $0x268] sm:$0xff]  ;;  %v7522_v21 = vld [vmem:[#allocation2 + $0x48] sm:$0xff]  ;;  %v7548_v41 = vld [vmem:[#allocation2 + $0x60] sm:$0xff] }
 0x172   : > { %5874 = vmatprep.subr.bf16.mxu0 %v9455_v23  ;;  %5388 = vmatmul.mubr.f32.gmra.mrb[8].mxu1 %v7424_v46  ;;  %v2132_v4 = vld [vmem:[#allocation10 + $0x310] sm:$0xff] }
 0x173   : > { %5390 = vmatprep.mubr.f32.mxu1 %v7427_v48  ;;  %5935 = vmatpush1.bf16.msra.mxu1 %v5934_v47  ;;  %v7486_v47 = vld [vmem:[#allocation2 + $0x31] sm:$0xff] }
 0x174   : > { %5936 = vmatprep.subr.bf16.mxu1 %v9455_v23 }
 0x175   : > { %5876 = vmatpush1.bf16.msra.mxu0 %v5875_v0  ;;  %v7470_v0 = vld [vmem:[#allocation2 + $0x18] sm:$0xff] }
 0x176   : > { %5877 = vmatprep.subr.bf16.mxu0 %v9455_v23  ;;  %5391 = vmatmul.mubr.f32.gmra.mrb[10].mxu1 %v7432_v54 }
 0x177   : > { %5393 = vmatprep.mubr.f32.mxu1 %v7434_v56  ;;  %5938 = vmatpush1.bf16.msra.mxu1 %v5937_v55  ;;  %v7492_v55 = vld [vmem:[#allocation2 + $0x122] sm:$0xff] }
 0x178   : > { %5939 = vmatprep.subr.bf16.mxu1 %v9455_v23 }
 0x179   : > { %5879 = vmatpush1.bf16.msra.mxu0 %v5878_v43  ;;  %v1470_v43 = vld [vmem:[#allocation10 + $0x230] sm:$0xff] }
 0x17a   : > { %5880 = vmatprep.subr.bf16.mxu0 %v9455_v23  ;;  %5394 = vmatmul.mubr.f32.gmra.mrb[12].mxu1 %v7440_v62 }
 0x17b   : > { %5396 = vmatprep.mubr.f32.mxu1 %v7442_v3  ;;  %5941 = vmatpush1.bf16.msra.mxu1 %v5940_v63  ;;  %v7502_v63 = vld [vmem:[#allocation2 + $0x12a] sm:$0xff] }
 0x17c   : > { %5942 = vmatprep.subr.bf16.mxu1 %v9455_v23 }
 0x17d   : > { %5882 = vmatpush1.bf16.msra.mxu0 %v5881_v51  ;;  %v5955_v51 = vpack.c.bf16 %v1471_v44, %v1470_v43  ;;  %v7551_v43 = vld [vmem:[#allocation2 + $0x69] sm:$0xff] }
 0x17e   : > { %5883 = vmatprep.subr.bf16.mxu0 %v9455_v23  ;;  %5397 = vmatmul.mubr.f32.gmra.mrb[14].mxu1 %v7448_v8  ;;  %9530 = vst [vmem:[#allocation34_spill] sm:$0xff] %v7551_v43  ;;  %v7554_v44 = vld [vmem:[#allocation2 + $0x18a] sm:$0xff] }
 0x17f   : > { %5399 = vmatprep.mubr.f32.mxu1 %v7450_v12  ;;  %5944 = vmatpush1.bf16.msra.mxu1 %v5943_v9  ;;  %v7509_v9 = vld [vmem:[#allocation2 + $0x38] sm:$0xff]  ;;  %9531 = vst [vmem:[#allocation35_spill] sm:$0xff] %v7554_v44 }
 0x180   : > { %5945 = vmatprep.subr.bf16.mxu1 %v9455_v23 }
 0x181   : > { %5885 = vmatpush1.bf16.msra.mxu0 %v5884_v59  ;;  %v7496_v59 = vld [vmem:[#allocation2 + $0x30] sm:$0xff] }
 0x182   : > { %5886 = vmatprep.subr.bf16.mxu0 %v9455_v23  ;;  %5400 = vmatmul.mubr.f32.gmra.mrb[16].mxu1 %v7455_v18 }
 0x183   : > { %5402 = vmatprep.mubr.f32.mxu1 %v7457_v22  ;;  %5947 = vmatpush1.bf16.msra.mxu1 %v5946_v19  ;;  %v1476_v19 = vld [vmem:[#allocation10 + $0x260] sm:$0xff] }
 0x184   : > { %5948 = vmatprep.subr.bf16.mxu1 %v9455_v23 }
 0x185   : > { %5888 = vmatpush1.bf16.msra.mxu0 %v5887_v6  ;;  %v1474_v6 = vld [vmem:[#allocation10 + $0x250] sm:$0xff] }
 0x186   : > { %5970 = vmatprep.subr.bf16.mxu0 %v5969_v7  ;;  %5403 = vmatmul.mubr.f32.gmra.mrb[18].mxu1 %v7464_v29 }
 0x187   : > { %5405 = vmatprep.mubr.f32.mxu1 %v7466_v33  ;;  %5950 = vmatpush1.bf16.msra.mxu1 %v5949_v30  ;;  %v7531_v30 = vld [vmem:[#allocation2 + $0x16a] sm:$0xff] }
 0x188   : > { %872 = vmatmul.mubr.f32.vlgmr.msra.gmra.mrb[0].mxu0 %v651_v15  ;;  %5951 = vmatprep.subr.bf16.mxu1 %v9455_v23  ;;  %v1494_v15 = vld [vmem:[#allocation10 + $0x2f0] sm:$0xff] }
 0x189   : > { %876 = vmatprep.mubr.f32.mxu0 %v688_v16  ;;  %5972 = vmatpush3.bf16.msra.mxu0 %v5969_v7  ;;  %v1475_v7 = vld [vmem:[#allocation10 + $0x258] sm:$0xff] }
 0x18a   : > { %5974 = vmatprep.subr.bf16.mxu0 %v5973_v17  ;;  %5406 = vmatmul.mubr.f32.gmra.mrb[20].mxu1 %v7476_v38  ;;  %v5961_v14 = vpack.c.bf16 %v1475_v7, %v1474_v6  ;;  %v1495_v16 = vld [vmem:[#allocation10 + $0x2f8] sm:$0xff]  ;;  %v7579_v7 = vld [vmem:[#allocation2 + $0x80] sm:$0xff] }
 0x18b   : > { %5408 = vmatprep.mubr.f32.mxu1 %v7479_v42  ;;  %5953 = vmatpush1.bf16.msra.mxu1 %v5952_v39  ;;  %v5997_v25 = vpack.c.bf16 %v1495_v16, %v1494_v15  ;;  %v5967_v39 = vpack.c.bf16 %v1479_v32, %v1478_v31  ;;  %v2133_v6 = vld [vmem:[#allocation10 + $0x318] sm:$0xff]  ;;  %9538 = vst [vmem:[#allocation42_spill] sm:$0xff] %v7579_v7  ;;  %v2135_v15 = vld [vmem:[#allocation10 + $0x328] sm:$0xff]  ;;  %v7588_v16 = vld [vmem:[#allocation2 + $0x90] sm:$0xff] }
 0x18c   : > { %877 = vmatmul.mubr.f32.gmra.mrb[2].mxu0 %v652_v26  ;;  %5954 = vmatprep.subr.bf16.mxu1 %v9455_v23  ;;  %v7528_v26 = vld [vmem:[#allocation2 + $0x15a] sm:$0xff]  ;;  %v2138_v31 = vld [vmem:[#allocation10 + $0x340] sm:$0xff] }
 0x18d   : > { %881 = vmatprep.mubr.f32.mxu0 %v7461_v27  ;;  %5976 = vmatpush3.bf16.msra.mxu0 %v5973_v17  ;;  %v7518_v17 = vld [vmem:[#allocation2 + $0x152] sm:$0xff] }
 0x18e   : > { %5978 = vmatprep.subr.bf16.mxu0 %v5977_v28  ;;  %5409 = vmatmul.mubr.f32.gmra.mrb[22].mxu1 %v7489_v50  ;;  %v2139_v32 = vld [vmem:[#allocation10 + $0x348] sm:$0xff] }
 0x18f   : > { %5411 = vmatprep.mubr.f32.mxu1 %v7492_v55  ;;  %5956 = vmatpush1.bf16.msra.mxu1 %v5955_v51  ;;  %v7561_v51 = vld [vmem:[#allocation2 + $0x68] sm:$0xff] }
 0x190   : > { %882 = vmatmul.mubr.f32.gmra.mrb[4].mxu0 %v7470_v0  ;;  %5957 = vmatprep.subr.bf16.mxu1 %v9455_v23  ;;  %9533 = vst [vmem:[#allocation37_spill] sm:$0xff] %v7561_v51 }
 0x191   : > { %886 = vmatprep.mubr.f32.mxu0 %v7473_v36  ;;  %5980 = vmatpush3.bf16.msra.mxu0 %v5977_v28  ;;  %v5964_v28 = vpack.c.bf16 %v1477_v20, %v1476_v19  ;;  %v7591_v19 = vld [vmem:[#allocation2 + $0x99] sm:$0xff]  ;;  %v2137_v20 = vld [vmem:[#allocation10 + $0x338] sm:$0xff] }
 0x192   : > { %5982 = vmatprep.subr.bf16.mxu0 %v5981_v37  ;;  %5412 = vmatmul.mubr.f32.gmra.mrb[24].mxu1 %v7502_v63 }
 0x193   : > { %5414 = vmatprep.mubr.f32.mxu1 %v7505_v5  ;;  %5959 = vmatpush1.bf16.msra.mxu1 %v5958_v1  ;;  %v7574_v1 = vld [vmem:[#allocation2 + $0x81] sm:$0xff] }
 0x194   : > { %887 = vmatmul.mubr.f32.gmra.mrb[6].mxu0 %v7483_v45  ;;  %5960 = vmatprep.subr.bf16.mxu1 %v9455_v23  ;;  %9537 = vst [vmem:[#allocation41_spill] sm:$0xff] %v7574_v1 }
 0x195   : > { %891 = vmatprep.mubr.f32.mxu0 %v7486_v47  ;;  %5984 = vmatpush3.bf16.msra.mxu0 %v5981_v37  ;;  %v7541_v37 = vld [vmem:[#allocation2 + $0x172] sm:$0xff] }
 0x196   : > { %5986 = vmatprep.subr.bf16.mxu0 %v5985_v49  ;;  %5415 = vmatmul.mubr.f32.gmra.mrb[26].mxu1 %v7515_v13 }
 0x197   : > { %5417 = vmatprep.mubr.f32.mxu1 %v7518_v17  ;;  %5962 = vmatpush1.bf16.msra.mxu1 %v5961_v14  ;;  %v6005_v14 = vpack.c.bf16 %v2133_v6, %v2132_v4  ;;  %v6014_v4 = vpack.c.bf16 %v2139_v32, %v2138_v31  ;;  %v7627_v31 = vld [vmem:[#allocation2 + $0xc0] sm:$0xff]  ;;  %v7630_v32 = vld [vmem:[#allocation2 + $0xc9] sm:$0xff] }
 0x198   : > { %892 = vmatmul.mubr.f32.gmra.mrb[8].mxu0 %v7496_v59  ;;  %5963 = vmatprep.subr.bf16.mxu1 %v9455_v23 }
 0x199   : > { %896 = vmatprep.mubr.f32.mxu0 %v7499_v60  ;;  %5988 = vmatpush3.bf16.msra.mxu0 %v5985_v49  ;;  %v7557_v49 = vld [vmem:[#allocation2 + $0x19a] sm:$0xff] }
 0x19a   : > { %5990 = vmatprep.subr.bf16.mxu0 %v5989_v61  ;;  %5418 = vmatmul.mubr.f32.gmra.mrb[28].mxu1 %v7528_v26  ;;  %9532 = vst [vmem:[#allocation36_spill] sm:$0xff] %v7557_v49 }
 0x19b   : > { %5420 = vmatprep.mubr.f32.mxu1 %v7531_v30  ;;  %5965 = vmatpush1.bf16.msra.mxu1 %v5964_v28  ;;  %v7600_v28 = vld [vmem:[#allocation2 + $0xa9] sm:$0xff] }
 0x19c   : > { %897 = vmatmul.mubr.f32.gmra.mrb[10].mxu0 %v7509_v9  ;;  %5966 = vmatprep.subr.bf16.mxu1 %v9455_v23 }
 0x19d   : > { %901 = vmatprep.mubr.f32.mxu0 %v7512_v10  ;;  %5992 = vmatpush3.bf16.msra.mxu0 %v5989_v61  ;;  %v7571_v61 = vld [vmem:[#allocation2 + $0x78] sm:$0xff] }
 0x19e   : > { %5994 = vmatprep.subr.bf16.mxu0 %v5993_v11  ;;  %5421 = vmatmul.mubr.f32.gmra.mrb[30].mxu1 %v7541_v37  ;;  %9536 = vst [vmem:[#allocation40_spill] sm:$0xff] %v7571_v61 }
 0x19f   : > { %5423 = vmatprep.mubr.f32.mxu1 %v7544_v40  ;;  %5968 = vmatpush1.bf16.msra.mxu1 %v5967_v39  ;;  %v7606_v39 = vld [vmem:[#allocation2 + $0xa8] sm:$0xff] }
 0x1a0   : > { %902 = vmatmul.mubr.f32.gmra.mrb[12].mxu0 %v7522_v21  ;;  %6001 = vmatprep.subr.bf16.mxu1 %v9455_v23 }
 0x1a1   : > { %906 = vmatprep.mubr.f32.mxu0 %v7525_v24  ;;  %5996 = vmatpush3.bf16.msra.mxu0 %v5993_v11  ;;  %v7582_v11 = vld [vmem:[#allocation2 + $0x91] sm:$0xff] }
 0x1a2   : > { %5998 = vmatprep.subr.bf16.mxu0 %v5997_v25  ;;  %5424 = vmatmul.mubr.f32.gmra.mrb[32].mxu1 %v7554_v44 }
 0x1a3   : > { %5426 = vmatprep.mubr.f32.mxu1 %v7557_v49  ;;  %v7648_v49 = vld [vmem:[#allocation2 + $0xe1] sm:$0xff] }
 0x1a4   : > { %907 = vmatmul.mubr.f32.gmra.mrb[14].mxu0 %v7535_v34 }
 0x1a5   : > { %911 = vmatprep.mubr.f32.mxu0 %v7538_v35  ;;  %6000 = vmatpush3.bf16.msra.mxu0 %v5997_v25  ;;  %v7597_v25 = vld [vmem:[#allocation2 + $0x98] sm:$0xff] }
 0x1a6   : > { %5427 = vmatmul.mubr.f32.gmra.mrb[34].mxu1 %v7567_v53 }
 0x1a7   : > { %1560 = vmatprep.mubr.f32.mxu1 %v7461_v27  ;;  %v2134_v27 = vld [vmem:[#allocation10 + $0x320] sm:$0xff] }
 0x1a8   : > { %912 = vmatmul.mubr.f32.gmra.mrb[16].mxu0 %v7548_v41 }
 0x1a9   : > { %916 = vmatprep.mubr.f32.mxu0 %v7551_v43 }
 0x1aa   : > { %1561 = vmatmul.mubr.f32.vlgmr.msra.gmra.mrb[36].mxu1 %v7470_v0  ;;  %v6008_v0 = vpack.c.bf16 %v2135_v15, %v2134_v27  ;;  %v2141_v27 = vld [vmem:[#allocation10 + $0x358] sm:$0xff]  ;;  %v7617_v15 = vld [vmem:[#allocation2 + $0xb0] sm:$0xff] }
 0x1ab   : > { %6003 = vmatpush1.bf16.msra.mxu1 %v6002_v2  ;;  %1565 = vmatprep.mubr.f32.mxu1 %v7473_v36  ;;  %v2136_v36 = vld [vmem:[#allocation10 + $0x330] sm:$0xff]  ;;  %v2163_v2 = vld [vmem:[#allocation10 + $0x408] sm:$0xff] }
 0x1ac   : > { %917 = vmatmul.mubr.f32.gmra.mrb[18].mxu0 %v7561_v51  ;;  %6004 = vmatprep.subr.bf16.mxu1 %v9455_v23  ;;  %v7612_v6 = vpack.c.bf16 %v2163_v2, %v2162_v58  ;;  %v2144_v2 = vld [vmem:[#allocation10 + $0x370] sm:$0xff] }
 0x1ad   : > { %921 = vmatprep.mubr.f32.mxu0 %v7564_v52 }
 0x1ae   : > { %1566 = vmatmul.mubr.f32.gmra.mrb[38].mxu1 %v7483_v45  ;;  %v6011_v45 = vpack.c.bf16 %v2137_v20, %v2136_v36  ;;  %6050 = vmatprep.subr.bf16.mxu0 %v7612_v6  ;;  %v2142_v20 = vld [vmem:[#allocation10 + $0x360] sm:$0xff] }
 0x1af   : > { %1570 = vmatprep.mubr.f32.mxu1 %v7486_v47  ;;  %6006 = vmatpush1.bf16.msra.mxu1 %v6005_v14  ;;  %v2140_v14 = vld [vmem:[#allocation10 + $0x350] sm:$0xff] }
 0x1b0   : > { %922 = vmatmul.mubr.f32.gmra.mrb[20].mxu0 %v7571_v61  ;;  %6007 = vmatprep.subr.bf16.mxu1 %v9455_v23  ;;  %v6017_v36 = vpack.c.bf16 %v2141_v27, %v2140_v14  ;;  %v7636_v14 = vld [vmem:[#allocation2 + $0xc8] sm:$0xff]  ;;  %v7639_v27 = vld [vmem:[#allocation2 + $0xd9] sm:$0xff] }
 0x1b1   : > { %926 = vmatprep.mubr.f32.mxu0 %v7574_v1 }
 0x1b2   : > { %1571 = vmatmul.mubr.f32.gmra.mrb[40].mxu1 %v7496_v59 }
 0x1b3   : > { %1575 = vmatprep.mubr.f32.mxu1 %v7499_v60  ;;  %6009 = vmatpush1.bf16.msra.mxu1 %v6008_v0  ;;  %v7621_v0 = vld [vmem:[#allocation2 + $0xc1] sm:$0xff] }
 0x1b4   : > { %927 = vmatmul.mubr.f32.gmra.mrb[22].mxu0 %v7579_v7  ;;  %6010 = vmatprep.subr.bf16.mxu1 %v9455_v23 }
 0x1b5   : > { %931 = vmatprep.mubr.f32.mxu0 %v7582_v11 }
 0x1b6   : > { %1576 = vmatmul.mubr.f32.gmra.mrb[42].mxu1 %v7509_v9 }
 0x1b7   : > { %1580 = vmatprep.mubr.f32.mxu1 %v7512_v10  ;;  %6012 = vmatpush1.bf16.msra.mxu1 %v6011_v45  ;;  %v2143_v45 = vld [vmem:[#allocation10 + $0x368] sm:$0xff] }
 0x1b8   : > { %932 = vmatmul.mubr.f32.gmra.mrb[24].mxu0 %v7588_v16  ;;  %6013 = vmatprep.subr.bf16.mxu1 %v9455_v23  ;;  %v6020_v58 = vpack.c.bf16 %v2143_v45, %v2142_v20  ;;  %v2147_v20 = vld [vmem:[#allocation10 + $0x388] sm:$0xff] }
 0x1b9   : > { %936 = vmatprep.mubr.f32.mxu0 %v7591_v19  ;;  %v7645_v45 = vld [vmem:[#allocation2 + $0xd8] sm:$0xff] }
 0x1ba   : > { %1581 = vmatmul.mubr.f32.gmra.mrb[44].mxu1 %v7522_v21 }
 0x1bb   : > { %1585 = vmatprep.mubr.f32.mxu1 %v7525_v24  ;;  %6015 = vmatpush1.bf16.msra.mxu1 %v6014_v4  ;;  %v2145_v4 = vld [vmem:[#allocation10 + $0x378] sm:$0xff] }
 0x1bc   : > { %937 = vmatmul.mubr.f32.gmra.mrb[26].mxu0 %v7597_v25  ;;  %6016 = vmatprep.subr.bf16.mxu1 %v9455_v23  ;;  %v6023_v53 = vpack.c.bf16 %v2145_v4, %v2144_v2  ;;  %v2149_v2 = vld [vmem:[#allocation10 + $0x398] sm:$0xff]  ;;  %v7654_v4 = vld [vmem:[#allocation2 + $0xe0] sm:$0xff] }
 0x1bd   : > { %941 = vmatprep.mubr.f32.mxu0 %v7600_v28 }
 0x1be   : > { %1586 = vmatmul.mubr.f32.gmra.mrb[46].mxu1 %v7535_v34 }
 0x1bf   : > { %1590 = vmatprep.mubr.f32.mxu1 %v7538_v35  ;;  %6018 = vmatpush1.bf16.msra.mxu1 %v6017_v36  ;;  %v2146_v36 = vld [vmem:[#allocation10 + $0x380] sm:$0xff] }
 0x1c0   : > { %942 = vmatmul.mubr.f32.gmra.mrb[28].mxu0 %v7606_v39  ;;  %6019 = vmatprep.subr.bf16.mxu1 %v9455_v23  ;;  %v6026_v44 = vpack.c.bf16 %v2147_v20, %v2146_v36  ;;  %v2151_v36 = vld [vmem:[#allocation10 + $0x3a8] sm:$0xff]  ;;  %v7663_v20 = vld [vmem:[#allocation2 + $0xf0] sm:$0xff] }
 0x1c1   : > { %946 = vmatprep.mubr.f32.mxu0 %v7609_v57 }
 0x1c2   : > { %1591 = vmatmul.mubr.f32.gmra.mrb[48].mxu1 %v7548_v41 }
 0x1c3   : > { %1595 = vmatprep.mubr.f32.mxu1 %v7551_v43  ;;  %6021 = vmatpush1.bf16.msra.mxu1 %v6020_v58  ;;  %v2148_v58 = vld [vmem:[#allocation10 + $0x390] sm:$0xff]  ;;  %v7657_v43 = vld [vmem:[#allocation2 + $0xf1] sm:$0xff] }
 0x1c4   : > { %947 = vmatmul.mubr.f32.gmra.mrb[30].mxu0 %v7617_v15  ;;  %6022 = vmatprep.subr.bf16.mxu1 %v9455_v23 }
 0x1c5   : > { %951 = vmatprep.mubr.f32.mxu0 %v7621_v0 }
 0x1c6   : > { %1596 = vmatmul.mubr.f32.gmra.mrb[50].mxu1 %v7561_v51  ;;  %v7666_v51 = vld [vmem:[#allocation2 + $0xf9] sm:$0xff] }
 0x1c7   : > { %1600 = vmatprep.mubr.f32.mxu1 %v7564_v52  ;;  %6024 = vmatpush1.bf16.msra.mxu1 %v6023_v53  ;;  %v6029_v52 = vpack.c.bf16 %v2149_v2, %v2148_v58  ;;  %v2150_v53 = vld [vmem:[#allocation10 + $0x3a0] sm:$0xff]  ;;  %v2153_v58 = vld [vmem:[#allocation10 + $0x3b8] sm:$0xff]  ;;  %v7672_v2 = vld [vmem:[#allocation2 + $0xf8] sm:$0xff] }
 0x1c8   : > { %952 = vmatmul.mubr.f32.gmra.mrb[32].mxu0 %v7627_v31  ;;  %6025 = vmatprep.subr.bf16.mxu1 %v9455_v23 }
 0x1c9   : > { %956 = vmatprep.mubr.f32.mxu0 %v7630_v32 }
 0x1ca   : > { %1601 = vmatmul.mubr.f32.gmra.mrb[52].mxu1 %v7571_v61  ;;  %v7675_v61 = vld [vmem:[#allocation2 + $0x109] sm:$0xff] }
 0x1cb   : > { %1605 = vmatprep.mubr.f32.mxu1 %v7574_v1  ;;  %6027 = vmatpush1.bf16.msra.mxu1 %v6026_v44  ;;  %v6032_v1 = vpack.c.bf16 %v2151_v36, %v2150_v53  ;;  %v2152_v44 = vld [vmem:[#allocation10 + $0x3b0] sm:$0xff]  ;;  %v2155_v53 = vld [vmem:[#allocation10 + $0x3c8] sm:$0xff]  ;;  %v7681_v36 = vld [vmem:[#allocation2 + $0x108] sm:$0xff] }
 0x1cc   : > { %957 = vmatmul.mubr.f32.gmra.mrb[34].mxu0 %v7636_v14  ;;  %6028 = vmatprep.subr.bf16.mxu1 %v9455_v23 }
 0x1cd   : > { %961 = vmatprep.mubr.f32.mxu0 %v7639_v27 }
 0x1ce   : > { %1606 = vmatmul.mubr.f32.gmra.mrb[54].mxu1 %v7579_v7  ;;  %v7684_v7 = vld [vmem:[#allocation2 + $0x111] sm:$0xff] }
 0x1cf   : > { %1610 = vmatprep.mubr.f32.mxu1 %v7582_v11  ;;  %6030 = vmatpush1.bf16.msra.mxu1 %v6029_v52  ;;  %v6035_v11 = vpack.c.bf16 %v2153_v58, %v2152_v44  ;;  %v2154_v52 = vld [vmem:[#allocation10 + $0x3c0] sm:$0xff]  ;;  %v7693_v58 = vld [vmem:[#allocation2 + $0x121] sm:$0xff] }
 0x1d0   : > { %962 = vmatmul.mubr.f32.gmra.mrb[36].mxu0 %v7645_v45  ;;  %6031 = vmatprep.subr.bf16.mxu1 %v9455_v23  ;;  %v7690_v44 = vld [vmem:[#allocation2 + $0x110] sm:$0xff] }
 0x1d1   : > { %966 = vmatprep.mubr.f32.mxu0 %v7648_v49 }
 0x1d2   : > { %1611 = vmatmul.mubr.f32.gmra.mrb[56].mxu1 %v7588_v16  ;;  %v6038_v16 = vpack.c.bf16 %v2155_v53, %v2154_v52  ;;  %v7699_v52 = vld [vmem:[#allocation2 + $0x120] sm:$0xff]  ;;  %v7702_v53 = vld [vmem:[#allocation2 + $0x129] sm:$0xff] }
 0x1d3   : > { %1615 = vmatprep.mubr.f32.mxu1 %v7591_v19  ;;  %6033 = vmatpush1.bf16.msra.mxu1 %v6032_v1  ;;  %v2156_v1 = vld [vmem:[#allocation10 + $0x3d0] sm:$0xff]  ;;  %v2157_v19 = vld [vmem:[#allocation10 + $0x3d8] sm:$0xff] }
 0x1d4   : > { %967 = vmatmul.mubr.f32.gmra.mrb[38].mxu0 %v7654_v4  ;;  %6034 = vmatprep.subr.bf16.mxu1 %v9455_v23 }
 0x1d5   : > { %971 = vmatprep.mubr.f32.mxu0 %v7657_v43 }
 0x1d6   : > { %1616 = vmatmul.mubr.f32.gmra.mrb[58].mxu1 %v7597_v25  ;;  %v6041_v25 = vpack.c.bf16 %v2157_v19, %v2156_v1  ;;  %v676_v1 = vld [vmem:[#allocation2 + $0x128] sm:$0xff]  ;;  %v713_v19 = vld [vmem:[#allocation2 + $0x139] sm:$0xff] }
 0x1d7   : > { %1620 = vmatprep.mubr.f32.mxu1 %v7600_v28  ;;  %6036 = vmatpush1.bf16.msra.mxu1 %v6035_v11  ;;  %v2158_v28 = vld [vmem:[#allocation10 + $0x3e0] sm:$0xff]  ;;  %v2159_v11 = vld [vmem:[#allocation10 + $0x3e8] sm:$0xff] }
 0x1d8   : > { %972 = vmatmul.mubr.f32.gmra.mrb[40].mxu0 %v7663_v20  ;;  %6037 = vmatprep.subr.bf16.mxu1 %v9455_v23 }
 0x1d9   : > { %976 = vmatprep.mubr.f32.mxu0 %v7666_v51 }
 0x1da   : > { %1621 = vmatmul.mubr.f32.gmra.mrb[60].mxu1 %v7606_v39  ;;  %v6044_v39 = vpack.c.bf16 %v2159_v11, %v2158_v28  ;;  %v678_v28 = vld [vmem:[#allocation2 + $0x140] sm:$0xff] }
 0x1db   : > { %1625 = vmatprep.mubr.f32.mxu1 %v7609_v57  ;;  %6039 = vmatpush1.bf16.msra.mxu1 %v6038_v16  ;;  %v2160_v57 = vld [vmem:[#allocation10 + $0x3f0] sm:$0xff]  ;;  %v2161_v16 = vld [vmem:[#allocation10 + $0x3f8] sm:$0xff] }
 0x1dc   : > { %977 = vmatmul.mubr.f32.gmra.mrb[42].mxu0 %v7672_v2  ;;  %6040 = vmatprep.subr.bf16.mxu1 %v9455_v23  ;;  %v7716_v11 = vld [vmem:[#allocation2 + $0x159] sm:$0xff] }
 0x1dd   : > { %981 = vmatprep.mubr.f32.mxu0 %v7675_v61 }
 0x1de   : > { %1626 = vmatmul.mubr.f32.gmra.mrb[62].mxu1 %v7617_v15  ;;  %v6047_v15 = vpack.c.bf16 %v2161_v16, %v2160_v57  ;;  %v7769_v57 = vld [vmem:[#allocation2 + $0x32] sm:$0xff] }
 0x1df   : > { %1630 = vmatprep.mubr.f32.mxu1 %v7621_v0  ;;  %6042 = vmatpush1.bf16.msra.mxu1 %v6041_v25  ;;  %v677_v0 = vld [vmem:[#allocation2 + $0x138] sm:$0xff]  ;;  %v714_v25 = vld [vmem:[#allocation2 + $0x141] sm:$0xff] }
 0x1e0   : > { %982 = vmatmul.mubr.f32.gmra.mrb[44].mxu0 %v7681_v36  ;;  %6043 = vmatprep.subr.bf16.mxu1 %v9455_v23 }
 0x1e1   : > { %986 = vmatprep.mubr.f32.mxu0 %v7684_v7 }
 0x1e2   : > { %1631 = vmatmul.mubr.f32.gmra.mrb[64].mxu1 %v7627_v31  ;;  %v715_v31 = vld [vmem:[#allocation2 + $0x151] sm:$0xff] }
 0x1e3   : > { %1635 = vmatprep.mubr.f32.mxu1 %v7630_v32  ;;  %6045 = vmatpush1.bf16.msra.mxu1 %v6044_v39  ;;  %v679_v32 = vld [vmem:[#allocation2 + $0x150] sm:$0xff]  ;;  %v1413_v39 = vld [vmem:[#allocation2 + $0x22] sm:$0xff] }
 0x1e4   : > { %987 = vmatmul.mubr.f32.gmra.mrb[46].mxu0 %v7690_v44  ;;  %6046 = vmatprep.subr.bf16.mxu1 %v9455_v23 }
 0x1e5   : > { %991 = vmatprep.mubr.f32.mxu0 %v7693_v58 }
 0x1e6   : > { %1636 = vmatmul.mubr.f32.gmra.mrb[66].mxu1 %v7636_v14  ;;  %v7720_v14 = vld [vmem:[#allocation2 + $0x158] sm:$0xff] }
 0x1e7   : > { %1640 = vmatprep.mubr.f32.mxu1 %v7639_v27  ;;  %6048 = vmatpush1.bf16.msra.mxu1 %v6047_v15  ;;  %v7723_v27 = vld [vmem:[#allocation2 + $0x169] sm:$0xff]  ;;  %v7772_v15 = vld [vmem:[#allocation2 + $0x3a] sm:$0xff] }
 0x1e8   : > { %992 = vmatmul.mubr.f32.gmra.mrb[48].mxu0 %v7699_v52 }
 0x1e9   : > { %996 = vmatprep.mubr.f32.mxu0 %v7702_v53 }
 0x1ea   : > { %1641 = vmatmul.mubr.f32.gmra.mrb[68].mxu1 %v7645_v45  ;;  %v7736_v45 = vld [vmem:[#allocation2 + $0x170] sm:$0xff] }
 0x1eb   : > { %1645 = vmatprep.mubr.f32.mxu1 %v7648_v49  ;;  %v7728_v49 = vld [vmem:[#allocation2 + $0x168] sm:$0xff] }
 0x1ec   : > { %997 = vmatmul.mubr.f32.gmra.mrb[50].mxu0 %v676_v1 }
 0x1ed   : > { %1001 = vmatprep.mubr.f32.mxu0 %v713_v19 }
 0x1ee   : > { %1646 = vmatmul.mubr.f32.gmra.mrb[70].mxu1 %v7654_v4  ;;  %v7744_v4 = vld [vmem:[#allocation2 + $0x180] sm:$0xff] }
 0x1ef   : > { %1650 = vmatprep.mubr.f32.mxu1 %v7657_v43  ;;  %v7731_v43 = vld [vmem:[#allocation2 + $0x171] sm:$0xff] }
 0x1f0   : > { %1002 = vmatmul.mubr.f32.gmra.mrb[52].mxu0 %v677_v0 }
 0x1f1   : > { %1006 = vmatprep.mubr.f32.mxu0 %v714_v25 }
 0x1f2   : > { %1651 = vmatmul.mubr.f32.gmra.mrb[72].mxu1 %v7663_v20  ;;  %v7752_v20 = vld [vmem:[#allocation2 + $0x188] sm:$0xff] }
 0x1f3   : > { %1655 = vmatprep.mubr.f32.mxu1 %v7666_v51  ;;  %v7739_v51 = vld [vmem:[#allocation2 + $0x181] sm:$0xff] }
 0x1f4   : > { %1007 = vmatmul.mubr.f32.gmra.mrb[54].mxu0 %v678_v28 }
 0x1f5   : > { %1011 = vmatprep.mubr.f32.mxu0 %v715_v31 }
 0x1f6   : > { %1656 = vmatmul.mubr.f32.gmra.mrb[74].mxu1 %v7672_v2  ;;  %v7760_v2 = vld [vmem:[#allocation2 + $0x198] sm:$0xff] }
 0x1f7   : > { %1660 = vmatprep.mubr.f32.mxu1 %v7675_v61  ;;  %v7747_v61 = vld [vmem:[#allocation2 + $0x189] sm:$0xff] }
 0x1f8   : > { %1012 = vmatmul.mubr.f32.gmra.mrb[56].mxu0 %v679_v32 }
 0x1f9   : > { %1016 = vmatprep.mubr.f32.mxu0 %v7716_v11 }
 0x1fa   : > { %1661 = vmatmul.mubr.f32.gmra.mrb[76].mxu1 %v7681_v36  ;;  %v7762_v36 = vld [vmem:[#allocation2 + $0x1a1] sm:$0xff] }
 0x1fb   : > { %1665 = vmatprep.mubr.f32.mxu1 %v7684_v7  ;;  %v7755_v7 = vld [vmem:[#allocation2 + $0x199] sm:$0xff] }
 0x1fc   : > { %1017 = vmatmul.mubr.f32.gmra.mrb[58].mxu0 %v7720_v14 }
 0x1fd   : > { %1021 = vmatprep.mubr.f32.mxu0 %v7723_v27 }
 0x1fe   : > { %1666 = vmatmul.mubr.f32.gmra.mrb[78].mxu1 %v7690_v44  ;;  %v7766_v44 = vld [vmem:[#allocation2 + $0x1a0] sm:$0xff] }
 0x1ff   : > { %1670 = vmatprep.mubr.f32.mxu1 %v7693_v58  ;;  %v1412_v58 = vld [vmem:[#allocation2 + $0x1a] sm:$0xff] }
 0x200   : > { %1022 = vmatmul.mubr.f32.gmra.mrb[60].mxu0 %v7728_v49 }
 0x201   : > { %1026 = vmatprep.mubr.f32.mxu0 %v7731_v43 }
 0x202   : > { %1671 = vmatmul.mubr.f32.gmra.mrb[80].mxu1 %v7699_v52  ;;  %v2164_v52 = vld [vmem:[#allocation10 + $0x410] sm:$0xff] }
 0x203   : > { %1675 = vmatprep.mubr.f32.mxu1 %v7702_v53  ;;  %v2165_v53 = vld [vmem:[#allocation10 + $0x418] sm:$0xff] }
 0x204   : > { %1027 = vmatmul.mubr.f32.gmra.mrb[62].mxu0 %v7736_v45  ;;  %v6053_v16 = vpack.c.bf16 %v2165_v53, %v2164_v52  ;;  %v7783_v52 = vld [vmem:[#allocation2 + $0x62] sm:$0xff]  ;;  %v2171_v53 = vld [vmem:[#allocation10 + $0x448] sm:$0xff] }
 0x205   : > { %1031 = vmatprep.mubr.f32.mxu0 %v7739_v51 }
 0x206   : > { %1676 = vmatmul.mubr.f32.gmra.mrb[82].mxu1 %v676_v1  ;;  %v2166_v1 = vld [vmem:[#allocation10 + $0x420] sm:$0xff] }
 0x207   : > { %1680 = vmatprep.mubr.f32.mxu1 %v713_v19  ;;  %v2167_v19 = vld [vmem:[#allocation10 + $0x428] sm:$0xff] }
 0x208   : > { %1032 = vmatmul.mubr.f32.gmra.mrb[64].mxu0 %v7744_v4 }
 0x209   : > { %1036 = vmatprep.mubr.f32.mxu0 %v7747_v61 }
 0x20a   : > { %1681 = vmatmul.mubr.f32.gmra.mrb[84].mxu1 %v677_v0  ;;  %v7775_v0 = vld [vmem:[#allocation2 + $0x4a] sm:$0xff] }
 0x20b   : > { %1685 = vmatprep.mubr.f32.mxu1 %v714_v25  ;;  %v6057_v25 = vpack.c.bf16 %v2167_v19, %v2166_v1  ;;  %v2175_v1 = vld [vmem:[#allocation10 + $0x468] sm:$0xff] }
 0x20c   : > { %1037 = vmatmul.mubr.f32.gmra.mrb[66].mxu0 %v7752_v20  ;;  %v2067_v19 = vld [vmem:[#allocation2 + $0x99] sm:$0xff] }
 0x20d   : > { %1041 = vmatprep.mubr.f32.mxu0 %v7755_v7 }
 0x20e   : > { %1686 = vmatmul.mubr.f32.gmra.mrb[86].mxu1 %v678_v28  ;;  %v2168_v28 = vld [vmem:[#allocation10 + $0x430] sm:$0xff] }
 0x20f   : > { %1690 = vmatprep.mubr.f32.mxu1 %v715_v31  ;;  %v7780_v31 = vld [vmem:[#allocation2 + $0x52] sm:$0xff] }
 0x210   : > { %1042 = vmatmul.mubr.f32.gmra.mrb[68].mxu0 %v7760_v2 }
 0x211   : > { %1046 = vmatprep.mubr.f32.mxu0 %v7762_v36 }
 0x212   : > { %1691 = vmatmul.mubr.f32.gmra.mrb[88].mxu1 %v679_v32  ;;  %v2170_v32 = vld [vmem:[#allocation10 + $0x440] sm:$0xff] }
 0x213   : > { %1695 = vmatprep.mubr.f32.mxu1 %v7716_v11  ;;  %v6065_v11 = vpack.c.bf16 %v2171_v53, %v2170_v32  ;;  %v2068_v53 = vld [vmem:[#allocation2 + $0xa9] sm:$0xff] }
 0x214   : > { %1047 = vmatmul.mubr.f32.gmra.mrb[70].mxu0 %v7766_v44 }
 0x215   : > { %5461 = vmatprep.mubr.f32.mxu0 %v1412_v58  ;;  %v2169_v58 = vld [vmem:[#allocation10 + $0x438] sm:$0xff] }
 0x216   : > { %1696 = vmatmul.mubr.f32.gmra.mrb[90].mxu1 %v7720_v14  ;;  %v2172_v14 = vld [vmem:[#allocation10 + $0x450] sm:$0xff] }
 0x217   : > { %1700 = vmatprep.mubr.f32.mxu1 %v7723_v27 }
 0x218   : > { %5462 = vmatmul.mubr.f32.vlgmr.msra.gmra.mrb[72].mxu0 %v1413_v39  ;;  %v2173_v39 = vld [vmem:[#allocation10 + $0x458] sm:$0xff] }
 0x219   : > { %5464 = vmatprep.mubr.f32.mxu0 %v7769_v57  ;;  %6052 = vmatpush3.bf16.msra.mxu0 %v7612_v6  ;;  %v6061_v6 = vpack.c.bf16 %v2169_v58, %v2168_v28  ;;  %v6069_v27 = vpack.c.bf16 %v2173_v39, %v2172_v14  ;;  %v2031_v58 = vld [vmem:[#allocation2 + $0x98] sm:$0xff] }
 0x21a   : > { %6054 = vmatprep.subr.bf16.mxu0 %v6053_v16  ;;  %1701 = vmatmul.mubr.f32.gmra.mrb[92].mxu1 %v7728_v49  ;;  %v2177_v49 = vld [vmem:[#allocation10 + $0x478] sm:$0xff] }
 0x21b   : > { %1705 = vmatprep.mubr.f32.mxu1 %v7731_v43 }
 0x21c   : > { %5465 = vmatmul.mubr.f32.gmra.mrb[74].mxu0 %v7772_v15 }
 0x21d   : > { %5467 = vmatprep.mubr.f32.mxu0 %v7775_v0  ;;  %6056 = vmatpush3.bf16.msra.mxu0 %v6053_v16  ;;  %v2174_v16 = vld [vmem:[#allocation10 + $0x460] sm:$0xff] }
 0x21e   : > { %6058 = vmatprep.subr.bf16.mxu0 %v6057_v25  ;;  %1706 = vmatmul.mubr.f32.gmra.mrb[94].mxu1 %v7736_v45 }
 0x21f   : > { %1710 = vmatprep.mubr.f32.mxu1 %v7739_v51  ;;  %v2066_v51 = vld [vmem:[#allocation2 + $0x91] sm:$0xff] }
 0x220   : > { %5468 = vmatmul.mubr.f32.gmra.mrb[76].mxu0 %v7780_v31 }
 0x221   : > { %5470 = vmatprep.mubr.f32.mxu0 %v7783_v52  ;;  %6060 = vmatpush3.bf16.msra.mxu0 %v6057_v25 }
 0x222   : > { %6062 = vmatprep.subr.bf16.mxu0 %v6061_v6  ;;  %1711 = vmatmul.mubr.f32.gmra.mrb[96].mxu1 %v7744_v4 }
 0x223   : > { %1715 = vmatprep.mubr.f32.mxu1 %v7747_v61 }
 0x224   : > { %5471 = vmatmul.mubr.f32.gmra.mrb[78].mxu0 %v7424_v46  ;;  %v6073_v46 = vpack.c.bf16 %v2175_v1, %v2174_v16 }
 0x225   : > { %5473 = vmatprep.mubr.f32.mxu0 %v7427_v48  ;;  %6064 = vmatpush3.bf16.msra.mxu0 %v6061_v6  ;;  %v2176_v48 = vld [vmem:[#allocation10 + $0x470] sm:$0xff] }
 0x226   : > { %6066 = vmatprep.subr.bf16.mxu0 %v6065_v11  ;;  %1716 = vmatmul.mubr.f32.gmra.mrb[98].mxu1 %v7752_v20  ;;  %v9547_v20 = vld [vmem:[#allocation42_spill] sm:$0xff] }
 0x227   : > { %1720 = vmatprep.mubr.f32.mxu1 %v7755_v7 }
 0x228   : > { %5474 = vmatmul.mubr.f32.gmra.mrb[80].mxu0 %v7432_v54  ;;  %v6077_v54 = vpack.c.bf16 %v2177_v49, %v2176_v48  ;;  %v2101_v48 = vld [vmem:[#allocation2 + $0x82] sm:$0xff] }
 0x229   : > { %5476 = vmatprep.mubr.f32.mxu0 %v7434_v56  ;;  %6068 = vmatpush3.bf16.msra.mxu0 %v6065_v11  ;;  %v7807_v56 = vld [vmem:[#allocation2 + $0x1b1] sm:$0xff] }
 0x22a   : > { %6070 = vmatprep.subr.bf16.mxu0 %v6069_v27  ;;  %1721 = vmatmul.mubr.f32.gmra.mrb[100].mxu1 %v7760_v2  ;;  %v2030_v2 = vld [vmem:[#allocation2 + $0x90] sm:$0xff] }
 0x22b   : > { %1725 = vmatprep.mubr.f32.mxu1 %v7762_v36  ;;  %v2099_v11 = vld [vmem:[#allocation2 + $0x6a] sm:$0xff] }
 0x22c   : > { %5477 = vmatmul.mubr.f32.gmra.mrb[82].mxu0 %v7440_v62  ;;  %v7812_v62 = vld [vmem:[#allocation2 + $0x1b0] sm:$0xff] }
 0x22d   : > { %5479 = vmatprep.mubr.f32.mxu0 %v7442_v3  ;;  %6072 = vmatpush3.bf16.msra.mxu0 %v6069_v27  ;;  %v7815_v3 = vld [vmem:[#allocation2 + $0x1b9] sm:$0xff]  ;;  %v2032_v27 = vld [vmem:[#allocation2 + $0xa8] sm:$0xff] }
 0x22e   : > { %6074 = vmatprep.subr.bf16.mxu0 %v6073_v46  ;;  %1726 = vmatmul.mubr.f32.gmra.mrb[102].mxu1 %v7766_v44 }
 0x22f   : > { %1730 = vmatprep.mubr.f32.mxu1 %v7807_v56 }
 0x230   : > { %5480 = vmatmul.mubr.f32.gmra.mrb[84].mxu0 %v7448_v8  ;;  %v7820_v8 = vld [vmem:[#allocation2 + $0x1b8] sm:$0xff] }
 0x231   : > { %5482 = vmatprep.mubr.f32.mxu0 %v7450_v12  ;;  %6076 = vmatpush3.bf16.msra.mxu0 %v6073_v46 }
 0x232   : > { %6078 = vmatprep.subr.bf16.mxu0 %v6077_v54  ;;  %1731 = vmatmul.mubr.f32.gmra.mrb[104].mxu1 %v7812_v62 }
 0x233   : > { %1735 = vmatprep.mubr.f32.mxu1 %v7815_v3 }
 0x234   : > { %5483 = vmatmul.mubr.f32.gmra.mrb[86].mxu0 %v7455_v18 }
 0x235   : > { %5485 = vmatprep.mubr.f32.mxu0 %v7457_v22  ;;  %6080 = vmatpush3.bf16.msra.mxu0 %v6077_v54  ;;  %v5377_v12 = vpop.f32.mrb[0].mxu1 }
 0x236   : > { %v1118_v18 = vpop.f32.mrb[1].mxu1  ;;  %1736 = vmatmul.mubr.f32.gmra.mrb[106].mxu1 %v7820_v8 }
 0x237   : > { %2242 = vmatprep.mubr.f32.mxu1 %v7486_v47 }
 0x238   : > { %5486 = vmatmul.mubr.f32.gmra.mrb[88].mxu0 %v7464_v29 }
 0x239   : > { %5488 = vmatprep.mubr.f32.mxu0 %v7466_v33  ;;  %v7827_v22 = vpop.f32.mrb[2].mxu1 }
 0x23a   : > { %v7830_v29 = vpop.f32.mrb[3].mxu1  ;;  %2243 = vmatmul.mubr.f32.vlgmr.msra.gmra.mrb[108].mxu1 %v7496_v59 }
 0x23b   : > { %2247 = vmatprep.mubr.f32.mxu1 %v7499_v60 }
 0x23c   : > { %5489 = vmatmul.mubr.f32.gmra.mrb[90].mxu0 %v7476_v38 }
 0x23d   : > { %5491 = vmatprep.mubr.f32.mxu0 %v7479_v42  ;;  %v7835_v33 = vpop.f32.mrb[4].mxu1 }
 0x23e   : > { %v7838_v38 = vpop.f32.mrb[5].mxu1  ;;  %2248 = vmatmul.mubr.f32.gmra.mrb[110].mxu1 %v7509_v9 }
 0x23f   : > { %2252 = vmatprep.mubr.f32.mxu1 %v7512_v10  ;;  %v9541_v10 = vld [vmem:[#allocation36_spill] sm:$0xff] }
 0x240   : > { %5492 = vmatmul.mubr.f32.gmra.mrb[92].mxu0 %v7489_v50 }
 0x241   : > { %5494 = vmatprep.mubr.f32.mxu0 %v7492_v55  ;;  %v7843_v42 = vpop.f32.mrb[6].mxu1 }
 0x242   : > { %v7846_v47 = vpop.f32.mrb[7].mxu1  ;;  %2253 = vmatmul.mubr.f32.gmra.mrb[112].mxu1 %v7522_v21  ;;  %v7873_v21 = vld [vmem:[#allocation2 + $0x1b2] sm:$0xff] }
 0x243   : > { %2257 = vmatprep.mubr.f32.mxu1 %v7525_v24  ;;  %v9543_v24 = vld [vmem:[#allocation38_spill] sm:$0xff] }
 0x244   : > { %5495 = vmatmul.mubr.f32.gmra.mrb[94].mxu0 %v7502_v63  ;;  %v9539_v63 = vld [vmem:[#allocation34_spill] sm:$0xff] }
 0x245   : > { %5497 = vmatprep.mubr.f32.mxu0 %v7505_v5  ;;  %v7851_v50 = vpop.f32.mrb[8].mxu1  ;;  %v9540_v5 = vld [vmem:[#allocation35_spill] sm:$0xff] }
 0x246   : > { %v7854_v55 = vpop.f32.mrb[9].mxu1  ;;  %2258 = vmatmul.mubr.f32.gmra.mrb[114].mxu1 %v7535_v34  ;;  %v7880_v34 = vld [vmem:[#allocation2 + $0x1ba] sm:$0xff] }
 0x247   : > { %2262 = vmatprep.mubr.f32.mxu1 %v7538_v35 }
 0x248   : > { %5498 = vmatmul.mubr.f32.gmra.mrb[96].mxu0 %v7515_v13 }
 0x249   : > { %5500 = vmatprep.mubr.f32.mxu0 %v7518_v17  ;;  %v7859_v59 = vpop.f32.mrb[10].mxu1  ;;  %v9542_v17 = vld [vmem:[#allocation37_spill] sm:$0xff] }
 0x24a   : > { %v7862_v60 = vpop.f32.mrb[11].mxu1  ;;  %2263 = vmatmul.mubr.f32.gmra.mrb[116].mxu1 %v7548_v41  ;;  %v9546_v41 = vld [vmem:[#allocation41_spill] sm:$0xff] }
 0x24b   : > { %2267 = vmatprep.mubr.f32.mxu1 %v9539_v63 }
 0x24c   : > { %5501 = vmatmul.mubr.f32.gmra.mrb[98].mxu0 %v7528_v26  ;;  %v9544_v26 = vld [vmem:[#allocation39_spill] sm:$0xff] }
 0x24d   : > { %5503 = vmatprep.mubr.f32.mxu0 %v7531_v30  ;;  %v7867_v9 = vpop.f32.mrb[12].mxu1 }
 0x24e   : > { %v7870_v13 = vpop.f32.mrb[13].mxu1  ;;  %2268 = vmatmul.mubr.f32.gmra.mrb[118].mxu1 %v9542_v17  ;;  %v2104_v17 = vld [vmem:[#allocation2 + $0xaa] sm:$0xff] }
 0x24f   : > { %2272 = vmatprep.mubr.f32.mxu1 %v9543_v24 }
 0x250   : > { %5504 = vmatmul.mubr.f32.gmra.mrb[100].mxu0 %v7541_v37  ;;  %v9545_v37 = vld [vmem:[#allocation40_spill] sm:$0xff] }
 0x251   : > { %5506 = vmatprep.mubr.f32.mxu0 %v7544_v40  ;;  %v7877_v30 = vpop.f32.mrb[14].mxu1 }
 0x252   : > { %v7882_v35 = vpop.f32.mrb[15].mxu1  ;;  %2273 = vmatmul.mubr.f32.gmra.mrb[120].mxu1 %v9545_v37 }
 0x253   : > { %2277 = vmatprep.mubr.f32.mxu1 %v9546_v41 }
 0x254   : > { %5507 = vmatmul.mubr.f32.gmra.mrb[102].mxu0 %v9540_v5  ;;  %v2103_v5 = vld [vmem:[#allocation2 + $0x9a] sm:$0xff] }
 0x255   : > { %5509 = vmatprep.mubr.f32.mxu0 %v9541_v10  ;;  %v7889_v4 = vpop.f32.mrb[16].mxu1 }
 0x256   : > { %v7892_v61 = vpop.f32.mrb[17].mxu1  ;;  %2278 = vmatmul.mubr.f32.gmra.mrb[122].mxu1 %v9547_v20  ;;  %v2106_v20 = vld [vmem:[#allocation2 + $0xc2] sm:$0xff] }
 0x257   : > { %2282 = vmatprep.mubr.f32.mxu1 %v2066_v51 }
 0x258   : > { %5510 = vmatmul.mubr.f32.gmra.mrb[104].mxu0 %v9544_v26  ;;  %v2034_v26 = vld [vmem:[#allocation2 + $0xc0] sm:$0xff] }
 0x259   : > { %5512 = vmatprep.mubr.f32.mxu0 %v7873_v21  ;;  %v7898_v25 = vpop.f32.mrb[18].mxu1 }
 0x25a   : > { %v7901_v28 = vpop.f32.mrb[19].mxu1  ;;  %2283 = vmatmul.mubr.f32.gmra.mrb[124].mxu1 %v2030_v2  ;;  %v2035_v2 = vld [vmem:[#allocation2 + $0xc8] sm:$0xff] }
 0x25b   : > { %v873_v40 = vpop.f32.mrb[0].mxu0  ;;  %2287 = vmatprep.mubr.f32.mxu1 %v2067_v19  ;;  %v2072_v19 = vld [vmem:[#allocation2 + $0xd9] sm:$0xff] }
 0x25c   : > { %v7886_v43 = vadd.f32 %v1118_v18, %v873_v40  ;;  %5513 = vmatmul.mubr.f32.gmra.mrb[106].mxu0 %v7880_v34  ;;  %v875_v45 = vpop.f32.mrb[1].mxu0  ;;  %v2071_v40 = vld [vmem:[#allocation2 + $0xc9] sm:$0xff] }
 0x25d   : > { %5547 = vmatprep.mubr.f32.mxu0 %v7769_v57  ;;  %v2105_v45 = vld [vmem:[#allocation2 + $0xb2] sm:$0xff] }
 0x25e   : > { %2288 = vmatmul.mubr.f32.gmra.mrb[126].mxu1 %v2031_v58  ;;  %v2107_v58 = vld [vmem:[#allocation2 + $0xca] sm:$0xff] }
 0x25f   : > { %v878_v7 = vpop.f32.mrb[2].mxu0  ;;  %2292 = vmatprep.mubr.f32.mxu1 %v2068_v53  ;;  %v2108_v53 = vld [vmem:[#allocation2 + $0xda] sm:$0xff] }
 0x260   : > { %v7895_v36 = vadd.f32 %v5377_v12, %v878_v7  ;;  %5548 = vmatmul.mubr.f32.vlgmr.msra.gmra.mrb[108].mxu0 %v7772_v15  ;;  %v880_v44 = vpop.f32.mrb[3].mxu0  ;;  %v7907_v15 = vpop.f32.mrb[20].mxu1  ;;  %v2033_v12 = vld [vmem:[#allocation2 + $0xb0] sm:$0xff] }
 0x261   : > { %5550 = vmatprep.mubr.f32.mxu0 %v7775_v0  ;;  %v7910_v14 = vpop.f32.mrb[21].mxu1  ;;  %v2100_v0 = vld [vmem:[#allocation2 + $0x7a] sm:$0xff] }
 0x262   : > { %v7915_v46 = vpop.f32.mrb[22].mxu1  ;;  %2293 = vmatmul.mubr.f32.gmra.mrb[128].mxu1 %v2032_v27  ;;  %v2073_v27 = vld [vmem:[#allocation2 + $0xe1] sm:$0xff] }
 0x263   : > { %v883_v57 = vpop.f32.mrb[4].mxu0  ;;  %v7917_v49 = vpop.f32.mrb[23].mxu1 }
 0x264   : > { %v7904_v6 = vadd.f32 %v7830_v29, %v883_v57  ;;  %5551 = vmatmul.mubr.f32.gmra.mrb[110].mxu0 %v7780_v31  ;;  %v885_v32 = vpop.f32.mrb[5].mxu0  ;;  %v2069_v31 = vld [vmem:[#allocation2 + $0xb1] sm:$0xff]  ;;  %v2070_v29 = vld [vmem:[#allocation2 + $0xc1] sm:$0xff] }
 0x265   : > { %5553 = vmatprep.mubr.f32.mxu0 %v7783_v52  ;;  %v2102_v52 = vld [vmem:[#allocation2 + $0x92] sm:$0xff]  ;;  %2297 = vmatprep.mubr.f32.mxu1 %v2069_v31  ;;  %v7922_v63 = vpop.f32.mrb[24].mxu1  ;;  %v2109_v31 = vld [vmem:[#allocation2 + $0xe2] sm:$0xff] }
 0x266   : > { %v7924_v10 = vpop.f32.mrb[25].mxu1  ;;  %2298 = vmatmul.mubr.f32.gmra.mrb[130].mxu1 %v2033_v12  ;;  %v2037_v12 = vld [vmem:[#allocation2 + $0xe0] sm:$0xff] }
 0x267   : > { %v888_v39 = vpop.f32.mrb[6].mxu0  ;;  %2302 = vmatprep.mubr.f32.mxu1 %v2070_v29  ;;  %v2074_v29 = vld [vmem:[#allocation2 + $0xf1] sm:$0xff] }
 0x268   : > { %v7913_v16 = vadd.f32 %v7827_v22, %v888_v39  ;;  %5554 = vmatmul.mubr.f32.gmra.mrb[112].mxu0 %v2099_v11  ;;  %v890_v1 = vpop.f32.mrb[7].mxu0 }
 0x269   : > { %5556 = vmatprep.mubr.f32.mxu0 %v2100_v0  ;;  %v7929_v41 = vpop.f32.mrb[26].mxu1  ;;  %v2036_v0 = vld [vmem:[#allocation2 + $0xd8] sm:$0xff] }
 0x26a   : > { %v7931_v51 = vpop.f32.mrb[27].mxu1  ;;  %2303 = vmatmul.mubr.f32.gmra.mrb[132].mxu1 %v2034_v26  ;;  %v2112_v26 = vld [vmem:[#allocation2 + $0x10a] sm:$0xff] }
 0x26b   : > { %v893_v54 = vpop.f32.mrb[8].mxu0  ;;  %2307 = vmatprep.mubr.f32.mxu1 %v2071_v40  ;;  %v2038_v40 = vld [vmem:[#allocation2 + $0xf0] sm:$0xff] }
 0x26c   : > { %v7920_v18 = vadd.f32 %v7838_v38, %v893_v54  ;;  %5557 = vmatmul.mubr.f32.gmra.mrb[114].mxu0 %v2101_v48  ;;  %v895_v22 = vpop.f32.mrb[9].mxu0 }
 0x26d   : > { %5559 = vmatprep.mubr.f32.mxu0 %v2102_v52  ;;  %v7936_v57 = vpop.f32.mrb[28].mxu1  ;;  %v2110_v52 = vld [vmem:[#allocation2 + $0xf2] sm:$0xff] }
 0x26e   : > { %v7938_v32 = vpop.f32.mrb[29].mxu1  ;;  %2308 = vmatmul.mubr.f32.gmra.mrb[134].mxu1 %v2035_v2  ;;  %v2113_v2 = vld [vmem:[#allocation2 + $0x112] sm:$0xff] }
 0x26f   : > { %v898_v24 = vpop.f32.mrb[10].mxu0  ;;  %2312 = vmatprep.mubr.f32.mxu1 %v2072_v19  ;;  %v2114_v19 = vld [vmem:[#allocation2 + $0x122] sm:$0xff] }
 0x270   : > { %v7927_v37 = vadd.f32 %v7835_v33, %v898_v24  ;;  %5560 = vmatmul.mubr.f32.gmra.mrb[116].mxu0 %v2103_v5  ;;  %v900_v38 = vpop.f32.mrb[11].mxu0 }
 0x271   : > { %5562 = vmatprep.mubr.f32.mxu0 %v2104_v17  ;;  %v7943_v1 = vpop.f32.mrb[30].mxu1  ;;  %v2111_v17 = vld [vmem:[#allocation2 + $0xfa] sm:$0xff] }
 0x272   : > { %v7945_v48 = vpop.f32.mrb[31].mxu1  ;;  %2313 = vmatmul.mubr.f32.gmra.mrb[136].mxu1 %v2036_v0 }
 0x273   : > { %v903_v7 = vpop.f32.mrb[12].mxu0  ;;  %2317 = vmatprep.mubr.f32.mxu1 %v2073_v27  ;;  %v2115_v27 = vld [vmem:[#allocation2 + $0x12a] sm:$0xff] }
 0x274   : > { %v7934_v44 = vadd.f32 %v7846_v47, %v903_v7  ;;  %5563 = vmatmul.mubr.f32.gmra.mrb[118].mxu0 %v2105_v45  ;;  %v905_v33 = vpop.f32.mrb[13].mxu0 }
 0x275   : > { %5565 = vmatprep.mubr.f32.mxu0 %v2106_v20  ;;  %v7950_v5 = vpop.f32.mrb[32].mxu1  ;;  %v2075_v20 = vld [vmem:[#allocation2 + $0xf9] sm:$0xff] }
 0x276   : > { %v7952_v24 = vpop.f32.mrb[33].mxu1  ;;  %2318 = vmatmul.mubr.f32.gmra.mrb[138].mxu1 %v2037_v12  ;;  %v2040_v12 = vld [vmem:[#allocation2 + $0x108] sm:$0xff] }
 0x277   : > { %v908_v11 = vpop.f32.mrb[14].mxu0  ;;  %2322 = vmatprep.mubr.f32.mxu1 %v2074_v29 }
 0x278   : > { %v7941_v39 = vadd.f32 %v7843_v42, %v908_v11  ;;  %5566 = vmatmul.mubr.f32.gmra.mrb[120].mxu0 %v2107_v58  ;;  %v910_v47 = vpop.f32.mrb[15].mxu0 }
 0x279   : > { %5568 = vmatprep.mubr.f32.mxu0 %v2108_v53  ;;  %v7957_v7 = vpop.f32.mrb[34].mxu1  ;;  %v2039_v53 = vld [vmem:[#allocation2 + $0xf8] sm:$0xff] }
 0x27a   : > { %v7959_v33 = vpop.f32.mrb[35].mxu1  ;;  %2323 = vmatmul.mubr.f32.gmra.mrb[140].mxu1 %v2038_v40  ;;  %v2118_v40 = vld [vmem:[#allocation2 + $0x152] sm:$0xff] }
 0x27b   : > { %v913_v54 = vpop.f32.mrb[16].mxu0  ;;  %2327 = vmatprep.mubr.f32.mxu1 %v2075_v20  ;;  %v2041_v20 = vld [vmem:[#allocation2 + $0x110] sm:$0xff] }
 0x27c   : > { %v7948_v22 = vadd.f32 %v7854_v55, %v913_v54  ;;  %5569 = vmatmul.mubr.f32.gmra.mrb[122].mxu0 %v2109_v31  ;;  %v915_v42 = vpop.f32.mrb[17].mxu0 }
 0x27d   : > { %5571 = vmatprep.mubr.f32.mxu0 %v2110_v52  ;;  %v7964_v47 = vpop.f32.mrb[36].mxu1  ;;  %v2116_v52 = vld [vmem:[#allocation2 + $0x13a] sm:$0xff] }
 0x27e   : > { %v1564_v31 = vpop.f32.mrb[37].mxu1  ;;  %2328 = vmatmul.mubr.f32.gmra.mrb[142].mxu1 %v2039_v53  ;;  %v2119_v53 = vld [vmem:[#allocation2 + $0x15a] sm:$0xff] }
 0x27f   : > { %v918_v38 = vpop.f32.mrb[18].mxu0  ;;  %v2042_v31 = vld [vmem:[#allocation2 + $0x120] sm:$0xff] }
 0x280   : > { %v7955_v45 = vadd.f32 %v7851_v50, %v918_v38  ;;  %5572 = vmatmul.mubr.f32.gmra.mrb[124].mxu0 %v2111_v17  ;;  %v920_v55 = vpop.f32.mrb[19].mxu0  ;;  %v2076_v50 = vld [vmem:[#allocation2 + $0x109] sm:$0xff]  ;;  %v2077_v17 = vld [vmem:[#allocation2 + $0x111] sm:$0xff] }
 0x281   : > { %5574 = vmatprep.mubr.f32.mxu0 %v2112_v26  ;;  %2332 = vmatprep.mubr.f32.mxu1 %v2076_v50  ;;  %v2117_v26 = vld [vmem:[#allocation2 + $0x142] sm:$0xff]  ;;  %v2120_v50 = vld [vmem:[#allocation2 + $0x16a] sm:$0xff] }
 0x282   : > { %2333 = vmatmul.mubr.f32.gmra.mrb[144].mxu1 %v2040_v12  ;;  %v2079_v12 = vld [vmem:[#allocation2 + $0x129] sm:$0xff] }
 0x283   : > { %v923_v58 = vpop.f32.mrb[20].mxu0  ;;  %2337 = vmatprep.mubr.f32.mxu1 %v2077_v17 }
 0x284   : > { %v7962_v11 = vadd.f32 %v7862_v60, %v923_v58  ;;  %v925_v0 = vpop.f32.mrb[21].mxu0  ;;  %5575 = vmatmul.mubr.f32.gmra.mrb[126].mxu0 %v2113_v2  ;;  %v7969_v60 = vpop.f32.mrb[38].mxu1  ;;  %v2078_v58 = vld [vmem:[#allocation2 + $0x121] sm:$0xff] }
 0x285   : > { %5577 = vmatprep.mubr.f32.mxu0 %v2114_v19  ;;  %v1569_v38 = vpop.f32.mrb[39].mxu1 }
 0x286   : > { %2338 = vmatmul.mubr.f32.gmra.mrb[146].mxu1 %v2041_v20 }
 0x287   : > { %v928_v54 = vpop.f32.mrb[22].mxu0  ;;  %2342 = vmatprep.mubr.f32.mxu1 %v2078_v58  ;;  %v2123_v58 = vld [vmem:[#allocation2 + $0x18a] sm:$0xff] }
 0x288   : > { %v7967_v42 = vadd.f32 %v7859_v59, %v928_v54  ;;  %v930_v29 = vpop.f32.mrb[23].mxu0  ;;  %5578 = vmatmul.mubr.f32.gmra.mrb[128].mxu0 %v2115_v27  ;;  %v7974_v59 = vpop.f32.mrb[40].mxu1 }
 0x289   : > { %5580 = vmatprep.mubr.f32.mxu0 %v2116_v52  ;;  %v1574_v0 = vpop.f32.mrb[41].mxu1  ;;  %v2121_v29 = vld [vmem:[#allocation2 + $0x172] sm:$0xff] }
 0x28a   : > { %2343 = vmatmul.mubr.f32.gmra.mrb[148].mxu1 %v2042_v31  ;;  %v2124_v0 = vld [vmem:[#allocation2 + $0x19a] sm:$0xff] }
 0x28b   : > { %v933_v55 = vpop.f32.mrb[24].mxu0  ;;  %2347 = vmatprep.mubr.f32.mxu1 %v2079_v12  ;;  %v2081_v12 = vld [vmem:[#allocation2 + $0x141] sm:$0xff] }
 0x28c   : > { %v7972_v2 = vadd.f32 %v7870_v13, %v933_v55  ;;  %v935_v19 = vpop.f32.mrb[25].mxu0  ;;  %5581 = vmatmul.mubr.f32.gmra.mrb[130].mxu0 %v2117_v26  ;;  %v7979_v13 = vpop.f32.mrb[42].mxu1  ;;  %v2122_v26 = vld [vmem:[#allocation2 + $0x182] sm:$0xff] }
 0x28d   : > { %5583 = vmatprep.mubr.f32.mxu0 %v2118_v40  ;;  %v1579_v17 = vpop.f32.mrb[43].mxu1  ;;  %v2043_v40 = vld [vmem:[#allocation2 + $0x128] sm:$0xff]  ;;  %v2080_v19 = vld [vmem:[#allocation2 + $0x139] sm:$0xff] }
 0x28e   : > { %2348 = vmatmul.mubr.f32.gmra.mrb[150].mxu1 %v2043_v40 }
 0x28f   : > { %v938_v27 = vpop.f32.mrb[26].mxu0  ;;  %2352 = vmatprep.mubr.f32.mxu1 %v2080_v19  ;;  %v2082_v19 = vld [vmem:[#allocation2 + $0x151] sm:$0xff] }
 0x290   : > { %v7977_v52 = vadd.f32 %v7867_v9, %v938_v27  ;;  %v940_v54 = vpop.f32.mrb[27].mxu0  ;;  %5584 = vmatmul.mubr.f32.gmra.mrb[132].mxu0 %v2119_v53  ;;  %v7984_v9 = vpop.f32.mrb[44].mxu1  ;;  %v2044_v27 = vld [vmem:[#allocation2 + $0x138] sm:$0xff] }
 0x291   : > { %5586 = vmatprep.mubr.f32.mxu0 %v2120_v50  ;;  %v1584_v53 = vpop.f32.mrb[45].mxu1 }
 0x292   : > { %2353 = vmatmul.mubr.f32.gmra.mrb[152].mxu1 %v2044_v27  ;;  %v2128_v53 = vld [vmem:[#allocation2 + $0x1ca] sm:$0xff] }
 0x293   : > { %v943_v38 = vpop.f32.mrb[28].mxu0  ;;  %2357 = vmatprep.mubr.f32.mxu1 %v2081_v12  ;;  %v2083_v12 = vld [vmem:[#allocation2 + $0x159] sm:$0xff] }
 0x294   : > { %v7982_v55 = vadd.f32 %v7882_v35, %v943_v38  ;;  %v945_v20 = vpop.f32.mrb[29].mxu0  ;;  %5587 = vmatmul.mubr.f32.gmra.mrb[134].mxu0 %v2121_v29  ;;  %v7989_v35 = vpop.f32.mrb[46].mxu1  ;;  %v2125_v29 = vld [vmem:[#allocation2 + $0x1a2] sm:$0xff] }
 0x295   : > { %5589 = vmatprep.mubr.f32.mxu0 %v2122_v26  ;;  %v1589_v17 = vpop.f32.mrb[47].mxu1  ;;  %v2045_v38 = vld [vmem:[#allocation2 + $0x140] sm:$0xff] }
 0x296   : > { %2358 = vmatmul.mubr.f32.gmra.mrb[154].mxu1 %v2045_v38 }
 0x297   : > { %v948_v50 = vpop.f32.mrb[30].mxu0  ;;  %2362 = vmatprep.mubr.f32.mxu1 %v2082_v19  ;;  %v2084_v19 = vld [vmem:[#allocation2 + $0x169] sm:$0xff] }
 0x298   : > { %v7987_v31 = vadd.f32 %v7877_v30, %v948_v50  ;;  %v950_v54 = vpop.f32.mrb[31].mxu0  ;;  %5590 = vmatmul.mubr.f32.gmra.mrb[136].mxu0 %v2123_v58  ;;  %v7994_v30 = vpop.f32.mrb[48].mxu1  ;;  %v2046_v50 = vld [vmem:[#allocation2 + $0x150] sm:$0xff] }
 0x299   : > { %5592 = vmatprep.mubr.f32.mxu0 %v2124_v0  ;;  %v1594_v58 = vpop.f32.mrb[49].mxu1 }
 0x29a   : > { %2363 = vmatmul.mubr.f32.gmra.mrb[156].mxu1 %v2046_v50 }
 0x29b   : > { %v953_v26 = vpop.f32.mrb[32].mxu0  ;;  %2367 = vmatprep.mubr.f32.mxu1 %v2083_v12 }
 0x29c   : > { %v7992_v40 = vadd.f32 %v7892_v61, %v953_v26  ;;  %v955_v20 = vpop.f32.mrb[33].mxu0  ;;  %5593 = vmatmul.mubr.f32.gmra.mrb[138].mxu0 %v2125_v29  ;;  %v8001_v61 = vpop.f32.mrb[50].mxu1  ;;  %v2129_v29 = vld [vmem:[#allocation2 + $0x1d2] sm:$0xff] }
 0x29d   : > { %5595 = vmatprep.mubr.f32.mxu0 %v7873_v21  ;;  %v1599_v17 = vpop.f32.mrb[51].mxu1  ;;  %v2047_v26 = vld [vmem:[#allocation2 + $0x158] sm:$0xff] }
 0x29e   : > { %2368 = vmatmul.mubr.f32.gmra.mrb[158].mxu1 %v2047_v26  ;;  %v2086_v26 = vld [vmem:[#allocation2 + $0x181] sm:$0xff] }
 0x29f   : > { %v958_v0 = vpop.f32.mrb[34].mxu0  ;;  %2372 = vmatprep.mubr.f32.mxu1 %v2084_v19 }
 0x2a0   : > { %v7998_v27 = vadd.f32 %v7889_v4, %v958_v0  ;;  %v960_v54 = vpop.f32.mrb[35].mxu0  ;;  %5596 = vmatmul.mubr.f32.gmra.mrb[140].mxu0 %v7880_v34  ;;  %v8006_v4 = vpop.f32.mrb[52].mxu1  ;;  %v2048_v0 = vld [vmem:[#allocation2 + $0x168] sm:$0xff] }
 0x2a1   : > { %5598 = vmatprep.mubr.f32.mxu0 %v2128_v53  ;;  %v1604_v58 = vpop.f32.mrb[53].mxu1  ;;  %v2085_v54 = vld [vmem:[#allocation2 + $0x171] sm:$0xff] }
 0x2a2   : > { %v8011_v12 = vpop.f32.mrb[54].mxu1  ;;  %2373 = vmatmul.mubr.f32.gmra.mrb[160].mxu1 %v2048_v0  ;;  %v2087_v0 = vld [vmem:[#allocation2 + $0x189] sm:$0xff] }
 0x2a3   : > { %v963_v21 = vpop.f32.mrb[36].mxu0  ;;  %v1609_v17 = vpop.f32.mrb[55].mxu1  ;;  %2377 = vmatprep.mubr.f32.mxu1 %v2085_v54 }
 0x2a4   : > { %v8004_v38 = vadd.f32 %v7901_v28, %v963_v21  ;;  %v965_v20 = vpop.f32.mrb[37].mxu0  ;;  %5599 = vmatmul.mubr.f32.gmra.mrb[142].mxu0 %v2129_v29  ;;  %v2049_v21 = vld [vmem:[#allocation2 + $0x170] sm:$0xff] }
 0x2a5   : > { %v8016_v58 = vpop.f32.mrb[56].mxu1 }
 0x2a6   : > { %v1614_v19 = vpop.f32.mrb[57].mxu1  ;;  %2378 = vmatmul.mubr.f32.gmra.mrb[162].mxu1 %v2049_v21  ;;  %v2088_v21 = vld [vmem:[#allocation2 + $0x199] sm:$0xff] }
 0x2a7   : > { %v968_v34 = vpop.f32.mrb[38].mxu0  ;;  %2382 = vmatprep.mubr.f32.mxu1 %v2086_v26 }
 0x2a8   : > { %v8009_v53 = vadd.f32 %v7898_v25, %v968_v34  ;;  %v970_v50 = vpop.f32.mrb[39].mxu0  ;;  %v2050_v34 = vld [vmem:[#allocation2 + $0x180] sm:$0xff] }
 0x2a9   : > { %v8021_v23 = vpop.f32.mrb[58].mxu1 }
 0x2aa   : > { %v1619_v54 = vpop.f32.mrb[59].mxu1  ;;  %2383 = vmatmul.mubr.f32.gmra.mrb[164].mxu1 %v2050_v34  ;;  %v2089_v34 = vld [vmem:[#allocation2 + $0x1a1] sm:$0xff] }
 0x2ab   : > { %v973_v28 = vpop.f32.mrb[40].mxu0  ;;  %2387 = vmatprep.mubr.f32.mxu1 %v2087_v0 }
 0x2ac   : > { %v8014_v29 = vadd.f32 %v7910_v14, %v973_v28  ;;  %v975_v20 = vpop.f32.mrb[41].mxu0  ;;  %v2051_v28 = vld [vmem:[#allocation2 + $0x188] sm:$0xff] }
 0x2ae   : > { %9548 = vst [vmem:[#allocation34_spill] sm:$0xff] %v8014_v29  ;;  %v8026_v29 = vpop.f32.mrb[60].mxu1  ;;  %2388 = vmatmul.mubr.f32.gmra.mrb[166].mxu1 %v2051_v28 }
 0x2af   : > { %v978_v25 = vpop.f32.mrb[42].mxu0  ;;  %v1624_v26 = vpop.f32.mrb[61].mxu1  ;;  %2392 = vmatprep.mubr.f32.mxu1 %v2088_v21 }
 0x2b0   : > { %v8019_v50 = vadd.f32 %v7907_v15, %v978_v25  ;;  %v980_v17 = vpop.f32.mrb[43].mxu0  ;;  %v2052_v25 = vld [vmem:[#allocation2 + $0x198] sm:$0xff] }
 0x2b2   : > { %9549 = vst [vmem:[#allocation35_spill] sm:$0xff] %v8019_v50  ;;  %v8031_v50 = vpop.f32.mrb[62].mxu1  ;;  %2393 = vmatmul.mubr.f32.gmra.mrb[168].mxu1 %v2052_v25 }
 0x2b3   : > { %v983_v14 = vpop.f32.mrb[44].mxu0  ;;  %v1629_v0 = vpop.f32.mrb[63].mxu1  ;;  %2397 = vmatprep.mubr.f32.mxu1 %v2089_v34 }
 0x2b4   : > { %v8024_v20 = vadd.f32 %v7917_v49, %v983_v14  ;;  %v985_v19 = vpop.f32.mrb[45].mxu0  ;;  %v2053_v14 = vld [vmem:[#allocation2 + $0x1a0] sm:$0xff] }
 0x2b5   : > { %v8036_v28 = vpop.f32.mrb[64].mxu1 }
 0x2b6   : > { %9550 = vst [vmem:[#allocation36_spill] sm:$0xff] %v8024_v20  ;;  %v1634_v21 = vpop.f32.mrb[65].mxu1  ;;  %2398 = vmatmul.mubr.f32.gmra.mrb[170].mxu1 %v2053_v14 }
 0x2b7   : > { %v988_v15 = vpop.f32.mrb[46].mxu0  ;;  %2402 = vmatprep.mubr.f32.mxu1 %v7807_v56  ;;  %v2093_v21 = vld [vmem:[#allocation2 + $0x1d1] sm:$0xff] }
 0x2b8   : > { %v8029_v17 = vadd.f32 %v7915_v46, %v988_v15  ;;  %v990_v54 = vpop.f32.mrb[47].mxu0 }
 0x2b9   : > { %v8042_v54 = vpop.f32.mrb[66].mxu1 }
 0x2ba   : > { %v1639_v25 = vpop.f32.mrb[67].mxu1  ;;  %2403 = vmatmul.mubr.f32.gmra.mrb[172].mxu1 %v7812_v62 }
 0x2bb   : > { %v993_v49 = vpop.f32.mrb[48].mxu0  ;;  %2407 = vmatprep.mubr.f32.mxu1 %v7815_v3  ;;  %v2057_v25 = vld [vmem:[#allocation2 + $0x1d0] sm:$0xff] }
 0x2bc   : > { %v8034_v19 = vadd.f32 %v7924_v10, %v993_v49  ;;  %v995_v26 = vpop.f32.mrb[49].mxu0  ;;  %v2092_v49 = vld [vmem:[#allocation2 + $0x1c9] sm:$0xff] }
 0x2bd   : > { %v8049_v14 = vpop.f32.mrb[68].mxu1 }
 0x2be   : > { %v1644_v56 = vpop.f32.mrb[69].mxu1  ;;  %2408 = vmatmul.mubr.f32.gmra.mrb[174].mxu1 %v7820_v8 }
 0x2bf   : > { %v998_v20 = vpop.f32.mrb[50].mxu0  ;;  %2412 = vmatprep.mubr.f32.mxu1 %v2092_v49 }
 0x2c0   : > { %v8040_v46 = vadd.f32 %v7922_v63, %v998_v20  ;;  %v1000_v15 = vpop.f32.mrb[51].mxu0  ;;  %v2056_v20 = vld [vmem:[#allocation2 + $0x1c8] sm:$0xff] }
 0x2c1   : > { %v8055_v15 = vpop.f32.mrb[70].mxu1 }
 0x2c2   : > { %v1649_v3 = vpop.f32.mrb[71].mxu1  ;;  %2413 = vmatmul.mubr.f32.gmra.mrb[176].mxu1 %v2056_v20 }
 0x2c3   : > { %v1003_v34 = vpop.f32.mrb[52].mxu0  ;;  %2417 = vmatprep.mubr.f32.mxu1 %v2093_v21 }
 0x2c4   : > { %v8047_v10 = vadd.f32 %v7931_v51, %v1003_v34  ;;  %v1005_v0 = vpop.f32.mrb[53].mxu0 }
 0x2c5   : > { %v8060_v8 = vpop.f32.mrb[72].mxu1 }
 0x2c6   : > { %9551 = vst [vmem:[#allocation37_spill] sm:$0xff] %v8047_v10  ;;  %v1654_v49 = vpop.f32.mrb[73].mxu1  ;;  %2418 = vmatmul.mubr.f32.gmra.mrb[178].mxu1 %v2057_v25 }
 0x2c7   : > { %v1008_v63 = vpop.f32.mrb[54].mxu0 }
 0x2c8   : > { %v8053_v26 = vadd.f32 %v7929_v41, %v1008_v63  ;;  %v1010_v62 = vpop.f32.mrb[55].mxu0 }
 0x2c9   : > { %v8065_v62 = vpop.f32.mrb[74].mxu1 }
 0x2ca   : > { %v1659_v3 = vpop.f32.mrb[75].mxu1 }
 0x2cb   : > { %v1013_v51 = vpop.f32.mrb[56].mxu0 }
 0x2cc   : > { %v8058_v34 = vadd.f32 %v7938_v32, %v1013_v51  ;;  %v1015_v0 = vpop.f32.mrb[57].mxu0 }
 0x2cd   : > { %v8070_v32 = vpop.f32.mrb[76].mxu1 }
 0x2ce   : > { %9552 = vst [vmem:[#allocation38_spill] sm:$0xff] %v8058_v34  ;;  %v1664_v51 = vpop.f32.mrb[77].mxu1 }
 0x2cf   : > { %v1018_v56 = vpop.f32.mrb[58].mxu0 }
 0x2d0   : > { %v8063_v41 = vadd.f32 %v7936_v57, %v1018_v56  ;;  %v1020_v63 = vpop.f32.mrb[59].mxu0 }
 0x2d1   : > { %v8075_v34 = vpop.f32.mrb[78].mxu1 }
 0x2d2   : > { %9553 = vst [vmem:[#allocation39_spill] sm:$0xff] %v8063_v41  ;;  %v1669_v57 = vpop.f32.mrb[79].mxu1 }
 0x2d3   : > { %v1023_v20 = vpop.f32.mrb[60].mxu0 }
 0x2d4   : > { %v8068_v21 = vadd.f32 %v7945_v48, %v1023_v20  ;;  %v1025_v10 = vpop.f32.mrb[61].mxu0 }
 0x2d5   : > { %v8080_v41 = vpop.f32.mrb[80].mxu1 }
 0x2d6   : > { %9554 = vst [vmem:[#allocation40_spill] sm:$0xff] %v8068_v21  ;;  %v1674_v48 = vpop.f32.mrb[81].mxu1 }
 0x2d7   : > { %v1028_v0 = vpop.f32.mrb[62].mxu0 }
 0x2d8   : > { %v8073_v49 = vadd.f32 %v7943_v1, %v1028_v0  ;;  %v1030_v25 = vpop.f32.mrb[63].mxu0 }
 0x2d9   : > { %v8085_v21 = vpop.f32.mrb[82].mxu1 }
 0x2da   : > { %9555 = vst [vmem:[#allocation41_spill] sm:$0xff] %v8073_v49  ;;  %v1679_v1 = vpop.f32.mrb[83].mxu1 }
 0x2db   : > { %v1033_v56 = vpop.f32.mrb[64].mxu0 }
 0x2dc   : > { %v8078_v63 = vadd.f32 %v7952_v24, %v1033_v56  ;;  %v1035_v3 = vpop.f32.mrb[65].mxu0 }
 0x2dd   : > { %v8090_v49 = vpop.f32.mrb[84].mxu1 }
 0x2de   : > { %9556 = vst [vmem:[#allocation42_spill] sm:$0xff] %v8078_v63  ;;  %v1684_v24 = vpop.f32.mrb[85].mxu1 }
 0x2df   : > { %v1038_v10 = vpop.f32.mrb[66].mxu0 }
 0x2e0   : > { %v8083_v20 = vadd.f32 %v7950_v5, %v1038_v10  ;;  %v1040_v51 = vpop.f32.mrb[67].mxu0  ;;  %v8100_v5 = vld [vmem:[%s9560_s22] ss:$0 sm:$0xff] }
 0x2e1   : > { %v8095_v63 = vpop.f32.mrb[86].mxu1 }
 0x2e2   : > { %9557 = vst [vmem:[#allocation43_spill] sm:$0xff] %v8083_v20  ;;  %v1689_v10 = vpop.f32.mrb[87].mxu1 }
 0x2e3   : > { %v1043_v0 = vpop.f32.mrb[68].mxu0 }
 0x2e4   : > { %v8088_v25 = vadd.f32 %v7959_v33, %v1043_v0  ;;  %v1045_v57 = vpop.f32.mrb[69].mxu0  ;;  %v1304_v33 = vadd.f32 %v8100_v5, %v7895_v36 }
 0x2e5   : > { %v8107_v57 = vpop.f32.mrb[88].mxu1 }
 0x2e6   : > { %9558 = vst [vmem:[#allocation44_spill] sm:$0xff] %v8088_v25 }
 0x2e7   : > { %v1048_v56 = vpop.f32.mrb[70].mxu0 }
 0x2e8   : > { %v8093_v3 = vadd.f32 %v7957_v7, %v1048_v56  ;;  %v1050_v48 = vpop.f32.mrb[71].mxu0  ;;  %v1303_v7 = vadd.f32 %v8100_v5, %v7886_v43 }
 0x2e9   : > { %v1694_v48 = vpop.f32.mrb[89].mxu1 }
 0x2ea   : > { %9559 = vst [vmem:[#allocation45_spill] sm:$0xff] %v8093_v3  ;;  %v1306_v3 = vadd.f32 %v8100_v5, %v7913_v16  ;;  %v8119_v43 = vpop.f32.mrb[90].mxu1 }
 0x2eb   : > { %v5463_v51 = vpop.f32.mrb[72].mxu0 }
 0x2ec   : > { %v1813_v1 = vadd.f32 %v5463_v51, %v7969_v60  ;;  %v1807_v0 = vpop.f32.mrb[73].mxu0  ;;  %v1305_v51 = vadd.f32 %v8100_v5, %v7904_v6 }
 0x2ed   : > { %v1808_v24 = vadd.f32 %v1807_v0, %v7964_v47 }
 0x2ee   : > { %v8110_v56 = vadd.f32 %v1813_v1, %v1304_v33  ;;  %v1699_v33 = vpop.f32.mrb[91].mxu1 }
 0x2ef   : > { %v8112_v25 = vadd.f32 %v1808_v24, %v1303_v7  ;;  %v5466_v10 = vpop.f32.mrb[74].mxu0  ;;  %v1308_v7 = vadd.f32 %v8100_v5, %v7927_v37  ;;  %v1307_v24 = vadd.f32 %v8100_v5, %v7920_v18  ;;  %v8131_v6 = vpop.f32.mrb[92].mxu1 }
 0x2f0   : > { %v1823_v36 = vadd.f32 %v5466_v10, %v7979_v13  ;;  %v1817_v60 = vpop.f32.mrb[75].mxu0 }
 0x2f1   : > { %v1818_v20 = vadd.f32 %v1817_v60, %v7974_v59  ;;  %v1309_v60 = vadd.f32 %v8100_v5, %v7934_v44 }
 0x2f2   : > { %v8122_v47 = vadd.f32 %v1823_v36, %v1306_v3  ;;  %v1704_v3 = vpop.f32.mrb[93].mxu1  ;;  %v1310_v36 = vadd.f32 %v8100_v5, %v7941_v39 }
 0x2f3   : > { %v8124_v1 = vadd.f32 %v1818_v20, %v1305_v51  ;;  %v5469_v0 = vpop.f32.mrb[76].mxu0  ;;  %v8143_v18 = vpop.f32.mrb[94].mxu1 }
 0x2f4   : > { %v1833_v16 = vadd.f32 %v5469_v0, %v7989_v35  ;;  %v1827_v13 = vpop.f32.mrb[77].mxu0  ;;  %v1709_v33 = vpop.f32.mrb[95].mxu1 }
 0x2f5   : > { %v1828_v48 = vadd.f32 %v1827_v13, %v7984_v9  ;;  %v1311_v13 = vadd.f32 %v8100_v5, %v7948_v22  ;;  %v8155_v44 = vpop.f32.mrb[96].mxu1 }
 0x2f6   : > { %v8134_v59 = vadd.f32 %v1833_v16, %v1308_v7  ;;  %v1312_v16 = vadd.f32 %v8100_v5, %v7955_v45 }
 0x2f7   : > { %v8136_v10 = vadd.f32 %v1828_v48, %v1307_v24  ;;  %v5472_v20 = vpop.f32.mrb[78].mxu0  ;;  %v1714_v48 = vpop.f32.mrb[97].mxu1 }
 0x2f8   : > { %v1843_v37 = vadd.f32 %v5472_v20, %v8001_v61  ;;  %v1837_v35 = vpop.f32.mrb[79].mxu0  ;;  %v1318_v48 = vadd.f32 %v8100_v5, %v7987_v31 }
 0x2f9   : > { %v1838_v51 = vadd.f32 %v1837_v35, %v7994_v30  ;;  %v8167_v22 = vpop.f32.mrb[98].mxu1 }
 0x2fa   : > { %v8146_v9 = vadd.f32 %v1843_v37, %v1310_v36  ;;  %v1314_v36 = vadd.f32 %v8100_v5, %v7967_v42  ;;  %v1313_v37 = vadd.f32 %v8100_v5, %v7962_v11 }
 0x2fb   : > { %v8148_v0 = vadd.f32 %v1838_v51, %v1309_v60  ;;  %v5475_v7 = vpop.f32.mrb[80].mxu0  ;;  %v1719_v60 = vpop.f32.mrb[99].mxu1 }
 0x2fc   : > { %v1853_v39 = vadd.f32 %v5475_v7, %v8011_v12  ;;  %v1847_v61 = vpop.f32.mrb[81].mxu0  ;;  %v1316_v7 = vadd.f32 %v8100_v5, %v7977_v52  ;;  %v1319_v60 = vadd.f32 %v8100_v5, %v7992_v40 }
 0x2fd   : > { %v1848_v24 = vadd.f32 %v1847_v61, %v8006_v4  ;;  %v8179_v11 = vpop.f32.mrb[100].mxu1 }
 0x2fe   : > { %v8158_v30 = vadd.f32 %v1853_v39, %v1312_v16  ;;  %v1315_v16 = vadd.f32 %v8100_v5, %v7972_v2  ;;  %v1724_v61 = vpop.f32.mrb[101].mxu1 }
 0x2ff   : > { %v8160_v3 = vadd.f32 %v1848_v24, %v1311_v13  ;;  %v5478_v20 = vpop.f32.mrb[82].mxu0 }
 0x300   : > { %v1863_v45 = vadd.f32 %v5478_v20, %v8021_v23  ;;  %v1857_v12 = vpop.f32.mrb[83].mxu0  ;;  %v1317_v20 = vadd.f32 %v8100_v5, %v7982_v55 }
 0x301   : > { %v1858_v35 = vadd.f32 %v1857_v12, %v8016_v58  ;;  %v8191_v2 = vpop.f32.mrb[102].mxu1 }
 0x302   : > { %v8170_v4 = vadd.f32 %v1863_v45, %v1314_v36  ;;  %v1729_v45 = vpop.f32.mrb[103].mxu1 }
 0x303   : > { %v8172_v51 = vadd.f32 %v1858_v35, %v1313_v37  ;;  %v5481_v33 = vpop.f32.mrb[84].mxu0  ;;  %v1320_v35 = vadd.f32 %v8100_v5, %v7998_v27 }
 0x304   : > { %v1873_v42 = vadd.f32 %v5481_v33, %v8031_v50  ;;  %v1867_v23 = vpop.f32.mrb[85].mxu0 }
 0x305   : > { %v1868_v39 = vadd.f32 %v1867_v23, %v8026_v29  ;;  %v8203_v55 = vpop.f32.mrb[104].mxu1 }
 0x306   : > { %v8182_v58 = vadd.f32 %v1873_v42, %v1316_v7  ;;  %v1734_v7 = vpop.f32.mrb[105].mxu1 }
 0x307   : > { %v8184_v13 = vadd.f32 %v1868_v39, %v1315_v16  ;;  %v5484_v24 = vpop.f32.mrb[86].mxu0  ;;  %v1322_v16 = vadd.f32 %v8100_v5, %v8009_v53  ;;  %v1321_v39 = vadd.f32 %v8100_v5, %v8004_v38  ;;  %v9563_v7 = vld [vmem:[#allocation36_spill] sm:$0xff] }
 0x308   : > { %v1883_v52 = vadd.f32 %v5484_v24, %v8042_v54  ;;  %v1877_v50 = vpop.f32.mrb[87].mxu0 }
 0x309   : > { %v1878_v36 = vadd.f32 %v1877_v50, %v8036_v28  ;;  %v8215_v40 = vpop.f32.mrb[106].mxu1  ;;  %v9561_v50 = vld [vmem:[#allocation35_spill] sm:$0xff] }
 0x30a   : > { %v8194_v29 = vadd.f32 %v1883_v52, %v1318_v48  ;;  %v1739_v24 = vpop.f32.mrb[107].mxu1 }
 0x30b   : > { %v8196_v12 = vadd.f32 %v1878_v36, %v1317_v20  ;;  %v5487_v37 = vpop.f32.mrb[88].mxu0  ;;  %v1324_v20 = vadd.f32 %v8100_v5, %v9561_v50  ;;  %v9562_v36 = vld [vmem:[#allocation34_spill] sm:$0xff]  ;;  %v1328_v24 = vadd.f32 %v8100_v5, %v8040_v46 }
 0x30c   : > { %v1893_v31 = vadd.f32 %v5487_v37, %v8055_v15  ;;  %v1887_v54 = vpop.f32.mrb[89].mxu0  ;;  %v1323_v45 = vadd.f32 %v8100_v5, %v9562_v36 }
 0x30d   : > { %v1888_v33 = vadd.f32 %v1887_v54, %v8049_v14  ;;  %v8228_v37 = vpop.f32.mrb[108].mxu1 }
 0x30e   : > { %v8206_v28 = vadd.f32 %v1893_v31, %v1320_v35  ;;  %v2246_v35 = vpop.f32.mrb[109].mxu1 }
 0x30f   : > { %v8208_v42 = vadd.f32 %v1888_v33, %v1319_v60  ;;  %v5490_v23 = vpop.f32.mrb[90].mxu0  ;;  %v1326_v60 = vadd.f32 %v8100_v5, %v8029_v17 }
 0x310   : > { %v1903_v27 = vadd.f32 %v5490_v23, %v8065_v62  ;;  %v1897_v15 = vpop.f32.mrb[91].mxu0  ;;  %v1325_v23 = vadd.f32 %v8100_v5, %v9563_v7  ;;  %v9565_v7 = vld [vmem:[#allocation39_spill] sm:$0xff] }
 0x311   : > { %v1898_v61 = vadd.f32 %v1897_v15, %v8060_v8 }
 0x312   : > { %v8218_v14 = vadd.f32 %v1903_v27, %v1322_v16 }
 0x313   : > { %v8220_v48 = vadd.f32 %v1898_v61, %v1321_v39  ;;  %v5493_v52 = vpop.f32.mrb[92].mxu0 }
 0x314   : > { %v1913_v53 = vadd.f32 %v5493_v52, %v8075_v34  ;;  %v1907_v62 = vpop.f32.mrb[93].mxu0  ;;  %v1327_v52 = vadd.f32 %v8100_v5, %v8034_v19 }
 0x315   : > { %v1908_v38 = vadd.f32 %v1907_v62, %v8070_v32  ;;  %v8240_v32 = vpop.f32.mrb[110].mxu1 }
 0x316   : > { %v8230_v8 = vadd.f32 %v1913_v53, %v1324_v20  ;;  %v2251_v15 = vpop.f32.mrb[111].mxu1 }
 0x317   : > { %v8232_v31 = vadd.f32 %v1908_v38, %v1323_v45  ;;  %v5496_v54 = vpop.f32.mrb[94].mxu0  ;;  %v1330_v45 = vadd.f32 %v8100_v5, %v8053_v26  ;;  %v9564_v38 = vld [vmem:[#allocation37_spill] sm:$0xff] }
 0x318   : > { %v1923_v33 = vadd.f32 %v5496_v54, %v8085_v21  ;;  %v1917_v34 = vpop.f32.mrb[95].mxu0  ;;  %v1329_v35 = vadd.f32 %v8100_v5, %v9564_v38 }
 0x319   : > { %v1918_v16 = vadd.f32 %v1917_v34, %v8080_v41  ;;  %v8252_v41 = vpop.f32.mrb[112].mxu1 }
 0x31a   : > { %v8242_v27 = vadd.f32 %v1923_v33, %v1326_v60  ;;  %v2256_v53 = vpop.f32.mrb[113].mxu1 }
 0x31b   : > { %v8244_v39 = vadd.f32 %v1918_v16, %v1325_v23  ;;  %v5499_v61 = vpop.f32.mrb[96].mxu0  ;;  %v1332_v23 = vadd.f32 %v8100_v5, %v9565_v7 }
 0x31c   : > { %v1933_v17 = vadd.f32 %v5499_v61, %v8095_v63  ;;  %v1927_v21 = vpop.f32.mrb[97].mxu0 }
 0x31d   : > { %v1928_v50 = vadd.f32 %v1927_v21, %v8090_v49  ;;  %v2259_v49 = vpop.f32.mrb[114].mxu1 }
 0x31e   : > { %v8254_v20 = vadd.f32 %v1933_v17, %v1328_v24  ;;  %v2261_v60 = vpop.f32.mrb[115].mxu1 }
 0x31f   : > { %v8256_v62 = vadd.f32 %v1928_v50, %v1327_v52  ;;  %v5502_v36 = vpop.f32.mrb[98].mxu0  ;;  %v2264_v24 = vpop.f32.mrb[116].mxu1  ;;  %v9567_v50 = vld [vmem:[#allocation41_spill] sm:$0xff] }
 0x320   : > { %v1943_v46 = vadd.f32 %v5502_v36, %v8119_v43  ;;  %v1937_v63 = vpop.f32.mrb[99].mxu0  ;;  %v9566_v43 = vld [vmem:[#allocation38_spill] sm:$0xff]  ;;  %v2266_v17 = vpop.f32.mrb[117].mxu1  ;;  %v1334_v53 = vadd.f32 %v8100_v5, %v9567_v50  ;;  %v9571_v50 = vld [vmem:[#allocation45_spill] sm:$0xff] }
 0x321   : > { %v1938_v19 = vadd.f32 %v1937_v63, %v8107_v57  ;;  %v1331_v15 = vadd.f32 %v8100_v5, %v9566_v43  ;;  %v2269_v38 = vpop.f32.mrb[118].mxu1 }
 0x322   : > { %v8264_v54 = vadd.f32 %v1943_v46, %v1330_v45 }
 0x323   : > { %v8266_v33 = vadd.f32 %v1938_v19, %v1329_v35  ;;  %v5505_v34 = vpop.f32.mrb[100].mxu0  ;;  %v2271_v35 = vpop.f32.mrb[119].mxu1 }
 0x324   : > { %v1953_v26 = vadd.f32 %v5505_v34, %v8143_v18  ;;  %v1947_v16 = vpop.f32.mrb[101].mxu0  ;;  %v9568_v18 = vld [vmem:[#allocation40_spill] sm:$0xff]  ;;  %v9569_v34 = vld [vmem:[#allocation43_spill] sm:$0xff] }
 0x325   : > { %v1948_v61 = vadd.f32 %v1947_v16, %v8131_v6  ;;  %v1333_v46 = vadd.f32 %v8100_v5, %v9568_v18  ;;  %v1336_v7 = vadd.f32 %v8100_v5, %v9569_v34 }
 0x326   : > { %v8274_v57 = vadd.f32 %v1953_v26, %v1332_v23 }
 0x327   : > { %v8276_v21 = vadd.f32 %v1948_v61, %v1331_v15  ;;  %v5508_v52 = vpop.f32.mrb[102].mxu0  ;;  %v2274_v15 = vpop.f32.mrb[120].mxu1 }
 0x328   : > { %v1963_v36 = vadd.f32 %v5508_v52, %v8167_v22  ;;  %v1957_v45 = vpop.f32.mrb[103].mxu0  ;;  %v9570_v22 = vld [vmem:[#allocation42_spill] sm:$0xff]  ;;  %v2276_v61 = vpop.f32.mrb[121].mxu1 }
 0x329   : > { %v1958_v63 = vadd.f32 %v1957_v45, %v8155_v44  ;;  %v1335_v16 = vadd.f32 %v8100_v5, %v9570_v22 }
 0x32a   : > { %v8284_v6 = vadd.f32 %v1963_v36, %v1334_v53  ;;  %v1338_v53 = vadd.f32 %v8100_v5, %v9571_v50 }
 0x32b   : > { %v8286_v19 = vadd.f32 %v1958_v63, %v1333_v46  ;;  %v5511_v60 = vpop.f32.mrb[104].mxu0  ;;  %v2279_v63 = vpop.f32.mrb[122].mxu1 }
 0x32c   : > { %v1973_v23 = vadd.f32 %v5511_v60, %v8191_v2  ;;  %v1967_v26 = vpop.f32.mrb[105].mxu0  ;;  %v9572_v2 = vld [vmem:[#allocation44_spill] sm:$0xff]  ;;  %v2281_v35 = vpop.f32.mrb[123].mxu1 }
 0x32d   : > { %v1968_v43 = vadd.f32 %v1967_v26, %v8179_v11  ;;  %v1337_v18 = vadd.f32 %v8100_v5, %v9572_v2  ;;  %v2284_v26 = vpop.f32.mrb[124].mxu1 }
 0x32e   : > { %v8294_v44 = vadd.f32 %v1973_v23, %v1336_v7 }
 0x32f   : > { %v8296_v17 = vadd.f32 %v1968_v43, %v1335_v16  ;;  %v5514_v52 = vpop.f32.mrb[106].mxu0  ;;  %v2286_v16 = vpop.f32.mrb[125].mxu1 }
 0x330   : > { %v1983_v36 = vadd.f32 %v5514_v52, %v8215_v40  ;;  %v1977_v45 = vpop.f32.mrb[107].mxu0 }
 0x331   : > { %v1978_v46 = vadd.f32 %v1977_v45, %v8203_v55 }
 0x332   : > { %v8304_v11 = vadd.f32 %v1983_v36, %v1338_v53  ;;  %v2289_v53 = vpop.f32.mrb[126].mxu1 }
 0x333   : > { %v8306_v60 = vadd.f32 %v1978_v46, %v1337_v18  ;;  %v5549_v34 = vpop.f32.mrb[108].mxu0  ;;  %v2291_v45 = vpop.f32.mrb[127].mxu1 }
 0x334   : > { %v2495_v7 = vadd.f32 %v5549_v34, %v8240_v32  ;;  %v2489_v23 = vpop.f32.mrb[109].mxu0 }
 0x335   : > { %v2490_v22 = vadd.f32 %v2489_v23, %v8228_v37  ;;  %v2294_v35 = vpop.f32.mrb[128].mxu1 }
 0x336   : > { %v2669_v40 = vadd.f32 %v2495_v7, %v8110_v56  ;;  %v2296_v7 = vpop.f32.mrb[129].mxu1 }
 0x337   : > { %v2668_v5 = vadd.f32 %v2490_v22, %v8112_v25  ;;  %v5552_v43 = vpop.f32.mrb[110].mxu0 }
 0x338   : > { %v2705_v55 = vmax.f32 %v2669_v40, 0.0  ;;  %v2505_v61 = vadd.f32 %v5552_v43, %v2259_v49  ;;  %v2499_v52 = vpop.f32.mrb[111].mxu0 }
 0x339   : > { %v2704_v50 = vmax.f32 %v2668_v5, 0.0  ;;  %v2500_v36 = vadd.f32 %v2499_v52, %v8252_v41 }
 0x33a   : > { %2777 = vst [vmem:[#allocation3 + $0x9] sm:$0xff] %v2705_v55  ;;  %v2671_v32 = vadd.f32 %v2505_v61, %v8122_v47 }
 0x33b   : > { %2776 = vst [vmem:[#allocation3 + $0x1] sm:$0xff] %v2704_v50  ;;  %v2670_v37 = vadd.f32 %v2500_v36, %v8124_v1  ;;  %v5555_v2 = vpop.f32.mrb[112].mxu0  ;;  %v2299_v1 = vpop.f32.mrb[130].mxu1 }
 0x33c   : > { %v2707_v56 = vmax.f32 %v2671_v32, 0.0  ;;  %v2515_v18 = vadd.f32 %v5555_v2, %v2269_v38  ;;  %v2509_v46 = vpop.f32.mrb[113].mxu0  ;;  %v2301_v43 = vpop.f32.mrb[131].mxu1 }
 0x33d   : > { %v2706_v25 = vmax.f32 %v2670_v37, 0.0  ;;  %v2510_v34 = vadd.f32 %v2509_v46, %v2264_v24 }
 0x33e   : > { %2779 = vst [vmem:[#allocation3 + $0x21] sm:$0xff] %v2707_v56  ;;  %v2673_v49 = vadd.f32 %v2515_v18, %v8134_v59 }
 0x33f   : > { %2778 = vst [vmem:[#allocation3 + $0x19] sm:$0xff] %v2706_v25  ;;  %v2672_v41 = vadd.f32 %v2510_v34, %v8136_v10  ;;  %v5558_v23 = vpop.f32.mrb[114].mxu0  ;;  %v2304_v10 = vpop.f32.mrb[132].mxu1 }
 0x340   : > { %v2709_v47 = vmax.f32 %v2673_v49, 0.0  ;;  %v2525_v22 = vadd.f32 %v5558_v23, %v2279_v63  ;;  %v2519_v40 = vpop.f32.mrb[115].mxu0  ;;  %v2306_v32 = vpop.f32.mrb[133].mxu1 }
 0x341   : > { %v2708_v16 = vmax.f32 %v2672_v41, 0.0  ;;  %v2520_v5 = vadd.f32 %v2519_v40, %v2274_v15 }
 0x342   : > { %2781 = vst [vmem:[#allocation3 + $0x39] sm:$0xff] %v2709_v47  ;;  %v2675_v38 = vadd.f32 %v2525_v22, %v8146_v9 }
 0x343   : > { %2780 = vst [vmem:[#allocation3 + $0x31] sm:$0xff] %v2708_v16  ;;  %v2674_v24 = vadd.f32 %v2520_v5, %v8148_v0  ;;  %v5561_v55 = vpop.f32.mrb[116].mxu0  ;;  %v2309_v0 = vpop.f32.mrb[134].mxu1 }
 0x344   : > { %v2711_v59 = vmax.f32 %v2675_v38, 0.0  ;;  %v2535_v61 = vadd.f32 %v5561_v55, %v2289_v53  ;;  %v2529_v52 = vpop.f32.mrb[117].mxu0  ;;  %v2311_v46 = vpop.f32.mrb[135].mxu1 }
 0x345   : > { %v2710_v50 = vmax.f32 %v2674_v24, 0.0  ;;  %v2530_v36 = vadd.f32 %v2529_v52, %v2284_v26 }
 0x346   : > { %2783 = vst [vmem:[#allocation3 + $0x51] sm:$0xff] %v2711_v59  ;;  %v2677_v63 = vadd.f32 %v2535_v61, %v8158_v30 }
 0x347   : > { %2782 = vst [vmem:[#allocation3 + $0x49] sm:$0xff] %v2710_v50  ;;  %v2676_v15 = vadd.f32 %v2530_v36, %v8160_v3  ;;  %v5564_v45 = vpop.f32.mrb[118].mxu0  ;;  %v2314_v3 = vpop.f32.mrb[136].mxu1 }
 0x348   : > { %v2713_v9 = vmax.f32 %v2677_v63, 0.0  ;;  %v2545_v37 = vadd.f32 %v5564_v45, %v2299_v1  ;;  %v2539_v2 = vpop.f32.mrb[119].mxu0  ;;  %v2316_v47 = vpop.f32.mrb[137].mxu1 }
 0x349   : > { %v2712_v56 = vmax.f32 %v2676_v15, 0.0  ;;  %v2540_v18 = vadd.f32 %v2539_v2, %v2294_v35  ;;  %v2319_v1 = vpop.f32.mrb[138].mxu1 }
 0x34a   : > { %2785 = vst [vmem:[#allocation3 + $0x69] sm:$0xff] %v2713_v9  ;;  %v2679_v53 = vadd.f32 %v2545_v37, %v8170_v4  ;;  %v2321_v38 = vpop.f32.mrb[139].mxu1 }
 0x34b   : > { %2784 = vst [vmem:[#allocation3 + $0x61] sm:$0xff] %v2712_v56  ;;  %v2678_v26 = vadd.f32 %v2540_v18, %v8172_v51  ;;  %v5567_v25 = vpop.f32.mrb[120].mxu0 }
 0x34c   : > { %v2715_v30 = vmax.f32 %v2679_v53, 0.0  ;;  %v2555_v34 = vadd.f32 %v5567_v25, %v2309_v0  ;;  %v2549_v49 = vpop.f32.mrb[121].mxu0 }
 0x34d   : > { %v2714_v7 = vmax.f32 %v2678_v26, 0.0  ;;  %v2550_v41 = vadd.f32 %v2549_v49, %v2304_v10  ;;  %v2324_v61 = vpop.f32.mrb[140].mxu1 }
 0x34e   : > { %2787 = vst [vmem:[#allocation3 + $0x81] sm:$0xff] %v2715_v30  ;;  %v2681_v23 = vadd.f32 %v2555_v34, %v8182_v58  ;;  %v2326_v50 = vpop.f32.mrb[141].mxu1 }
 0x34f   : > { %2786 = vst [vmem:[#allocation3 + $0x79] sm:$0xff] %v2714_v7  ;;  %v2680_v35 = vadd.f32 %v2550_v41, %v8184_v13  ;;  %v5570_v22 = vpop.f32.mrb[122].mxu0 }
 0x350   : > { %v2717_v4 = vmax.f32 %v2681_v23, 0.0  ;;  %v2559_v40 = vpop.f32.mrb[123].mxu0  ;;  %v2565_v5 = vadd.f32 %v5570_v22, %v2319_v1 }
 0x351   : > { %v2716_v16 = vmax.f32 %v2680_v35, 0.0  ;;  %v2560_v51 = vadd.f32 %v2559_v40, %v2314_v3  ;;  %v2329_v32 = vpop.f32.mrb[142].mxu1 }
 0x352   : > { %2789 = vst [vmem:[#allocation3 + $0x99] sm:$0xff] %v2717_v4  ;;  %v2683_v55 = vadd.f32 %v2565_v5, %v8194_v29  ;;  %v2331_v9 = vpop.f32.mrb[143].mxu1 }
 0x353   : > { %2788 = vst [vmem:[#allocation3 + $0x91] sm:$0xff] %v2716_v16  ;;  %v2682_v43 = vadd.f32 %v2560_v51, %v8196_v12  ;;  %v5573_v24 = vpop.f32.mrb[124].mxu0 }
 0x354   : > { %v2569_v58 = vpop.f32.mrb[125].mxu0  ;;  %v2719_v52 = vmax.f32 %v2683_v55, 0.0  ;;  %v2575_v45 = vadd.f32 %v5573_v24, %v2329_v32 }
 0x355   : > { %v2718_v59 = vmax.f32 %v2682_v43, 0.0  ;;  %v2570_v13 = vadd.f32 %v2569_v58, %v2324_v61  ;;  %v2334_v2 = vpop.f32.mrb[144].mxu1 }
 0x356   : > { %2791 = vst [vmem:[#allocation3 + $0xb1] sm:$0xff] %v2719_v52  ;;  %v2685_v29 = vadd.f32 %v2575_v45, %v8206_v28  ;;  %v2336_v18 = vpop.f32.mrb[145].mxu1 }
 0x357   : > { %2790 = vst [vmem:[#allocation3 + $0xa9] sm:$0xff] %v2718_v59  ;;  %v5576_v10 = vpop.f32.mrb[126].mxu0  ;;  %v2684_v36 = vadd.f32 %v2570_v13, %v8208_v42 }
 0x358   : > { %v2579_v63 = vpop.f32.mrb[127].mxu0  ;;  %v2721_v56 = vmax.f32 %v2685_v29, 0.0 }
 0x359   : > { %v2720_v15 = vmax.f32 %v2684_v36, 0.0  ;;  %v2580_v0 = vadd.f32 %v2579_v63, %v2334_v2  ;;  %v2339_v42 = vpop.f32.mrb[146].mxu1 }
 0x35a   : > { %2793 = vst [vmem:[#allocation3 + $0xc9] sm:$0xff] %v2721_v56  ;;  %v2585_v30 = vadd.f32 %v5576_v10, %v2339_v42  ;;  %v2341_v34 = vpop.f32.mrb[147].mxu1 }
 0x35b   : > { %v5579_v12 = vpop.f32.mrb[128].mxu0  ;;  %2792 = vst [vmem:[#allocation3 + $0xc1] sm:$0xff] %v2720_v15  ;;  %v2686_v46 = vadd.f32 %v2580_v0, %v8220_v48 }
 0x35c   : > { %v2589_v37 = vpop.f32.mrb[129].mxu0  ;;  %v2687_v7 = vadd.f32 %v2585_v30, %v8218_v14 }
 0x35d   : > { %v2722_v25 = vmax.f32 %v2686_v46, 0.0  ;;  %v2344_v28 = vpop.f32.mrb[148].mxu1 }
 0x35e   : > { %v2723_v41 = vmax.f32 %v2687_v7, 0.0  ;;  %v2590_v23 = vadd.f32 %v2589_v37, %v2344_v28  ;;  %v2346_v47 = vpop.f32.mrb[149].mxu1 }
 0x35f   : > { %v5582_v53 = vpop.f32.mrb[130].mxu0  ;;  %2794 = vst [vmem:[#allocation3 + $0xd9] sm:$0xff] %v2722_v25 }
 0x360   : > { %v2599_v26 = vpop.f32.mrb[131].mxu0  ;;  %2795 = vst [vmem:[#allocation3 + $0xe1] sm:$0xff] %v2723_v41  ;;  %v2688_v22 = vadd.f32 %v2590_v23, %v8232_v31 }
 0x361   : > { %v2349_v48 = vpop.f32.mrb[150].mxu1 }
 0x362   : > { %v2724_v40 = vmax.f32 %v2688_v22, 0.0  ;;  %v2595_v16 = vadd.f32 %v5579_v12, %v2349_v48  ;;  %v2351_v1 = vpop.f32.mrb[151].mxu1 }
 0x363   : > { %v5585_v49 = vpop.f32.mrb[132].mxu0 }
 0x364   : > { %v2609_v3 = vpop.f32.mrb[133].mxu0  ;;  %2796 = vst [vmem:[#allocation3 + $0xf1] sm:$0xff] %v2724_v40  ;;  %v2689_v5 = vadd.f32 %v2595_v16, %v8230_v8 }
 0x365   : > { %v2354_v14 = vpop.f32.mrb[152].mxu1 }
 0x366   : > { %v2725_v43 = vmax.f32 %v2689_v5, 0.0  ;;  %v2600_v24 = vadd.f32 %v2599_v26, %v2354_v14  ;;  %v2356_v55 = vpop.f32.mrb[153].mxu1 }
 0x367   : > { %v5588_v35 = vpop.f32.mrb[134].mxu0 }
 0x368   : > { %v2619_v4 = vpop.f32.mrb[135].mxu0  ;;  %2797 = vst [vmem:[#allocation3 + $0xf9] sm:$0xff] %v2725_v43  ;;  %v2690_v59 = vadd.f32 %v2600_v24, %v8244_v39 }
 0x369   : > { %v2359_v31 = vpop.f32.mrb[154].mxu1 }
 0x36a   : > { %v2726_v52 = vmax.f32 %v2690_v59, 0.0  ;;  %v2605_v13 = vadd.f32 %v5582_v53, %v2359_v31  ;;  %v2361_v50 = vpop.f32.mrb[155].mxu1 }
 0x36b   : > { %v5591_v51 = vpop.f32.mrb[136].mxu0 }
 0x36c   : > { %v2629_v38 = vpop.f32.mrb[137].mxu0  ;;  %2798 = vst [vmem:[#allocation3 + $0x109] sm:$0xff] %v2726_v52  ;;  %v2691_v36 = vadd.f32 %v2605_v13, %v8242_v27 }
 0x36d   : > { %v2364_v8 = vpop.f32.mrb[156].mxu1 }
 0x36e   : > { %v2727_v32 = vmax.f32 %v2691_v36, 0.0  ;;  %v2610_v15 = vadd.f32 %v2609_v3, %v2364_v8  ;;  %v2366_v45 = vpop.f32.mrb[157].mxu1 }
 0x36f   : > { %v5594_v58 = vpop.f32.mrb[138].mxu0 }
 0x370   : > { %v2639_v61 = vpop.f32.mrb[139].mxu0  ;;  %2799 = vst [vmem:[#allocation3 + $0x111] sm:$0xff] %v2727_v32  ;;  %v2692_v12 = vadd.f32 %v2610_v15, %v8256_v62 }
 0x371   : > { %v2369_v29 = vpop.f32.mrb[158].mxu1 }
 0x372   : > { %v2728_v37 = vmax.f32 %v2692_v12, 0.0  ;;  %v2615_v2 = vadd.f32 %v5585_v49, %v2369_v29  ;;  %v2371_v56 = vpop.f32.mrb[159].mxu1 }
 0x373   : > { %v5597_v10 = vpop.f32.mrb[140].mxu0 }
 0x374   : > { %v2649_v63 = vpop.f32.mrb[141].mxu0  ;;  %2800 = vst [vmem:[#allocation3 + $0x121] sm:$0xff] %v2728_v37  ;;  %v2693_v0 = vadd.f32 %v2615_v2, %v8254_v20 }
 0x375   : > { %v2374_v18 = vpop.f32.mrb[160].mxu1 }
 0x376   : > { %v2729_v27 = vmax.f32 %v2693_v0, 0.0  ;;  %v2620_v53 = vadd.f32 %v2619_v4, %v2374_v18  ;;  %v2376_v46 = vpop.f32.mrb[161].mxu1 }
 0x377   : > { %v8335_v9 = vpop.f32.mrb[142].mxu0 }
 0x378   : > { %v2659_v39 = vpop.f32.mrb[143].mxu0  ;;  %2801 = vst [vmem:[#allocation3 + $0x129] sm:$0xff] %v2729_v27  ;;  %v2694_v26 = vadd.f32 %v2620_v53, %v8266_v33 }
 0x379   : > { %v2379_v42 = vpop.f32.mrb[162].mxu1 }
 0x37a   : > { %v2730_v25 = vmax.f32 %v2694_v26, 0.0  ;;  %v2625_v30 = vadd.f32 %v5588_v35, %v2379_v42  ;;  %v2381_v34 = vpop.f32.mrb[163].mxu1 }
 0x37c   : > { %2802 = vst [vmem:[#allocation3 + $0x139] sm:$0xff] %v2730_v25  ;;  %v2695_v62 = vadd.f32 %v2625_v30, %v8264_v54 }
 0x37d   : > { %v2384_v7 = vpop.f32.mrb[164].mxu1 }
 0x37e   : > { %v2731_v49 = vmax.f32 %v2695_v62, 0.0  ;;  %v2630_v3 = vadd.f32 %v2629_v38, %v2384_v7  ;;  %v2386_v28 = vpop.f32.mrb[165].mxu1 }
 0x380   : > { %2803 = vst [vmem:[#allocation3 + $0x141] sm:$0xff] %v2731_v49  ;;  %v2696_v20 = vadd.f32 %v2630_v3, %v8276_v21 }
 0x381   : > { %v2389_v41 = vpop.f32.mrb[166].mxu1 }
 0x382   : > { %v2732_v23 = vmax.f32 %v2696_v20, 0.0  ;;  %v2635_v47 = vadd.f32 %v5591_v51, %v2389_v41  ;;  %v2391_v22 = vpop.f32.mrb[167].mxu1 }
 0x384   : > { %2804 = vst [vmem:[#allocation3 + $0x151] sm:$0xff] %v2732_v23  ;;  %v2697_v33 = vadd.f32 %v2635_v47, %v8274_v57 }
 0x385   : > { %v2394_v4 = vpop.f32.mrb[168].mxu1 }
 0x386   : > { %v2733_v35 = vmax.f32 %v2697_v33, 0.0  ;;  %v2640_v48 = vadd.f32 %v2639_v61, %v2394_v4  ;;  %v2396_v40 = vpop.f32.mrb[169].mxu1 }
 0x388   : > { %2805 = vst [vmem:[#allocation3 + $0x159] sm:$0xff] %v2733_v35  ;;  %v2698_v54 = vadd.f32 %v2640_v48, %v8286_v19 }
 0x389   : > { %v2399_v16 = vpop.f32.mrb[170].mxu1 }
 0x38a   : > { %v2734_v1 = vmax.f32 %v2698_v54, 0.0  ;;  %v2645_v5 = vadd.f32 %v5594_v58, %v2399_v16  ;;  %v2401_v38 = vpop.f32.mrb[171].mxu1 }
 0x38c   : > { %2806 = vst [vmem:[#allocation3 + $0x169] sm:$0xff] %v2734_v1  ;;  %v2699_v21 = vadd.f32 %v2645_v5, %v8284_v6 }
 0x38d   : > { %v2404_v14 = vpop.f32.mrb[172].mxu1 }
 0x38e   : > { %v2735_v51 = vmax.f32 %v2699_v21, 0.0  ;;  %v2650_v43 = vadd.f32 %v2649_v63, %v2404_v14  ;;  %v2406_v24 = vpop.f32.mrb[173].mxu1 }
 0x390   : > { %2807 = vst [vmem:[#allocation3 + $0x171] sm:$0xff] %v2735_v51  ;;  %v2700_v57 = vadd.f32 %v2650_v43, %v8296_v17 }
 0x391   : > { %v2409_v55 = vpop.f32.mrb[174].mxu1 }
 0x392   : > { %v2736_v59 = vmax.f32 %v2700_v57, 0.0  ;;  %v2655_v61 = vadd.f32 %v5597_v10, %v2409_v55  ;;  %v2411_v31 = vpop.f32.mrb[175].mxu1 }
 0x394   : > { %2808 = vst [vmem:[#allocation3 + $0x181] sm:$0xff] %v2736_v59  ;;  %v2701_v19 = vadd.f32 %v2655_v61, %v8294_v44  ;;  %v6805_v44 = vmov (!%p5020_p10), 0.0  }
 0x395   : > { %v2414_v52 = vpop.f32.mrb[176].mxu1  ;;  %2815 = vst [vmem:[#allocation3] sm:$0xff] (!%p5020_p10), %v6805_v44  ;;  %2816 = vst [vmem:[#allocation3 + $0x8] sm:$0xff] (!%p5020_p10), %v6805_v44 }
 0x396   : > { %v2737_v58 = vmax.f32 %v2701_v19, 0.0  ;;  %v2660_v13 = vadd.f32 %v2659_v39, %v2414_v52  ;;  %v2416_v50 = vpop.f32.mrb[177].mxu1  ;;  %2817 = vst [vmem:[#allocation3 + $0x10] sm:$0x3] (!%p5020_p10), %v6805_v44 }
 0x398   : > { %2809 = vst [vmem:[#allocation3 + $0x189] sm:$0xff] %v2737_v58  ;;  %v2702_v6 = vadd.f32 %v2660_v13, %v8306_v60 }
 0x399   : > { %v2419_v36 = vpop.f32.mrb[178].mxu1 }
 0x39a   : > { %v2738_v63 = vmax.f32 %v2702_v6, 0.0  ;;  %v2665_v8 = vadd.f32 %v8335_v9, %v2419_v36  ;;  %v2421_v32 = vpop.f32.mrb[179].mxu1  ;;  %2814 = sbr.rel (%p5020_p10) target bundleno = 929 (0x3a1), region = 80 }
 0x39c   : > { %2810 = vst [vmem:[#allocation3 + $0x199] sm:$0xff] %v2738_v63  ;;  %v2703_v17 = vadd.f32 %v2665_v8, %v8304_v11 }
 0x39e   : > { %v2739_v10 = vmax.f32 %v2703_v17, 0.0 }
 0x3a0   : > { %2811 = vst [vmem:[#allocation3 + $0x1a1] sm:$0xff] %v2739_v10 }
 0x3a1 PF: > { %2820 = sbr.rel (%p5021_p8) target bundleno = 936 (0x3a8), region = 84  ;;  %v6806_v60 = vmov (!%p5021_p8), 0.0  }
 0x3a2   : > { %2822 = vst [vmem:[#allocation3 + $0x198] sm:$0xff] (!%p5021_p8), %v6806_v60  ;;  %2823 = vst [vmem:[#allocation3 + $0x1a0] sm:$0xff] (!%p5021_p8), %v6806_v60 }
 0x3a3   : > { %2824 = vst [vmem:[#allocation3 + $0x1a8] sm:$0x3] (!%p5021_p8), %v6806_v60 }
 0x3a8 PF: > { %v9575_v15 = vmov 0.0|0.0   ;;  %v2922_v11 = vld [vmem:[#allocation12] sm:$0xff]  ;;  %v2923_v45 = vld [vmem:[#allocation12 + $0x8] sm:$0xff]  ;;  %v2924_v9 = vld [vmem:[#allocation12 + $0x10] sm:$0xff]  ;;  %s9590_s1 = sld [smem:[#allocation51_spill]]  ;;  %s9595_s5 = sld [smem:[#allocation22_spill]] }
 0x3a9   : > { %6081 = vmatprep.subr.bf16.mxu0 %v9575_v15  ;;  %v6082_v12 = vpack.c.bf16 %v2923_v45, %v2922_v11  ;;  %v2925_v39 = vld [vmem:[#allocation12 + $0x18] sm:$0xff]  ;;  %v2926_v37 = vld [vmem:[#allocation12 + $0x20] sm:$0xff]  ;;  %v2927_v2 = vld [vmem:[#allocation12 + $0x28] sm:$0xff]  ;;  %s9596_s13 = sld [smem:[#allocation23_spill]]  ;;  %s9598_s12 = sld [smem:[#allocation28_spill]] }
 0x3aa   : > { %v6085_v29 = vpack.c.bf16 %v2925_v39, %v2924_v9  ;;  %v2954_v56 = vld [vmem:[#allocation12 + $0x100] sm:$0xff]  ;;  %v2955_v0 = vld [vmem:[#allocation12 + $0x108] sm:$0xff]  ;;  %v2956_v27 = vld [vmem:[#allocation12 + $0x110] sm:$0xff]  ;;  %v6088_v53 = vpack.c.bf16 %v2927_v2, %v2926_v37  ;;  %s4825_s21 = sshll.u32 %s7363_s15, 4  ;;  %s9599_s28 = sld [smem:[#allocation52_spill]]  ;;  %s9324_s21 = int_to_ptr.vmem [resolvable:$true] %s4825_s21 }
 0x3ab   : > { %6083 = vmatpush1.bf16.msra.mxu0 %v6082_v12  ;;  %v6129_v18 = vpack.c.bf16 %v2955_v0, %v2954_v56  ;;  %v2928_v46 = vld [vmem:[#allocation12 + $0x30] sm:$0xff]  ;;  %v2957_v26 = vld [vmem:[#allocation12 + $0x118] sm:$0xff]  ;;  %v2958_v30 = vld [vmem:[#allocation12 + $0x120] sm:$0xff]  ;;  %s9329_s23 = scalar_lea.sflag [#allocation6], %s396_s11  ;;  %s6634_s18 = scalar_lea.vmem %s9324_s21, 4096 }
 0x3ac   : > { %6084 = vmatprep.subr.bf16.mxu0 %v9575_v15  ;;  %v2929_v42 = vld [vmem:[#allocation12 + $0x38] sm:$0xff]  ;;  %v6133_v25 = vpack.c.bf16 %v2957_v26, %v2956_v27  ;;  %v2959_v34 = vld [vmem:[#allocation12 + $0x128] sm:$0xff]  ;;  %v2960_v49 = vld [vmem:[#allocation12 + $0x130] sm:$0xff]  ;;  %p6635_p0 = scmp.ne.s32.totalorder %s9324_s21, %s6634_s18 }
 0x3ad   : > { %6130 = vmatprep.subr.bf16.mxu1 %v6129_v18  ;;  %v6137_v62 = vpack.c.bf16 %v2959_v34, %v2958_v30  ;;  %v6091_v7 = vpack.c.bf16 %v2929_v42, %v2928_v46  ;;  %v2961_v3 = vld [vmem:[#allocation12 + $0x138] sm:$0xff]  ;;  %v2930_v28 = vld [vmem:[#allocation12 + $0x40] sm:$0xff]  ;;  %v2931_v20 = vld [vmem:[#allocation12 + $0x48] sm:$0xff] }
 0x3ae   : > { %6132 = vmatpush3.bf16.msra.mxu1 %v6129_v18  ;;  %v6141_v41 = vpack.c.bf16 %v2961_v3, %v2960_v49  ;;  %v6094_v23 = vpack.c.bf16 %v2931_v20, %v2930_v28  ;;  %v2932_v47 = vld [vmem:[#allocation12 + $0x50] sm:$0xff]  ;;  %v2962_v22 = vld [vmem:[#allocation12 + $0x140] sm:$0xff]  ;;  %v2963_v33 = vld [vmem:[#allocation12 + $0x148] sm:$0xff]  ;;  %s5042_s16 = sshll.u32 %s9595_s5, 5 }
 0x3af   : > { %6086 = vmatpush1.bf16.msra.mxu0 %v6085_v29  ;;  %6134 = vmatprep.subr.bf16.mxu1 %v6133_v25  ;;  %v2933_v4 = vld [vmem:[#allocation12 + $0x58] sm:$0xff]  ;;  %v6145_v40 = vpack.c.bf16 %v2963_v33, %v2962_v22  ;;  %v2964_v16 = vld [vmem:[#allocation12 + $0x150] sm:$0xff]  ;;  %v2934_v5 = vld [vmem:[#allocation12 + $0x60] sm:$0xff]  ;;  %s5029_s2 = sshll.u32 %s9596_s13, 6  ;;  %p9601_p12 = scmp.ne.s32.totalorder %s9598_s12, 0 }
 0x3b0   : > { %6087 = vmatprep.subr.bf16.mxu0 %v9575_v15  ;;  %v2890_v35 = vld [vmem:[#allocation3 + $0x2] sm:$0xff]  ;;  %v6097_v54 = vpack.c.bf16 %v2933_v4, %v2932_v47  ;;  %v2935_v38 = vld [vmem:[#allocation12 + $0x68] sm:$0xff]  ;;  %v2966_v51 = vld [vmem:[#allocation12 + $0x160] sm:$0xff]  ;;  %s4822_s6 = sadd.s32 %s5042_s16, %s5029_s2  ;;  %s9600_s22 = smov %s9599_s28 }
 0x3b1   : > { %v2858_v48 = vld [vmem:[#allocation3 + $0x1] sm:$0xff]  ;;  %5633 = vmatprep.mubr.f32.mxu1 %v2890_v35  ;;  %v6100_v14 = vpack.c.bf16 %v2935_v38, %v2934_v5  ;;  %v2967_v43 = vld [vmem:[#allocation12 + $0x168] sm:$0xff]  ;;  %v2938_v19 = vld [vmem:[#allocation12 + $0x80] sm:$0xff]  ;;  %s5030_s4 = sshll.u32 %s4822_s6, 7  ;;  %p6636_p1 = pnand %p6635_p0, %p9601_p12 }
 0x3b2   : > { %6136 = vmatpush3.bf16.msra.mxu1 %v6133_v25  ;;  %3034 = vmatprep.mubr.f32.mxu0 %v2858_v48  ;;  %v2965_v1 = vld [vmem:[#allocation12 + $0x158] sm:$0xff]  ;;  %v2936_v24 = vld [vmem:[#allocation12 + $0x70] sm:$0xff]  ;;  %v6153_v55 = vpack.c.bf16 %v2967_v43, %v2966_v51  ;;  %v2939_v52 = vld [vmem:[#allocation12 + $0x88] sm:$0xff]  ;;  %s9322_s7 = scalar_lea.hbm %s9599_s28, %s5030_s4 }
 0x3b3   : > { %6089 = vmatpush1.bf16.msra.mxu0 %v6088_v53  ;;  %6138 = vmatprep.subr.bf16.mxu1 %v6137_v62  ;;  %v6149_v21 = vpack.c.bf16 %v2965_v1, %v2964_v16  ;;  %v2937_v57 = vld [vmem:[#allocation12 + $0x78] sm:$0xff]  ;;  %v2968_v61 = vld [vmem:[#allocation12 + $0x170] sm:$0xff]  ;;  %v6106_v13 = vpack.c.bf16 %v2939_v52, %v2938_v19  ;;  %v3555_v36 = vld [vmem:[#allocation12 + $0x180] sm:$0xff]  ;;  %p6637_p13 = pneg %p6636_p1 }
 0x3b4   : > { %6090 = vmatprep.subr.bf16.mxu0 %v9575_v15  ;;  %v6103_v59 = vpack.c.bf16 %v2937_v57, %v2936_v24  ;;  %v2969_v31 = vld [vmem:[#allocation12 + $0x178] sm:$0xff]  ;;  %v2940_v50 = vld [vmem:[#allocation12 + $0x90] sm:$0xff]  ;;  %v3556_v63 = vld [vmem:[#allocation12 + $0x188] sm:$0xff] }
 0x3b5   : > { %v6157_v58 = vpack.c.bf16 %v2969_v31, %v2968_v61  ;;  %v2941_v6 = vld [vmem:[#allocation12 + $0x98] sm:$0xff]  ;;  %v2942_v32 = vld [vmem:[#allocation12 + $0xa0] sm:$0xff]  ;;  %v2943_v17 = vld [vmem:[#allocation12 + $0xa8] sm:$0xff]  ;;  %v6162_v44 = vpack.c.bf16 %v3556_v63, %v3555_v36 }
 0x3b6   : > { %6140 = vmatpush3.bf16.msra.mxu1 %v6137_v62  ;;  %v6109_v8 = vpack.c.bf16 %v2941_v6, %v2940_v50  ;;  %v2891_v10 = vld [vmem:[#allocation3 + $0xa] sm:$0xff]  ;;  %v8365_v60 = vld [vmem:[#allocation3 + $0x1a] sm:$0xff]  ;;  %v6112_v9 = vpack.c.bf16 %v2943_v17, %v2942_v32  ;;  %v8369_v29 = vld [vmem:[#allocation3 + $0x22] sm:$0xff] }
 0x3b7   : > { %6092 = vmatpush1.bf16.msra.mxu0 %v6091_v7  ;;  %6142 = vmatprep.subr.bf16.mxu1 %v6141_v41  ;;  %v3557_v11 = vld [vmem:[#allocation12 + $0x190] sm:$0xff]  ;;  %v3558_v45 = vld [vmem:[#allocation12 + $0x198] sm:$0xff]  ;;  %v8372_v2 = vld [vmem:[#allocation3 + $0x32] sm:$0xff] }
 0x3b8   : > { %6093 = vmatprep.subr.bf16.mxu0 %v9575_v15  ;;  %v2944_v12 = vld [vmem:[#allocation12 + $0xb0] sm:$0xff]  ;;  %v2945_v39 = vld [vmem:[#allocation12 + $0xb8] sm:$0xff]  ;;  %v6165_v37 = vpack.c.bf16 %v3558_v45, %v3557_v11  ;;  %v3559_v56 = vld [vmem:[#allocation12 + $0x1a0] sm:$0xff] }
 0x3b9   : > { %v3560_v0 = vld [vmem:[#allocation12 + $0x1a8] sm:$0xff]  ;;  %v6115_v18 = vpack.c.bf16 %v2945_v39, %v2944_v12  ;;  %v2946_v27 = vld [vmem:[#allocation12 + $0xc0] sm:$0xff]  ;;  %v3561_v25 = vld [vmem:[#allocation12 + $0x1b0] sm:$0xff] }
 0x3ba   : > { %6144 = vmatpush3.bf16.msra.mxu1 %v6141_v41  ;;  %v2947_v53 = vld [vmem:[#allocation12 + $0xc8] sm:$0xff]  ;;  %v6168_v26 = vpack.c.bf16 %v3560_v0, %v3559_v56  ;;  %v8380_v42 = vld [vmem:[#allocation3 + $0x4a] sm:$0xff]  ;;  %v2948_v62 = vld [vmem:[#allocation12 + $0xd0] sm:$0xff] }
 0x3bb   : > { %6095 = vmatpush1.bf16.msra.mxu0 %v6094_v23  ;;  %6146 = vmatprep.subr.bf16.mxu1 %v6145_v40  ;;  %v8377_v46 = vld [vmem:[#allocation3 + $0x3a] sm:$0xff]  ;;  %v3562_v30 = vld [vmem:[#allocation12 + $0x1b8] sm:$0xff]  ;;  %v6118_v34 = vpack.c.bf16 %v2947_v53, %v2946_v27  ;;  %v8385_v49 = vld [vmem:[#allocation3 + $0x52] sm:$0xff] }
 0x3bc   : > { %6096 = vmatprep.subr.bf16.mxu0 %v9575_v15  ;;  %v2949_v7 = vld [vmem:[#allocation12 + $0xd8] sm:$0xff]  ;;  %v6171_v3 = vpack.c.bf16 %v3562_v30, %v3561_v25  ;;  %v3563_v20 = vld [vmem:[#allocation12 + $0x1c0] sm:$0xff]  ;;  %v3564_v41 = vld [vmem:[#allocation12 + $0x1c8] sm:$0xff] }
 0x3bd   : > { %v8388_v28 = vld [vmem:[#allocation3 + $0x62] sm:$0xff]  ;;  %v6121_v23 = vpack.c.bf16 %v2949_v7, %v2948_v62  ;;  %v2950_v47 = vld [vmem:[#allocation12 + $0xe0] sm:$0xff]  ;;  %v2951_v22 = vld [vmem:[#allocation12 + $0xe8] sm:$0xff]  ;;  %v6174_v4 = vpack.c.bf16 %v3564_v41, %v3563_v20 }
 0x3be   : > { %6148 = vmatpush3.bf16.msra.mxu1 %v6145_v40  ;;  %v8393_v33 = vld [vmem:[#allocation3 + $0x6a] sm:$0xff]  ;;  %v8396_v35 = vld [vmem:[#allocation3 + $0x7a] sm:$0xff]  ;;  %v8404_v51 = vld [vmem:[#allocation3 + $0x92] sm:$0xff] }
 0x3bf   : > { %6098 = vmatpush1.bf16.msra.mxu0 %v6097_v54  ;;  %6150 = vmatprep.subr.bf16.mxu1 %v6149_v21  ;;  %v3565_v48 = vld [vmem:[#allocation12 + $0x1d0] sm:$0xff]  ;;  %v3566_v40 = vld [vmem:[#allocation12 + $0x1d8] sm:$0xff]  ;;  %v6124_v54 = vpack.c.bf16 %v2951_v22, %v2950_v47  ;;  %v3587_v5 = vld [vmem:[#allocation12 + $0x280] sm:$0xff] }
 0x3c0   : > { %6099 = vmatprep.subr.bf16.mxu0 %v9575_v15  ;;  %v2952_v16 = vld [vmem:[#allocation12 + $0xf0] sm:$0xff]  ;;  %v2953_v1 = vld [vmem:[#allocation12 + $0xf8] sm:$0xff]  ;;  %v3588_v38 = vld [vmem:[#allocation12 + $0x288] sm:$0xff] }
 0x3c1   : > { %v3567_v43 = vld [vmem:[#allocation12 + $0x1e0] sm:$0xff]  ;;  %v3568_v24 = vld [vmem:[#allocation12 + $0x1e8] sm:$0xff]  ;;  %v6127_v57 = vpack.c.bf16 %v2953_v1, %v2952_v16  ;;  %v3590_v61 = vld [vmem:[#allocation12 + $0x298] sm:$0xff] }
 0x3c2   : > { %6152 = vmatpush3.bf16.msra.mxu1 %v6149_v21  ;;  %v8401_v21 = vld [vmem:[#allocation3 + $0x82] sm:$0xff]  ;;  %v8409_v31 = vld [vmem:[#allocation3 + $0x9a] sm:$0xff]  ;;  %v6180_v19 = vpack.c.bf16 %v3568_v24, %v3567_v43  ;;  %v8412_v52 = vld [vmem:[#allocation3 + $0xaa] sm:$0xff] }
 0x3c3   : > { %6101 = vmatpush1.bf16.msra.mxu0 %v6100_v14  ;;  %6154 = vmatprep.subr.bf16.mxu1 %v6153_v55  ;;  %v6177_v14 = vpack.c.bf16 %v3566_v40, %v3565_v48  ;;  %v2826_v50 = vld [vmem:[#allocation3] sm:$0xff]  ;;  %v2859_v6 = vld [vmem:[#allocation3 + $0x9] sm:$0xff]  ;;  %v8416_v63 = vld [vmem:[#allocation3 + $0xb2] sm:$0xff] }
 0x3c4   : > { %6102 = vmatprep.subr.bf16.mxu0 %v9575_v15  ;;  %v3591_v32 = vld [vmem:[#allocation12 + $0x2a0] sm:$0xff]  ;;  %v3592_v17 = vld [vmem:[#allocation12 + $0x2a8] sm:$0xff]  ;;  %v2827_v45 = vld [vmem:[#allocation3 + $0x8] sm:$0xff] }
 0x3c5   : > { %v3572_v11 = vld [vmem:[#allocation12 + $0x208] sm:$0xff]  ;;  %v6217_v12 = vpack.c.bf16 %v3592_v17, %v3591_v32  ;;  %v8425_v39 = vld [vmem:[#allocation3 + $0xca] sm:$0xff]  ;;  %v3593_v56 = vld [vmem:[#allocation12 + $0x2b0] sm:$0xff] }
 0x3c6   : > { %6156 = vmatpush3.bf16.msra.mxu1 %v6153_v55  ;;  %v6209_v55 = vpack.c.bf16 %v3588_v38, %v3587_v5  ;;  %v3594_v0 = vld [vmem:[#allocation12 + $0x2b8] sm:$0xff]  ;;  %v3573_v27 = vld [vmem:[#allocation12 + $0x210] sm:$0xff]  ;;  %v3595_v7 = vld [vmem:[#allocation12 + $0x2c0] sm:$0xff] }
 0x3c7   : > { %6104 = vmatpush1.bf16.msra.mxu0 %v6103_v59  ;;  %6158 = vmatprep.subr.bf16.mxu1 %v6157_v58  ;;  %v3589_v59 = vld [vmem:[#allocation12 + $0x290] sm:$0xff]  ;;  %v3574_v53 = vld [vmem:[#allocation12 + $0x218] sm:$0xff]  ;;  %v6221_v30 = vpack.c.bf16 %v3594_v0, %v3593_v56  ;;  %v8441_v20 = vld [vmem:[#allocation3 + $0xf2] sm:$0xff] }
 0x3c8   : > { %6105 = vmatprep.subr.bf16.mxu0 %v9575_v15  ;;  %v6213_v36 = vpack.c.bf16 %v3590_v61, %v3589_v59  ;;  %v8433_v25 = vld [vmem:[#allocation3 + $0x21] sm:$0xff]  ;;  %v6189_v62 = vpack.c.bf16 %v3574_v53, %v3573_v27  ;;  %v3575_v41 = vld [vmem:[#allocation12 + $0x220] sm:$0xff]  ;;  %v8459_v43 = vld [vmem:[#allocation3 + $0x39] sm:$0xff] }
 0x3c9   : > { %v8444_v47 = vld [vmem:[#allocation3 + $0x20] sm:$0xff]  ;;  %v8446_v22 = vld [vmem:[#allocation3 + $0x31] sm:$0xff]  ;;  %v3598_v16 = vld [vmem:[#allocation12 + $0x2d8] sm:$0xff] }
 0x3ca   : > { %6160 = vmatpush3.bf16.msra.mxu1 %v6157_v58  ;;  %v3569_v58 = vld [vmem:[#allocation12 + $0x1f0] sm:$0xff]  ;;  %v8454_v1 = vld [vmem:[#allocation3 + $0x10a] sm:$0xff]  ;;  %v3600_v61 = vld [vmem:[#allocation12 + $0x2e8] sm:$0xff] }
 0x3cb   : > { %6107 = vmatpush1.bf16.msra.mxu0 %v6106_v13  ;;  %6161 = vmatprep.subr.bf16.mxu1 %v9575_v15  ;;  %v3570_v13 = vld [vmem:[#allocation12 + $0x1f8] sm:$0xff]  ;;  %v8450_v48 = vld [vmem:[#allocation3 + $0xfa] sm:$0xff]  ;;  %v3599_v59 = vld [vmem:[#allocation12 + $0x2e0] sm:$0xff] }
 0x3cc   : > { %6108 = vmatprep.subr.bf16.mxu0 %v9575_v15  ;;  %v3577_v5 = vld [vmem:[#allocation12 + $0x230] sm:$0xff]  ;;  %v3578_v38 = vld [vmem:[#allocation12 + $0x238] sm:$0xff]  ;;  %v8485_v56 = vld [vmem:[#allocation3 + $0x51] sm:$0xff] }
 0x3cd   : > { %5634 = vmatmul.mubr.f32.vlgmr.msra.gmra.mrb[180].mxu1 %v2891_v10  ;;  %v8419_v10 = vld [vmem:[#allocation3 + $0xc2] sm:$0xff] }
 0x3ce   : > { %6163 = vmatpush1.bf16.msra.mxu1 %v6162_v44  ;;  %5636 = vmatprep.mubr.f32.mxu1 %v8365_v60  ;;  %v3571_v44 = vld [vmem:[#allocation12 + $0x200] sm:$0xff]  ;;  %v3601_v17 = vld [vmem:[#allocation12 + $0x2f0] sm:$0xff] }
 0x3cf   : > { %6110 = vmatpush1.bf16.msra.mxu0 %v6109_v8  ;;  %6164 = vmatprep.subr.bf16.mxu1 %v9575_v15  ;;  %v6183_v8 = vpack.c.bf16 %v3570_v13, %v3569_v58  ;;  %v3579_v58 = vld [vmem:[#allocation12 + $0x240] sm:$0xff]  ;;  %v3580_v13 = vld [vmem:[#allocation12 + $0x248] sm:$0xff]  ;;  %v8489_v27 = vld [vmem:[#allocation3 + $0x142] sm:$0xff] }
 0x3d0   : > { %6111 = vmatprep.subr.bf16.mxu0 %v9575_v15  ;;  %v6198_v32 = vpack.c.bf16 %v3580_v13, %v3579_v58  ;;  %v8521_v13 = vld [vmem:[#allocation3 + $0x68] sm:$0xff] }
 0x3d1   : > { %5637 = vmatmul.mubr.f32.gmra.mrb[182].mxu1 %v8369_v29 }
 0x3d2   : > { %6166 = vmatpush1.bf16.msra.mxu1 %v6165_v37  ;;  %5639 = vmatprep.mubr.f32.mxu1 %v8372_v2  ;;  %v6186_v37 = vpack.c.bf16 %v3572_v11, %v3571_v44  ;;  %v3602_v44 = vld [vmem:[#allocation12 + $0x2f8] sm:$0xff]  ;;  %v8480_v11 = vld [vmem:[#allocation3 + $0x13a] sm:$0xff] }
 0x3d3   : > { %6113 = vmatpush1.bf16.msra.mxu0 %v6112_v9  ;;  %6167 = vmatprep.subr.bf16.mxu1 %v9575_v15  ;;  %v8421_v9 = vld [vmem:[#allocation3 + $0x19] sm:$0xff]  ;;  %v6237_v0 = vpack.c.bf16 %v3602_v44, %v3601_v17 }
 0x3d4   : > { %6114 = vmatprep.subr.bf16.mxu0 %v9575_v15  ;;  %v8523_v17 = vld [vmem:[#allocation3 + $0x79] sm:$0xff] }
 0x3d5   : > { %5640 = vmatmul.mubr.f32.gmra.mrb[184].mxu1 %v8377_v46 }
 0x3d6   : > { %6169 = vmatpush1.bf16.msra.mxu1 %v6168_v26  ;;  %5642 = vmatprep.mubr.f32.mxu1 %v8380_v42  ;;  %v8431_v26 = vld [vmem:[#allocation3 + $0x18] sm:$0xff] }
 0x3d7   : > { %6116 = vmatpush1.bf16.msra.mxu0 %v6115_v18  ;;  %6170 = vmatprep.subr.bf16.mxu1 %v9575_v15  ;;  %v8428_v18 = vld [vmem:[#allocation3 + $0xda] sm:$0xff] }
 0x3d8   : > { %6117 = vmatprep.subr.bf16.mxu0 %v9575_v15 }
 0x3d9   : > { %5643 = vmatmul.mubr.f32.gmra.mrb[186].mxu1 %v8385_v49 }
 0x3da   : > { %6172 = vmatpush1.bf16.msra.mxu1 %v6171_v3  ;;  %5645 = vmatprep.mubr.f32.mxu1 %v8388_v28  ;;  %v3596_v3 = vld [vmem:[#allocation12 + $0x2c8] sm:$0xff] }
 0x3db   : > { %6119 = vmatpush1.bf16.msra.mxu0 %v6118_v34  ;;  %6173 = vmatprep.subr.bf16.mxu1 %v9575_v15  ;;  %v8437_v34 = vld [vmem:[#allocation3 + $0xe2] sm:$0xff] }
 0x3dc   : > { %6120 = vmatprep.subr.bf16.mxu0 %v9575_v15 }
 0x3dd   : > { %5646 = vmatmul.mubr.f32.gmra.mrb[188].mxu1 %v8393_v33 }
 0x3de   : > { %6175 = vmatpush1.bf16.msra.mxu1 %v6174_v4  ;;  %5648 = vmatprep.mubr.f32.mxu1 %v8396_v35  ;;  %v6225_v4 = vpack.c.bf16 %v3596_v3, %v3595_v7  ;;  %v3584_v7 = vld [vmem:[#allocation12 + $0x268] sm:$0xff]  ;;  %v8496_v3 = vld [vmem:[#allocation3 + $0x50] sm:$0xff] }
 0x3df   : > { %6122 = vmatpush1.bf16.msra.mxu0 %v6121_v23  ;;  %6176 = vmatprep.subr.bf16.mxu1 %v9575_v15  ;;  %v3576_v23 = vld [vmem:[#allocation12 + $0x228] sm:$0xff] }
 0x3e0   : > { %6123 = vmatprep.subr.bf16.mxu0 %v9575_v15  ;;  %v6192_v40 = vpack.c.bf16 %v3576_v23, %v3575_v41  ;;  %v8498_v41 = vld [vmem:[#allocation3 + $0x61] sm:$0xff] }
 0x3e1   : > { %5649 = vmatmul.mubr.f32.gmra.mrb[190].mxu1 %v8401_v21  ;;  %v8502_v23 = vld [vmem:[#allocation3 + $0x15a] sm:$0xff] }
 0x3e2   : > { %6178 = vmatpush1.bf16.msra.mxu1 %v6177_v14  ;;  %5651 = vmatprep.mubr.f32.mxu1 %v8404_v51  ;;  %v8457_v14 = vld [vmem:[#allocation3 + $0x30] sm:$0xff] }
 0x3e3   : > { %6125 = vmatpush1.bf16.msra.mxu0 %v6124_v54  ;;  %6179 = vmatprep.subr.bf16.mxu1 %v9575_v15  ;;  %v3597_v54 = vld [vmem:[#allocation12 + $0x2d0] sm:$0xff] }
 0x3e4   : > { %6126 = vmatprep.subr.bf16.mxu0 %v9575_v15  ;;  %v6229_v24 = vpack.c.bf16 %v3598_v16, %v3597_v54  ;;  %v3585_v54 = vld [vmem:[#allocation12 + $0x270] sm:$0xff]  ;;  %v3586_v16 = vld [vmem:[#allocation12 + $0x278] sm:$0xff] }
 0x3e5   : > { %5652 = vmatmul.mubr.f32.gmra.mrb[192].mxu1 %v8409_v31 }
 0x3e6   : > { %6181 = vmatpush1.bf16.msra.mxu1 %v6180_v19  ;;  %5654 = vmatprep.mubr.f32.mxu1 %v8412_v52  ;;  %v8467_v19 = vld [vmem:[#allocation3 + $0x122] sm:$0xff] }
 0x3e7   : > { %6128 = vmatpush1.bf16.msra.mxu0 %v6127_v57  ;;  %6182 = vmatprep.subr.bf16.mxu1 %v9575_v15  ;;  %v8463_v57 = vld [vmem:[#allocation3 + $0x112] sm:$0xff] }
 0x3e8   : > { %6210 = vmatprep.subr.bf16.mxu0 %v6209_v55 }
 0x3e9   : > { %5655 = vmatmul.mubr.f32.gmra.mrb[194].mxu1 %v8416_v63 }
 0x3ea   : > { %3035 = vmatmul.mubr.f32.vlgmr.msra.gmra.mrb[144].mxu0 %v2826_v50  ;;  %6184 = vmatpush1.bf16.msra.mxu1 %v6183_v8  ;;  %v8470_v50 = vld [vmem:[#allocation3 + $0x38] sm:$0xff]  ;;  %v8476_v8 = vld [vmem:[#allocation3 + $0x12a] sm:$0xff] }
 0x3eb   : > { %6212 = vmatpush3.bf16.msra.mxu0 %v6209_v55  ;;  %3039 = vmatprep.mubr.f32.mxu0 %v2859_v6  ;;  %v6195_v55 = vpack.c.bf16 %v3578_v38, %v3577_v5  ;;  %v8472_v6 = vld [vmem:[#allocation3 + $0x49] sm:$0xff]  ;;  %v8509_v5 = vld [vmem:[#allocation3 + $0x60] sm:$0xff] }
 0x3ec   : > { %6214 = vmatprep.subr.bf16.mxu0 %v6213_v36  ;;  %5657 = vmatprep.mubr.f32.mxu1 %v8419_v10  ;;  %v4214_v38 = vld [vmem:[#allocation12 + $0x400] sm:$0xff] }
 0x3ed   : > { %6185 = vmatprep.subr.bf16.mxu1 %v9575_v15  ;;  %5658 = vmatmul.mubr.f32.gmra.mrb[196].mxu1 %v8425_v39 }
 0x3ee   : > { %3040 = vmatmul.mubr.f32.gmra.mrb[146].mxu0 %v2827_v45  ;;  %6187 = vmatpush1.bf16.msra.mxu1 %v6186_v37  ;;  %v3581_v45 = vld [vmem:[#allocation12 + $0x250] sm:$0xff]  ;;  %v8483_v37 = vld [vmem:[#allocation3 + $0x48] sm:$0xff] }
 0x3ef   : > { %3044 = vmatprep.mubr.f32.mxu0 %v8421_v9  ;;  %6216 = vmatpush3.bf16.msra.mxu0 %v6213_v36  ;;  %v6233_v36 = vpack.c.bf16 %v3600_v61, %v3599_v59  ;;  %v8516_v59 = vld [vmem:[#allocation3 + $0x172] sm:$0xff]  ;;  %v6207_v61 = vpack.c.bf16 %v3586_v16, %v3585_v54 }
 0x3f0   : > { %6218 = vmatprep.subr.bf16.mxu0 %v6217_v12  ;;  %5660 = vmatprep.mubr.f32.mxu1 %v8428_v18  ;;  %v8539_v54 = vld [vmem:[#allocation3 + $0x91] sm:$0xff] }
 0x3f1   : > { %6188 = vmatprep.subr.bf16.mxu1 %v9575_v15  ;;  %5661 = vmatmul.mubr.f32.gmra.mrb[198].mxu1 %v8437_v34  ;;  %v4222_v16 = vld [vmem:[#allocation12 + $0x440] sm:$0xff] }
 0x3f2   : > { %3045 = vmatmul.mubr.f32.gmra.mrb[148].mxu0 %v8431_v26  ;;  %6190 = vmatpush1.bf16.msra.mxu1 %v6189_v62  ;;  %v3583_v62 = vld [vmem:[#allocation12 + $0x260] sm:$0xff] }
 0x3f3   : > { %3049 = vmatprep.mubr.f32.mxu0 %v8433_v25  ;;  %6220 = vmatpush3.bf16.msra.mxu0 %v6217_v12  ;;  %v3582_v12 = vld [vmem:[#allocation12 + $0x258] sm:$0xff] }
 0x3f4   : > { %6222 = vmatprep.subr.bf16.mxu0 %v6221_v30  ;;  %5663 = vmatprep.mubr.f32.mxu1 %v8441_v20  ;;  %v6201_v53 = vpack.c.bf16 %v3582_v12, %v3581_v45  ;;  %v8529_v45 = vld [vmem:[#allocation3 + $0x78] sm:$0xff]  ;;  %v4218_v12 = vld [vmem:[#allocation12 + $0x420] sm:$0xff] }
 0x3f5   : > { %6191 = vmatprep.subr.bf16.mxu1 %v9575_v15  ;;  %5664 = vmatmul.mubr.f32.gmra.mrb[200].mxu1 %v8450_v48 }
 0x3f6   : > { %3050 = vmatmul.mubr.f32.gmra.mrb[150].mxu0 %v8444_v47  ;;  %6193 = vmatpush1.bf16.msra.mxu1 %v6192_v40  ;;  %v8506_v40 = vld [vmem:[#allocation3 + $0x16a] sm:$0xff] }
 0x3f7   : > { %3054 = vmatprep.mubr.f32.mxu0 %v8446_v22  ;;  %6224 = vmatpush3.bf16.msra.mxu0 %v6221_v30  ;;  %v8493_v30 = vld [vmem:[#allocation3 + $0x152] sm:$0xff] }
 0x3f8   : > { %6226 = vmatprep.subr.bf16.mxu0 %v6225_v4  ;;  %5666 = vmatprep.mubr.f32.mxu1 %v8454_v1 }
 0x3f9   : > { %6194 = vmatprep.subr.bf16.mxu1 %v9575_v15  ;;  %5667 = vmatmul.mubr.f32.gmra.mrb[202].mxu1 %v8463_v57 }
 0x3fa   : > { %3055 = vmatmul.mubr.f32.gmra.mrb[152].mxu0 %v8457_v14  ;;  %6196 = vmatpush1.bf16.msra.mxu1 %v6195_v55  ;;  %v8511_v55 = vld [vmem:[#allocation3 + $0x69] sm:$0xff] }
 0x3fb   : > { %3059 = vmatprep.mubr.f32.mxu0 %v8459_v43  ;;  %6228 = vmatpush3.bf16.msra.mxu0 %v6225_v4  ;;  %v6204_v4 = vpack.c.bf16 %v3584_v7, %v3583_v62  ;;  %v8537_v62 = vld [vmem:[#allocation3 + $0x80] sm:$0xff] }
 0x3fc   : > { %6230 = vmatprep.subr.bf16.mxu0 %v6229_v24  ;;  %5669 = vmatprep.mubr.f32.mxu1 %v8467_v19  ;;  %v4220_v7 = vld [vmem:[#allocation12 + $0x430] sm:$0xff] }
 0x3fd   : > { %6197 = vmatprep.subr.bf16.mxu1 %v9575_v15  ;;  %5670 = vmatmul.mubr.f32.gmra.mrb[204].mxu1 %v8476_v8 }
 0x3fe   : > { %3060 = vmatmul.mubr.f32.gmra.mrb[154].mxu0 %v8470_v50  ;;  %6199 = vmatpush1.bf16.msra.mxu1 %v6198_v32  ;;  %v4217_v32 = vld [vmem:[#allocation12 + $0x418] sm:$0xff] }
 0x3ff   : > { %3064 = vmatprep.mubr.f32.mxu0 %v8472_v6  ;;  %6232 = vmatpush3.bf16.msra.mxu0 %v6229_v24  ;;  %v4215_v24 = vld [vmem:[#allocation12 + $0x408] sm:$0xff] }
 0x400   : > { %6234 = vmatprep.subr.bf16.mxu0 %v6233_v36  ;;  %5672 = vmatprep.mubr.f32.mxu1 %v8480_v11  ;;  %v6289_v58 = vpack.c.bf16 %v4215_v24, %v4214_v38  ;;  %v4223_v38 = vld [vmem:[#allocation12 + $0x448] sm:$0xff] }
 0x401   : > { %6200 = vmatprep.subr.bf16.mxu1 %v9575_v15  ;;  %5673 = vmatmul.mubr.f32.gmra.mrb[206].mxu1 %v8489_v27  ;;  %v8547_v24 = vld [vmem:[#allocation3 + $0x99] sm:$0xff] }
 0x402   : > { %3065 = vmatmul.mubr.f32.gmra.mrb[156].mxu0 %v8483_v37  ;;  %6202 = vmatpush1.bf16.msra.mxu1 %v6201_v53  ;;  %v8531_v53 = vld [vmem:[#allocation3 + $0x81] sm:$0xff] }
 0x403   : > { %3069 = vmatprep.mubr.f32.mxu0 %v8485_v56  ;;  %6236 = vmatpush3.bf16.msra.mxu0 %v6233_v36  ;;  %v4216_v36 = vld [vmem:[#allocation12 + $0x410] sm:$0xff] }
 0x404   : > { %6238 = vmatprep.subr.bf16.mxu0 %v6237_v0  ;;  %5675 = vmatprep.mubr.f32.mxu1 %v8493_v30  ;;  %v6293_v44 = vpack.c.bf16 %v4217_v32, %v4216_v36  ;;  %v8555_v36 = vld [vmem:[#allocation3 + $0xa9] sm:$0xff] }
 0x405   : > { %6203 = vmatprep.subr.bf16.mxu1 %v9575_v15  ;;  %5676 = vmatmul.mubr.f32.gmra.mrb[208].mxu1 %v8502_v23  ;;  %v4226_v32 = vld [vmem:[#allocation12 + $0x460] sm:$0xff] }
 0x406   : > { %3070 = vmatmul.mubr.f32.gmra.mrb[158].mxu0 %v8496_v3  ;;  %6205 = vmatpush1.bf16.msra.mxu1 %v6204_v4  ;;  %v4221_v4 = vld [vmem:[#allocation12 + $0x438] sm:$0xff] }
 0x407   : > { %3074 = vmatprep.mubr.f32.mxu0 %v8498_v41  ;;  %6240 = vmatpush3.bf16.msra.mxu0 %v6237_v0  ;;  %v4219_v0 = vld [vmem:[#allocation12 + $0x428] sm:$0xff] }
 0x408   : > { %6241 = vmatprep.subr.bf16.mxu0 %v9575_v15  ;;  %5678 = vmatprep.mubr.f32.mxu1 %v8506_v40 }
 0x409   : > { %6206 = vmatprep.subr.bf16.mxu1 %v9575_v15  ;;  %5679 = vmatmul.mubr.f32.gmra.mrb[210].mxu1 %v8516_v59 }
 0x40a   : > { %3075 = vmatmul.mubr.f32.gmra.mrb[160].mxu0 %v8509_v5  ;;  %6208 = vmatpush1.bf16.msra.mxu1 %v6207_v61  ;;  %v4224_v61 = vld [vmem:[#allocation12 + $0x450] sm:$0xff] }
 0x40b   : > { %3079 = vmatprep.mubr.f32.mxu0 %v8511_v55  ;;  %3667 = vmatprep.mubr.f32.mxu1 %v8421_v9  ;;  %v6297_v9 = vpack.c.bf16 %v4219_v0, %v4218_v12  ;;  %v8563_v12 = vld [vmem:[#allocation3 + $0xb1] sm:$0xff]  ;;  %v4228_v0 = vld [vmem:[#allocation12 + $0x470] sm:$0xff] }
 0x40c   : > { %6290 = vmatprep.subr.bf16.mxu1 %v6289_v58 }
 0x40d   : > { %3668 = vmatmul.mubr.f32.vlgmr.msra.gmra.mrb[212].mxu1 %v8431_v26  ;;  %v6301_v26 = vpack.c.bf16 %v4221_v4, %v4220_v7  ;;  %v8571_v7 = vld [vmem:[#allocation3 + $0xc1] sm:$0xff]  ;;  %v8579_v4 = vld [vmem:[#allocation3 + $0xc9] sm:$0xff] }
 0x40e   : > { %3080 = vmatmul.mubr.f32.gmra.mrb[162].mxu0 %v8521_v13  ;;  %3672 = vmatprep.mubr.f32.mxu1 %v8433_v25  ;;  %v8545_v25 = vld [vmem:[#allocation3 + $0x90] sm:$0xff] }
 0x40f   : > { %3084 = vmatprep.mubr.f32.mxu0 %v8523_v17  ;;  %6292 = vmatpush3.bf16.msra.mxu1 %v6289_v58  ;;  %v4225_v58 = vld [vmem:[#allocation12 + $0x458] sm:$0xff] }
 0x410   : > { %6294 = vmatprep.subr.bf16.mxu1 %v6293_v44 }
 0x411   : > { %3673 = vmatmul.mubr.f32.gmra.mrb[214].mxu1 %v8444_v47  ;;  %v6305_v47 = vpack.c.bf16 %v4223_v38, %v4222_v16  ;;  %v8606_v16 = vld [vmem:[#allocation3 + $0xf9] sm:$0xff]  ;;  %v2882_v38 = vld [vmem:[#allocation3 + $0x121] sm:$0xff] }
 0x412   : > { %3085 = vmatmul.mubr.f32.gmra.mrb[164].mxu0 %v8529_v45  ;;  %3677 = vmatprep.mubr.f32.mxu1 %v8446_v22  ;;  %v8553_v22 = vld [vmem:[#allocation3 + $0x98] sm:$0xff]  ;;  %9580 = vst [vmem:[#allocation39_spill] sm:$0xff] %v8606_v16 }
 0x413   : > { %3089 = vmatprep.mubr.f32.mxu0 %v8531_v53  ;;  %6296 = vmatpush3.bf16.msra.mxu1 %v6293_v44  ;;  %v4227_v44 = vld [vmem:[#allocation12 + $0x468] sm:$0xff] }
 0x414   : > { %6298 = vmatprep.subr.bf16.mxu1 %v6297_v9 }
 0x415   : > { %3678 = vmatmul.mubr.f32.gmra.mrb[216].mxu1 %v8457_v14  ;;  %v6309_v14 = vpack.c.bf16 %v4225_v58, %v4224_v61  ;;  %v2851_v61 = vld [vmem:[#allocation3 + $0x128] sm:$0xff]  ;;  %v2884_v58 = vld [vmem:[#allocation3 + $0x139] sm:$0xff] }
 0x416   : > { %3090 = vmatmul.mubr.f32.gmra.mrb[166].mxu0 %v8537_v62  ;;  %3682 = vmatprep.mubr.f32.mxu1 %v8459_v43  ;;  %v8561_v43 = vld [vmem:[#allocation3 + $0xa8] sm:$0xff] }
 0x417   : > { %3094 = vmatprep.mubr.f32.mxu0 %v8539_v54  ;;  %6300 = vmatpush3.bf16.msra.mxu1 %v6297_v9  ;;  %v4229_v9 = vld [vmem:[#allocation12 + $0x478] sm:$0xff] }
 0x418   : > { %6302 = vmatprep.subr.bf16.mxu1 %v6301_v26 }
 0x419   : > { %3683 = vmatmul.mubr.f32.gmra.mrb[218].mxu1 %v8470_v50  ;;  %v6313_v50 = vpack.c.bf16 %v4227_v44, %v4226_v32  ;;  %v2885_v32 = vld [vmem:[#allocation3 + $0x141] sm:$0xff] }
 0x41a   : > { %3095 = vmatmul.mubr.f32.gmra.mrb[168].mxu0 %v8545_v25  ;;  %3687 = vmatprep.mubr.f32.mxu1 %v8472_v6  ;;  %v8569_v6 = vld [vmem:[#allocation3 + $0xb0] sm:$0xff]  ;;  %v2853_v44 = vld [vmem:[#allocation3 + $0x140] sm:$0xff] }
 0x41b   : > { %3099 = vmatprep.mubr.f32.mxu0 %v8547_v24  ;;  %6304 = vmatpush3.bf16.msra.mxu1 %v6301_v26  ;;  %v2846_v26 = vld [vmem:[#allocation3 + $0xf0] sm:$0xff] }
 0x41c   : > { %6306 = vmatprep.subr.bf16.mxu1 %v6305_v47 }
 0x41d   : > { %3688 = vmatmul.mubr.f32.gmra.mrb[220].mxu1 %v8483_v37  ;;  %v6317_v37 = vpack.c.bf16 %v4229_v9, %v4228_v0  ;;  %v8624_v0 = vld [vmem:[#allocation3 + $0x150] sm:$0xff]  ;;  %v8626_v9 = vld [vmem:[#allocation3 + $0x159] sm:$0xff] }
 0x41e   : > { %3100 = vmatmul.mubr.f32.gmra.mrb[170].mxu0 %v8553_v22  ;;  %3692 = vmatprep.mubr.f32.mxu1 %v8485_v56  ;;  %v8577_v56 = vld [vmem:[#allocation3 + $0xc0] sm:$0xff] }
 0x41f   : > { %3104 = vmatprep.mubr.f32.mxu0 %v8555_v36  ;;  %6308 = vmatpush3.bf16.msra.mxu1 %v6305_v47  ;;  %v2850_v47 = vld [vmem:[#allocation3 + $0x120] sm:$0xff] }
 0x420   : > { %6310 = vmatprep.subr.bf16.mxu1 %v6309_v14 }
 0x421   : > { %3693 = vmatmul.mubr.f32.gmra.mrb[222].mxu1 %v8496_v3  ;;  %v8585_v3 = vld [vmem:[#allocation3 + $0xc8] sm:$0xff] }
 0x422   : > { %3105 = vmatmul.mubr.f32.gmra.mrb[172].mxu0 %v8561_v43  ;;  %3697 = vmatprep.mubr.f32.mxu1 %v8498_v41  ;;  %v8587_v41 = vld [vmem:[#allocation3 + $0xd9] sm:$0xff] }
 0x423   : > { %3109 = vmatprep.mubr.f32.mxu0 %v8563_v12  ;;  %6312 = vmatpush3.bf16.msra.mxu1 %v6309_v14  ;;  %9576 = vst [vmem:[#allocation35_spill] sm:$0xff] %v8587_v41  ;;  %v2852_v14 = vld [vmem:[#allocation3 + $0x138] sm:$0xff] }
 0x424   : > { %6314 = vmatprep.subr.bf16.mxu1 %v6313_v50 }
 0x425   : > { %3698 = vmatmul.mubr.f32.gmra.mrb[224].mxu1 %v8509_v5  ;;  %v8593_v5 = vld [vmem:[#allocation3 + $0xd8] sm:$0xff] }
 0x426   : > { %3110 = vmatmul.mubr.f32.gmra.mrb[174].mxu0 %v8569_v6  ;;  %3702 = vmatprep.mubr.f32.mxu1 %v8511_v55  ;;  %9577 = vst [vmem:[#allocation34_spill] sm:$0xff] %v8593_v5  ;;  %v8595_v55 = vld [vmem:[#allocation3 + $0xe1] sm:$0xff] }
 0x427   : > { %3114 = vmatprep.mubr.f32.mxu0 %v8571_v7  ;;  %6316 = vmatpush3.bf16.msra.mxu1 %v6313_v50  ;;  %9578 = vst [vmem:[#allocation36_spill] sm:$0xff] %v8595_v55  ;;  %v2886_v50 = vld [vmem:[#allocation3 + $0x151] sm:$0xff] }
 0x428   : > { %6318 = vmatprep.subr.bf16.mxu1 %v6317_v37 }
 0x429   : > { %3703 = vmatmul.mubr.f32.gmra.mrb[226].mxu1 %v8521_v13  ;;  %v8601_v13 = vld [vmem:[#allocation3 + $0xe0] sm:$0xff] }
 0x42a   : > { %3115 = vmatmul.mubr.f32.gmra.mrb[176].mxu0 %v8577_v56  ;;  %3707 = vmatprep.mubr.f32.mxu1 %v8523_v17  ;;  %9579 = vst [vmem:[#allocation37_spill] sm:$0xff] %v8601_v13  ;;  %v2878_v17 = vld [vmem:[#allocation3 + $0xf1] sm:$0xff] }
 0x42b   : > { %3119 = vmatprep.mubr.f32.mxu0 %v8579_v4  ;;  %6320 = vmatpush3.bf16.msra.mxu1 %v6317_v37  ;;  %v8631_v37 = vld [vmem:[#allocation3 + $0x158] sm:$0xff] }
 0x42d   : > { %3708 = vmatmul.mubr.f32.gmra.mrb[228].mxu1 %v8529_v45  ;;  %v2847_v45 = vld [vmem:[#allocation3 + $0xf8] sm:$0xff] }
 0x42e   : > { %3120 = vmatmul.mubr.f32.gmra.mrb[178].mxu0 %v8585_v3  ;;  %3712 = vmatprep.mubr.f32.mxu1 %v8531_v53  ;;  %v2880_v53 = vld [vmem:[#allocation3 + $0x109] sm:$0xff] }
 0x42f   : > { %3124 = vmatprep.mubr.f32.mxu0 %v8587_v41 }
 0x431   : > { %3713 = vmatmul.mubr.f32.gmra.mrb[230].mxu1 %v8537_v62  ;;  %v2848_v62 = vld [vmem:[#allocation3 + $0x108] sm:$0xff] }
 0x432   : > { %3125 = vmatmul.mubr.f32.gmra.mrb[180].mxu0 %v8593_v5  ;;  %3717 = vmatprep.mubr.f32.mxu1 %v8539_v54  ;;  %v2881_v54 = vld [vmem:[#allocation3 + $0x111] sm:$0xff] }
 0x433   : > { %3129 = vmatprep.mubr.f32.mxu0 %v8595_v55 }
 0x435   : > { %3718 = vmatmul.mubr.f32.gmra.mrb[232].mxu1 %v8545_v25  ;;  %v2849_v25 = vld [vmem:[#allocation3 + $0x110] sm:$0xff] }
 0x436   : > { %3130 = vmatmul.mubr.f32.gmra.mrb[182].mxu0 %v8601_v13  ;;  %3722 = vmatprep.mubr.f32.mxu1 %v8547_v24 }
 0x437   : > { %3134 = vmatprep.mubr.f32.mxu0 %v2878_v17 }
 0x439   : > { %3723 = vmatmul.mubr.f32.gmra.mrb[234].mxu1 %v8553_v22  ;;  %v2883_v22 = vld [vmem:[#allocation3 + $0x129] sm:$0xff] }
 0x43a   : > { %3135 = vmatmul.mubr.f32.gmra.mrb[184].mxu0 %v2846_v26  ;;  %3727 = vmatprep.mubr.f32.mxu1 %v8555_v36 }
 0x43b   : > { %3139 = vmatprep.mubr.f32.mxu0 %v8606_v16 }
 0x43d   : > { %3728 = vmatmul.mubr.f32.gmra.mrb[236].mxu1 %v8561_v43 }
 0x43e   : > { %3140 = vmatmul.mubr.f32.gmra.mrb[186].mxu0 %v2847_v45  ;;  %3732 = vmatprep.mubr.f32.mxu1 %v8563_v12 }
 0x43f   : > { %3144 = vmatprep.mubr.f32.mxu0 %v2880_v53 }
 0x441   : > { %3733 = vmatmul.mubr.f32.gmra.mrb[238].mxu1 %v8569_v6 }
 0x442   : > { %3145 = vmatmul.mubr.f32.gmra.mrb[188].mxu0 %v2848_v62  ;;  %3737 = vmatprep.mubr.f32.mxu1 %v8571_v7 }
 0x443   : > { %3149 = vmatprep.mubr.f32.mxu0 %v2881_v54 }
 0x445   : > { %3738 = vmatmul.mubr.f32.gmra.mrb[240].mxu1 %v8577_v56 }
 0x446   : > { %3150 = vmatmul.mubr.f32.gmra.mrb[190].mxu0 %v2849_v25  ;;  %3742 = vmatprep.mubr.f32.mxu1 %v8579_v4 }
 0x447   : > { %3154 = vmatprep.mubr.f32.mxu0 %v2882_v38 }
 0x449   : > { %3743 = vmatmul.mubr.f32.gmra.mrb[242].mxu1 %v8585_v3 }
 0x44a   : > { %3155 = vmatmul.mubr.f32.gmra.mrb[192].mxu0 %v2850_v47  ;;  %3747 = vmatprep.mubr.f32.mxu1 %v8587_v41  ;;  %v4185_v41 = vld [vmem:[#allocation12 + $0x318] sm:$0xff] }
 0x44b   : > { %3159 = vmatprep.mubr.f32.mxu0 %v2883_v22 }
 0x44d   : > { %3748 = vmatmul.mubr.f32.gmra.mrb[244].mxu1 %v8593_v5  ;;  %v4183_v5 = vld [vmem:[#allocation12 + $0x308] sm:$0xff] }
 0x44e   : > { %3160 = vmatmul.mubr.f32.gmra.mrb[194].mxu0 %v2851_v61  ;;  %3752 = vmatprep.mubr.f32.mxu1 %v8595_v55  ;;  %v8633_v55 = vld [vmem:[#allocation3 + $0x169] sm:$0xff] }
 0x44f   : > { %3164 = vmatprep.mubr.f32.mxu0 %v2884_v58 }
 0x451   : > { %3753 = vmatmul.mubr.f32.gmra.mrb[246].mxu1 %v8601_v13  ;;  %v8639_v13 = vld [vmem:[#allocation3 + $0x171] sm:$0xff] }
 0x452   : > { %3165 = vmatmul.mubr.f32.gmra.mrb[196].mxu0 %v2852_v14  ;;  %3757 = vmatprep.mubr.f32.mxu1 %v2878_v17  ;;  %v8637_v17 = vld [vmem:[#allocation3 + $0x168] sm:$0xff] }
 0x453   : > { %3169 = vmatprep.mubr.f32.mxu0 %v2885_v32 }
 0x455   : > { %3758 = vmatmul.mubr.f32.gmra.mrb[248].mxu1 %v2846_v26  ;;  %v8643_v26 = vld [vmem:[#allocation3 + $0x170] sm:$0xff] }
 0x456   : > { %3170 = vmatmul.mubr.f32.gmra.mrb[198].mxu0 %v2853_v44  ;;  %3762 = vmatprep.mubr.f32.mxu1 %v8606_v16  ;;  %v4182_v16 = vld [vmem:[#allocation12 + $0x300] sm:$0xff] }
 0x457   : > { %3174 = vmatprep.mubr.f32.mxu0 %v2886_v50 }
 0x459   : > { %3763 = vmatmul.mubr.f32.gmra.mrb[250].mxu1 %v2847_v45  ;;  %v6242_v45 = vpack.c.bf16 %v4183_v5, %v4182_v16  ;;  %v4188_v5 = vld [vmem:[#allocation12 + $0x330] sm:$0xff] }
 0x45a   : > { %3175 = vmatmul.mubr.f32.gmra.mrb[200].mxu0 %v8624_v0  ;;  %3767 = vmatprep.mubr.f32.mxu1 %v2880_v53  ;;  %v4184_v53 = vld [vmem:[#allocation12 + $0x310] sm:$0xff] }
 0x45b   : > { %3179 = vmatprep.mubr.f32.mxu0 %v8626_v9  ;;  %v4192_v16 = vld [vmem:[#allocation12 + $0x350] sm:$0xff] }
 0x45d   : > { %3768 = vmatmul.mubr.f32.gmra.mrb[252].mxu1 %v2848_v62  ;;  %v6245_v62 = vpack.c.bf16 %v4185_v41, %v4184_v53  ;;  %v4190_v41 = vld [vmem:[#allocation12 + $0x340] sm:$0xff] }
 0x45e   : > { %3180 = vmatmul.mubr.f32.gmra.mrb[202].mxu0 %v8631_v37  ;;  %3772 = vmatprep.mubr.f32.mxu1 %v2881_v54  ;;  %v4186_v54 = vld [vmem:[#allocation12 + $0x320] sm:$0xff] }
 0x45f   : > { %3184 = vmatprep.mubr.f32.mxu0 %v8633_v55 }
 0x461   : > { %3773 = vmatmul.mubr.f32.gmra.mrb[254].mxu1 %v2849_v25  ;;  %v4187_v25 = vld [vmem:[#allocation12 + $0x328] sm:$0xff] }
 0x462   : > { %3185 = vmatmul.mubr.f32.gmra.mrb[204].mxu0 %v8637_v17  ;;  %3777 = vmatprep.mubr.f32.mxu1 %v2882_v38  ;;  %v4195_v38 = vld [vmem:[#allocation12 + $0x368] sm:$0xff] }
 0x463   : > { %3189 = vmatprep.mubr.f32.mxu0 %v8639_v13 }
 0x465   : > { %3778 = vmatmul.mubr.f32.gmra.mrb[0].mxu1 %v2850_v47  ;;  %v4197_v47 = vld [vmem:[#allocation12 + $0x378] sm:$0xff] }
 0x466   : > { %3190 = vmatmul.mubr.f32.gmra.mrb[206].mxu0 %v8643_v26  ;;  %3782 = vmatprep.mubr.f32.mxu1 %v2883_v22  ;;  %v8678_v22 = vld [vmem:[#allocation3 + $0x180] sm:$0xff] }
 0x467   : > { %5713 = vmatprep.mubr.f32.mxu0 %v8365_v60  ;;  %v6248_v60 = vpack.c.bf16 %v4187_v25, %v4186_v54  ;;  %v4158_v54 = vld [vmem:[#allocation3 + $0x92] sm:$0xff] }
 0x469   : > { %3783 = vmatmul.mubr.f32.gmra.mrb[2].mxu1 %v2851_v61  ;;  %v4201_v61 = vld [vmem:[#allocation12 + $0x398] sm:$0xff] }
 0x46a   : > { %5714 = vmatmul.mubr.f32.vlgmr.msra.gmra.mrb[208].mxu0 %v8369_v29  ;;  %3787 = vmatprep.mubr.f32.mxu1 %v2884_v58  ;;  %v4189_v29 = vld [vmem:[#allocation12 + $0x338] sm:$0xff] }
 0x46b   : > { %6243 = vmatpush1.bf16.msra.mxu0 %v6242_v45  ;;  %5716 = vmatprep.mubr.f32.mxu0 %v8372_v2  ;;  %v6251_v2 = vpack.c.bf16 %v4189_v29, %v4188_v5  ;;  %v8687_v58 = vld [vmem:[#allocation3 + $0x188] sm:$0xff]  ;;  %v4156_v45 = vld [vmem:[#allocation3 + $0x7a] sm:$0xff] }
 0x46c   : > { %6244 = vmatprep.subr.bf16.mxu0 %v9575_v15  ;;  %v4160_v5 = vld [vmem:[#allocation3 + $0xaa] sm:$0xff] }
 0x46d   : > { %3788 = vmatmul.mubr.f32.gmra.mrb[4].mxu1 %v2852_v14  ;;  %v4150_v14 = vld [vmem:[#allocation3 + $0x32] sm:$0xff] }
 0x46e   : > { %5717 = vmatmul.mubr.f32.gmra.mrb[210].mxu0 %v8377_v46  ;;  %3792 = vmatprep.mubr.f32.mxu1 %v2885_v32  ;;  %v4191_v46 = vld [vmem:[#allocation12 + $0x348] sm:$0xff] }
 0x46f   : > { %6246 = vmatpush1.bf16.msra.mxu0 %v6245_v62  ;;  %5719 = vmatprep.mubr.f32.mxu0 %v8380_v42  ;;  %v6254_v42 = vpack.c.bf16 %v4191_v46, %v4190_v41  ;;  %v4203_v32 = vld [vmem:[#allocation12 + $0x3a8] sm:$0xff]  ;;  %v4209_v62 = vld [vmem:[#allocation12 + $0x3d8] sm:$0xff] }
 0x470   : > { %6247 = vmatprep.subr.bf16.mxu0 %v9575_v15  ;;  %v4161_v41 = vld [vmem:[#allocation3 + $0xb2] sm:$0xff]  ;;  %v4162_v46 = vld [vmem:[#allocation3 + $0xc2] sm:$0xff] }
 0x471   : > { %3793 = vmatmul.mubr.f32.gmra.mrb[6].mxu1 %v2853_v44  ;;  %v4151_v44 = vld [vmem:[#allocation3 + $0x3a] sm:$0xff] }
 0x472   : > { %5720 = vmatmul.mubr.f32.gmra.mrb[212].mxu0 %v8385_v49  ;;  %3797 = vmatprep.mubr.f32.mxu1 %v2886_v50  ;;  %v4193_v49 = vld [vmem:[#allocation12 + $0x358] sm:$0xff] }
 0x473   : > { %6249 = vmatpush1.bf16.msra.mxu0 %v6248_v60  ;;  %5722 = vmatprep.mubr.f32.mxu0 %v8388_v28  ;;  %v6257_v28 = vpack.c.bf16 %v4193_v49, %v4192_v16  ;;  %v4152_v50 = vld [vmem:[#allocation3 + $0x4a] sm:$0xff]  ;;  %v4211_v60 = vld [vmem:[#allocation12 + $0x3e8] sm:$0xff] }
 0x474   : > { %6250 = vmatprep.subr.bf16.mxu0 %v9575_v15  ;;  %v4118_v16 = vld [vmem:[#allocation3 + $0x31] sm:$0xff] }
 0x475   : > { %3798 = vmatmul.mubr.f32.gmra.mrb[8].mxu1 %v8624_v0  ;;  %v4204_v0 = vld [vmem:[#allocation12 + $0x3b0] sm:$0xff] }
 0x476   : > { %5723 = vmatmul.mubr.f32.gmra.mrb[214].mxu0 %v8393_v33  ;;  %3802 = vmatprep.mubr.f32.mxu1 %v8626_v9  ;;  %v4194_v33 = vld [vmem:[#allocation12 + $0x360] sm:$0xff] }
 0x477   : > { %6252 = vmatpush1.bf16.msra.mxu0 %v6251_v2  ;;  %5725 = vmatprep.mubr.f32.mxu0 %v8396_v35  ;;  %v6260_v35 = vpack.c.bf16 %v4195_v38, %v4194_v33  ;;  %v4153_v9 = vld [vmem:[#allocation3 + $0x52] sm:$0xff]  ;;  %v4213_v2 = vld [vmem:[#allocation12 + $0x3f8] sm:$0xff] }
 0x478   : > { %6253 = vmatprep.subr.bf16.mxu0 %v9575_v15  ;;  %v4086_v33 = vld [vmem:[#allocation3 + $0x30] sm:$0xff] }
 0x479   : > { %3803 = vmatmul.mubr.f32.gmra.mrb[10].mxu1 %v8631_v37  ;;  %v4154_v37 = vld [vmem:[#allocation3 + $0x62] sm:$0xff] }
 0x47a   : > { %5726 = vmatmul.mubr.f32.gmra.mrb[216].mxu0 %v8401_v21  ;;  %3807 = vmatprep.mubr.f32.mxu1 %v8633_v55  ;;  %v4196_v21 = vld [vmem:[#allocation12 + $0x370] sm:$0xff]  ;;  %v4199_v55 = vld [vmem:[#allocation12 + $0x388] sm:$0xff] }
 0x47b   : > { %6255 = vmatpush1.bf16.msra.mxu0 %v6254_v42  ;;  %5728 = vmatprep.mubr.f32.mxu0 %v8404_v51  ;;  %v8672_v51 = vld [vmem:[#allocation3 + $0x181] sm:$0xff] }
 0x47c   : > { %6256 = vmatprep.subr.bf16.mxu0 %v9575_v15 }
 0x47d   : > { %3808 = vmatmul.mubr.f32.gmra.mrb[12].mxu1 %v8637_v17 }
 0x47e   : > { %5729 = vmatmul.mubr.f32.gmra.mrb[218].mxu0 %v8409_v31  ;;  %3812 = vmatprep.mubr.f32.mxu1 %v8639_v13  ;;  %v6263_v31 = vpack.c.bf16 %v4197_v47, %v4196_v21  ;;  %v8681_v13 = vld [vmem:[#allocation3 + $0x189] sm:$0xff]  ;;  %v4166_v47 = vld [vmem:[#allocation3 + $0xf2] sm:$0xff] }
 0x47f   : > { %6258 = vmatpush1.bf16.msra.mxu0 %v6257_v28  ;;  %5731 = vmatprep.mubr.f32.mxu0 %v8412_v52  ;;  %v4198_v52 = vld [vmem:[#allocation12 + $0x380] sm:$0xff] }
 0x480   : > { %6259 = vmatprep.subr.bf16.mxu0 %v9575_v15  ;;  %v4163_v28 = vld [vmem:[#allocation3 + $0xca] sm:$0xff] }
 0x481   : > { %3813 = vmatmul.mubr.f32.gmra.mrb[14].mxu1 %v8643_v26  ;;  %v4207_v26 = vld [vmem:[#allocation12 + $0x3c8] sm:$0xff] }
 0x482   : > { %5732 = vmatmul.mubr.f32.gmra.mrb[220].mxu0 %v8416_v63  ;;  %3817 = vmatprep.mubr.f32.mxu1 %v8672_v51  ;;  %v6266_v63 = vpack.c.bf16 %v4199_v55, %v4198_v52  ;;  %v4120_v55 = vld [vmem:[#allocation3 + $0x49] sm:$0xff] }
 0x483   : > { %6261 = vmatpush1.bf16.msra.mxu0 %v6260_v35  ;;  %5734 = vmatprep.mubr.f32.mxu0 %v8419_v10  ;;  %v4200_v10 = vld [vmem:[#allocation12 + $0x390] sm:$0xff] }
 0x484   : > { %6262 = vmatprep.subr.bf16.mxu0 %v9575_v15  ;;  %v4119_v35 = vld [vmem:[#allocation3 + $0x39] sm:$0xff] }
 0x485   : > { %3818 = vmatmul.mubr.f32.gmra.mrb[16].mxu1 %v8678_v22 }
 0x486   : > { %5735 = vmatmul.mubr.f32.gmra.mrb[222].mxu0 %v8425_v39  ;;  %3822 = vmatprep.mubr.f32.mxu1 %v8681_v13  ;;  %v6269_v39 = vpack.c.bf16 %v4201_v61, %v4200_v10  ;;  %v4167_v10 = vld [vmem:[#allocation3 + $0xfa] sm:$0xff]  ;;  %v4168_v61 = vld [vmem:[#allocation3 + $0x10a] sm:$0xff] }
 0x487   : > { %6264 = vmatpush1.bf16.msra.mxu0 %v6263_v31  ;;  %5737 = vmatprep.mubr.f32.mxu0 %v8428_v18  ;;  %v4202_v18 = vld [vmem:[#allocation12 + $0x3a0] sm:$0xff]  ;;  %v4087_v31 = vld [vmem:[#allocation3 + $0x38] sm:$0xff] }
 0x488   : > { %6265 = vmatprep.subr.bf16.mxu0 %v9575_v15 }
 0x489   : > { %3823 = vmatmul.mubr.f32.gmra.mrb[18].mxu1 %v8687_v58 }
 0x48a   : > { %5738 = vmatmul.mubr.f32.gmra.mrb[224].mxu0 %v8437_v34  ;;  %5793 = vmatprep.mubr.f32.mxu1 %v4150_v14  ;;  %v6272_v34 = vpack.c.bf16 %v4203_v32, %v4202_v18  ;;  %v4088_v14 = vld [vmem:[#allocation3 + $0x48] sm:$0xff]  ;;  %v4121_v18 = vld [vmem:[#allocation3 + $0x51] sm:$0xff] }
 0x48b   : > { %6267 = vmatpush1.bf16.msra.mxu0 %v6266_v63  ;;  %5740 = vmatprep.mubr.f32.mxu0 %v8441_v20  ;;  %v4205_v20 = vld [vmem:[#allocation12 + $0x3b8] sm:$0xff] }
 0x48c   : > { %6268 = vmatprep.subr.bf16.mxu0 %v9575_v15  ;;  %v6275_v17 = vpack.c.bf16 %v4205_v20, %v4204_v0  ;;  %v4122_v20 = vld [vmem:[#allocation3 + $0x61] sm:$0xff] }
 0x48d   : > { %5794 = vmatmul.mubr.f32.vlgmr.msra.gmra.mrb[20].mxu1 %v4151_v44  ;;  %v4169_v44 = vld [vmem:[#allocation3 + $0x112] sm:$0xff] }
 0x48e   : > { %5741 = vmatmul.mubr.f32.gmra.mrb[226].mxu0 %v8450_v48  ;;  %5796 = vmatprep.mubr.f32.mxu1 %v4152_v50  ;;  %v4206_v48 = vld [vmem:[#allocation12 + $0x3c0] sm:$0xff]  ;;  %v4170_v50 = vld [vmem:[#allocation3 + $0x122] sm:$0xff] }
 0x48f   : > { %6270 = vmatpush1.bf16.msra.mxu0 %v6269_v39  ;;  %5743 = vmatprep.mubr.f32.mxu0 %v8454_v1  ;;  %v4155_v1 = vld [vmem:[#allocation3 + $0x6a] sm:$0xff]  ;;  %v6278_v53 = vpack.c.bf16 %v4207_v26, %v4206_v48  ;;  %v4090_v48 = vld [vmem:[#allocation3 + $0x60] sm:$0xff] }
 0x490   : > { %6271 = vmatprep.subr.bf16.mxu0 %v9575_v15 }
 0x491   : > { %5797 = vmatmul.mubr.f32.gmra.mrb[22].mxu1 %v4153_v9 }
 0x492   : > { %5744 = vmatmul.mubr.f32.gmra.mrb[228].mxu0 %v8463_v57  ;;  %5799 = vmatprep.mubr.f32.mxu1 %v4154_v37  ;;  %v4208_v57 = vld [vmem:[#allocation12 + $0x3d0] sm:$0xff]  ;;  %v4171_v37 = vld [vmem:[#allocation3 + $0x12a] sm:$0xff] }
 0x493   : > { %6273 = vmatpush1.bf16.msra.mxu0 %v6272_v34  ;;  %5746 = vmatprep.mubr.f32.mxu0 %v8467_v19  ;;  %v4157_v19 = vld [vmem:[#allocation3 + $0x82] sm:$0xff]  ;;  %v6281_v25 = vpack.c.bf16 %v4209_v62, %v4208_v57  ;;  %v4089_v34 = vld [vmem:[#allocation3 + $0x50] sm:$0xff] }
 0x494   : > { %6274 = vmatprep.subr.bf16.mxu0 %v9575_v15  ;;  %v4174_v57 = vld [vmem:[#allocation3 + $0x152] sm:$0xff]  ;;  %v4091_v62 = vld [vmem:[#allocation3 + $0x68] sm:$0xff] }
 0x495   : > { %5800 = vmatmul.mubr.f32.gmra.mrb[24].mxu1 %v4155_v1  ;;  %v4123_v1 = vld [vmem:[#allocation3 + $0x69] sm:$0xff] }
 0x496   : > { %5747 = vmatmul.mubr.f32.gmra.mrb[230].mxu0 %v8476_v8  ;;  %5802 = vmatprep.mubr.f32.mxu1 %v4156_v45  ;;  %v4210_v8 = vld [vmem:[#allocation12 + $0x3e0] sm:$0xff] }
 0x497   : > { %6276 = vmatpush1.bf16.msra.mxu0 %v6275_v17  ;;  %5749 = vmatprep.mubr.f32.mxu0 %v8480_v11  ;;  %v4159_v11 = vld [vmem:[#allocation3 + $0x9a] sm:$0xff]  ;;  %v6284_v29 = vpack.c.bf16 %v4211_v60, %v4210_v8 }
 0x498   : > { %6277 = vmatprep.subr.bf16.mxu0 %v9575_v15  ;;  %v4172_v17 = vld [vmem:[#allocation3 + $0x13a] sm:$0xff] }
 0x499   : > { %5803 = vmatmul.mubr.f32.gmra.mrb[26].mxu1 %v4157_v19  ;;  %v4175_v60 = vld [vmem:[#allocation3 + $0x15a] sm:$0xff] }
 0x49a   : > { %5750 = vmatmul.mubr.f32.gmra.mrb[232].mxu0 %v8489_v27  ;;  %5805 = vmatprep.mubr.f32.mxu1 %v4158_v54  ;;  %v8708_v27 = vld [vmem:[#allocation3 + $0x182] sm:$0xff]  ;;  %v4124_v54 = vld [vmem:[#allocation3 + $0x79] sm:$0xff] }
 0x49b   : > { %6279 = vmatpush1.bf16.msra.mxu0 %v6278_v53  ;;  %5752 = vmatprep.mubr.f32.mxu0 %v8493_v30  ;;  %v4212_v30 = vld [vmem:[#allocation12 + $0x3f0] sm:$0xff] }
 0x49c   : > { %6280 = vmatprep.subr.bf16.mxu0 %v9575_v15  ;;  %v6287_v42 = vpack.c.bf16 %v4213_v2, %v4212_v30  ;;  %v4173_v53 = vld [vmem:[#allocation3 + $0x142] sm:$0xff]  ;;  %v4092_v30 = vld [vmem:[#allocation3 + $0x78] sm:$0xff] }
 0x49d   : > { %5806 = vmatmul.mubr.f32.gmra.mrb[28].mxu1 %v4159_v11 }
 0x49e   : > { %5753 = vmatmul.mubr.f32.gmra.mrb[234].mxu0 %v8502_v23  ;;  %5808 = vmatprep.mubr.f32.mxu1 %v4160_v5  ;;  %v8712_v23 = vld [vmem:[#allocation3 + $0x18a] sm:$0xff] }
 0x49f   : > { %6282 = vmatpush1.bf16.msra.mxu0 %v6281_v25  ;;  %5755 = vmatprep.mubr.f32.mxu0 %v8506_v40 }
 0x4a0   : > { %6283 = vmatprep.subr.bf16.mxu0 %v9575_v15  ;;  %v8714_v40 = vpop.f32.mrb[180].mxu1 }
 0x4a1   : > { %v8717_v49 = vpop.f32.mrb[181].mxu1  ;;  %5809 = vmatmul.mubr.f32.gmra.mrb[30].mxu1 %v4161_v41  ;;  %v4125_v41 = vld [vmem:[#allocation3 + $0x81] sm:$0xff] }
 0x4a2   : > { %5756 = vmatmul.mubr.f32.gmra.mrb[236].mxu0 %v8516_v59  ;;  %5811 = vmatprep.mubr.f32.mxu1 %v4162_v46  ;;  %v4164_v59 = vld [vmem:[#allocation3 + $0xda] sm:$0xff] }
 0x4a3   : > { %6285 = vmatpush1.bf16.msra.mxu0 %v6284_v29  ;;  %5758 = vmatprep.mubr.f32.mxu0 %v8708_v27  ;;  %v4176_v29 = vld [vmem:[#allocation3 + $0x16a] sm:$0xff] }
 0x4a4   : > { %6286 = vmatprep.subr.bf16.mxu0 %v9575_v15  ;;  %v8720_v38 = vpop.f32.mrb[182].mxu1  ;;  %v4165_v15 = vld [vmem:[#allocation3 + $0xe2] sm:$0xff] }
 0x4a5   : > { %v8722_v21 = vpop.f32.mrb[183].mxu1  ;;  %5812 = vmatmul.mubr.f32.gmra.mrb[32].mxu1 %v4163_v28 }
 0x4a6   : > { %5759 = vmatmul.mubr.f32.gmra.mrb[238].mxu0 %v8712_v23  ;;  %5814 = vmatprep.mubr.f32.mxu1 %v4164_v59 }
 0x4a7   : > { %6288 = vmatpush1.bf16.msra.mxu0 %v6287_v42  ;;  %4294 = vmatprep.mubr.f32.mxu0 %v4118_v16  ;;  %v4177_v16 = vld [vmem:[#allocation3 + $0x172] sm:$0xff] }
 0x4a8   : > { %v8724_v52 = vpop.f32.mrb[184].mxu1 }
 0x4a9   : > { %v8726_v63 = vpop.f32.mrb[185].mxu1  ;;  %5815 = vmatmul.mubr.f32.gmra.mrb[34].mxu1 %v4165_v15 }
 0x4aa   : > { %4295 = vmatmul.mubr.f32.vlgmr.msra.gmra.mrb[240].mxu0 %v4086_v33  ;;  %5817 = vmatprep.mubr.f32.mxu1 %v4166_v47 }
 0x4ab   : > { %4299 = vmatprep.mubr.f32.mxu0 %v4119_v35  ;;  %v4126_v35 = vld [vmem:[#allocation3 + $0x91] sm:$0xff] }
 0x4ac   : > { %v8728_v39 = vpop.f32.mrb[186].mxu1 }
 0x4ad   : > { %v8730_v32 = vpop.f32.mrb[187].mxu1  ;;  %5818 = vmatmul.mubr.f32.gmra.mrb[36].mxu1 %v4167_v10  ;;  %v4094_v10 = vld [vmem:[#allocation3 + $0x90] sm:$0xff] }
 0x4ae   : > { %4300 = vmatmul.mubr.f32.gmra.mrb[242].mxu0 %v4087_v31  ;;  %5820 = vmatprep.mubr.f32.mxu1 %v4168_v61 }
 0x4af   : > { %4304 = vmatprep.mubr.f32.mxu0 %v4120_v55 }
 0x4b0   : > { %v8732_v0 = vpop.f32.mrb[188].mxu1 }
 0x4b1   : > { %v8734_v9 = vpop.f32.mrb[189].mxu1  ;;  %5821 = vmatmul.mubr.f32.gmra.mrb[38].mxu1 %v4169_v44  ;;  %v4181_v44 = vld [vmem:[#allocation3 + $0x1a2] sm:$0xff] }
 0x4b2   : > { %4305 = vmatmul.mubr.f32.gmra.mrb[244].mxu0 %v4088_v14  ;;  %5823 = vmatprep.mubr.f32.mxu1 %v4170_v50 }
 0x4b3   : > { %4309 = vmatprep.mubr.f32.mxu0 %v4121_v18 }
 0x4b4   : > { %v8736_v26 = vpop.f32.mrb[190].mxu1 }
 0x4b5   : > { %v8738_v45 = vpop.f32.mrb[191].mxu1  ;;  %5824 = vmatmul.mubr.f32.gmra.mrb[40].mxu1 %v4171_v37 }
 0x4b6   : > { %4310 = vmatmul.mubr.f32.gmra.mrb[246].mxu0 %v4089_v34  ;;  %5826 = vmatprep.mubr.f32.mxu1 %v4172_v17 }
 0x4b7   : > { %4314 = vmatprep.mubr.f32.mxu0 %v4122_v20 }
 0x4b8   : > { %v8740_v19 = vpop.f32.mrb[192].mxu1 }
 0x4b9   : > { %v8742_v25 = vpop.f32.mrb[193].mxu1  ;;  %5827 = vmatmul.mubr.f32.gmra.mrb[42].mxu1 %v4173_v53 }
 0x4ba   : > { %4315 = vmatmul.mubr.f32.gmra.mrb[248].mxu0 %v4090_v48  ;;  %5829 = vmatprep.mubr.f32.mxu1 %v4174_v57 }
 0x4bb   : > { %4319 = vmatprep.mubr.f32.mxu0 %v4123_v1 }
 0x4bc   : > { %v8747_v2 = vpop.f32.mrb[194].mxu1 }
 0x4bd   : > { %v3036_v8 = vpop.f32.mrb[144].mxu0  ;;  %v8749_v46 = vpop.f32.mrb[195].mxu1  ;;  %5830 = vmatmul.mubr.f32.gmra.mrb[44].mxu1 %v4175_v60 }
 0x4be   : > { %v3038_v11 = vpop.f32.mrb[145].mxu0  ;;  %v8745_v5 = vadd.f32 %v8717_v49, %v3036_v8  ;;  %4320 = vmatmul.mubr.f32.gmra.mrb[250].mxu0 %v4091_v62  ;;  %5832 = vmatprep.mubr.f32.mxu1 %v4176_v29  ;;  %v4093_v49 = vld [vmem:[#allocation3 + $0x80] sm:$0xff] }
 0x4bf   : > { %4324 = vmatprep.mubr.f32.mxu0 %v4124_v54 }
 0x4c0   : > { %v8754_v33 = vpop.f32.mrb[196].mxu1 }
 0x4c1   : > { %v3041_v42 = vpop.f32.mrb[146].mxu0  ;;  %v8756_v15 = vpop.f32.mrb[197].mxu1  ;;  %5833 = vmatmul.mubr.f32.gmra.mrb[46].mxu1 %v4177_v16  ;;  %v9582_v16 = vld [vmem:[#allocation34_spill] sm:$0xff] }
 0x4c2   : > { %v8752_v28 = vadd.f32 %v8714_v40, %v3041_v42  ;;  %v3043_v59 = vpop.f32.mrb[147].mxu0  ;;  %4325 = vmatmul.mubr.f32.gmra.mrb[252].mxu0 %v4092_v30  ;;  %5835 = vmatprep.mubr.f32.mxu1 %v8708_v27  ;;  %v4180_v40 = vld [vmem:[#allocation3 + $0x19a] sm:$0xff] }
 0x4c3   : > { %4329 = vmatprep.mubr.f32.mxu0 %v4125_v41  ;;  %v9581_v30 = vld [vmem:[#allocation35_spill] sm:$0xff]  ;;  %v9583_v59 = vld [vmem:[#allocation36_spill] sm:$0xff] }
 0x4c4   : > { %v8762_v61 = vpop.f32.mrb[198].mxu1 }
 0x4c5   : > { %v3046_v47 = vpop.f32.mrb[148].mxu0  ;;  %v8764_v14 = vpop.f32.mrb[199].mxu1  ;;  %5836 = vmatmul.mubr.f32.gmra.mrb[48].mxu1 %v8712_v23 }
 0x4c6   : > { %v3048_v31 = vpop.f32.mrb[149].mxu0  ;;  %v8760_v55 = vadd.f32 %v8722_v21, %v3046_v47  ;;  %4330 = vmatmul.mubr.f32.gmra.mrb[254].mxu0 %v4093_v49  ;;  %5838 = vmatprep.mubr.f32.mxu1 %v4180_v40  ;;  %v4095_v21 = vld [vmem:[#allocation3 + $0x98] sm:$0xff]  ;;  %v9584_v40 = vld [vmem:[#allocation37_spill] sm:$0xff] }
 0x4c7   : > { %4334 = vmatprep.mubr.f32.mxu0 %v4126_v35 }
 0x4c8   : > { %v8771_v34 = vpop.f32.mrb[200].mxu1 }
 0x4c9   : > { %v3051_v18 = vpop.f32.mrb[150].mxu0  ;;  %v8773_v20 = vpop.f32.mrb[201].mxu1  ;;  %5839 = vmatmul.mubr.f32.gmra.mrb[50].mxu1 %v4181_v44 }
 0x4ca   : > { %v8768_v50 = vadd.f32 %v8720_v38, %v3051_v18  ;;  %v3053_v27 = vpop.f32.mrb[151].mxu0  ;;  %4335 = vmatmul.mubr.f32.gmra.mrb[0].mxu0 %v4094_v10  ;;  %v4102_v10 = vld [vmem:[#allocation3 + $0xf0] sm:$0xff] }
 0x4cb   : > { %4339 = vmatprep.mubr.f32.mxu0 %v8547_v24 }
 0x4cc   : > { %v8779_v38 = vpop.f32.mrb[202].mxu1 }
 0x4cd   : > { %v3056_v37 = vpop.f32.mrb[152].mxu0  ;;  %v8781_v48 = vpop.f32.mrb[203].mxu1 }
 0x4ce   : > { %v3058_v17 = vpop.f32.mrb[153].mxu0  ;;  %v8776_v23 = vadd.f32 %v8726_v63, %v3056_v37  ;;  %4340 = vmatmul.mubr.f32.gmra.mrb[2].mxu0 %v4095_v21  ;;  %v9585_v37 = vld [vmem:[#allocation39_spill] sm:$0xff] }
 0x4cf   : > { %4344 = vmatprep.mubr.f32.mxu0 %v8555_v36  ;;  %v4103_v17 = vld [vmem:[#allocation3 + $0xf8] sm:$0xff] }
 0x4d0   : > { %v8788_v57 = vpop.f32.mrb[204].mxu1 }
 0x4d1   : > { %v3061_v1 = vpop.f32.mrb[154].mxu0  ;;  %v8790_v63 = vpop.f32.mrb[205].mxu1 }
 0x4d2   : > { %v8784_v24 = vadd.f32 %v8724_v52, %v3061_v1  ;;  %v3063_v53 = vpop.f32.mrb[155].mxu0  ;;  %4345 = vmatmul.mubr.f32.gmra.mrb[4].mxu0 %v8561_v43 }
 0x4d3   : > { %4349 = vmatprep.mubr.f32.mxu0 %v8563_v12 }
 0x4d4   : > { %v8797_v52 = vpop.f32.mrb[206].mxu1 }
 0x4d5   : > { %v3066_v62 = vpop.f32.mrb[156].mxu0  ;;  %v8799_v8 = vpop.f32.mrb[207].mxu1 }
 0x4d6   : > { %v3068_v54 = vpop.f32.mrb[157].mxu0  ;;  %v8793_v36 = vadd.f32 %v8730_v32, %v3066_v62  ;;  %4350 = vmatmul.mubr.f32.gmra.mrb[6].mxu0 %v8569_v6 }
 0x4d7   : > { %4354 = vmatprep.mubr.f32.mxu0 %v8571_v7 }
 0x4d8   : > { %v8806_v11 = vpop.f32.mrb[208].mxu1 }
 0x4d9   : > { %v3071_v43 = vpop.f32.mrb[158].mxu0  ;;  %v8808_v32 = vpop.f32.mrb[209].mxu1 }
 0x4da   : > { %v8802_v12 = vadd.f32 %v8728_v39, %v3071_v43  ;;  %v3073_v60 = vpop.f32.mrb[159].mxu0  ;;  %4355 = vmatmul.mubr.f32.gmra.mrb[8].mxu0 %v8577_v56 }
 0x4db   : > { %4359 = vmatprep.mubr.f32.mxu0 %v8579_v4  ;;  %v4104_v60 = vld [vmem:[#allocation3 + $0x108] sm:$0xff] }
 0x4dc   : > { %v8815_v39 = vpop.f32.mrb[210].mxu1 }
 0x4dd   : > { %v3076_v6 = vpop.f32.mrb[160].mxu0  ;;  %v8817_v41 = vpop.f32.mrb[211].mxu1 }
 0x4de   : > { %v3078_v29 = vpop.f32.mrb[161].mxu0  ;;  %v8811_v7 = vadd.f32 %v8734_v9, %v3076_v6  ;;  %4360 = vmatmul.mubr.f32.gmra.mrb[10].mxu0 %v8585_v3  ;;  %v4134_v9 = vld [vmem:[#allocation3 + $0xf1] sm:$0xff] }
 0x4df   : > { %4364 = vmatprep.mubr.f32.mxu0 %v9581_v30 }
 0x4e0   : > { %v8824_v49 = vpop.f32.mrb[212].mxu1 }
 0x4e1   : > { %v3081_v56 = vpop.f32.mrb[162].mxu0  ;;  %v3671_v35 = vpop.f32.mrb[213].mxu1 }
 0x4e2   : > { %v8820_v4 = vadd.f32 %v8732_v0, %v3081_v56  ;;  %v3083_v42 = vpop.f32.mrb[163].mxu0  ;;  %4365 = vmatmul.mubr.f32.gmra.mrb[12].mxu0 %v9582_v16  ;;  %v4105_v16 = vld [vmem:[#allocation3 + $0x110] sm:$0xff] }
 0x4e3   : > { %4369 = vmatprep.mubr.f32.mxu0 %v9583_v59 }
 0x4e4   : > { %v8830_v0 = vpop.f32.mrb[214].mxu1 }
 0x4e5   : > { %v3086_v3 = vpop.f32.mrb[164].mxu0  ;;  %v3676_v18 = vpop.f32.mrb[215].mxu1 }
 0x4e6   : > { %v3088_v47 = vpop.f32.mrb[165].mxu0  ;;  %v8827_v31 = vadd.f32 %v8738_v45, %v3086_v3  ;;  %4370 = vmatmul.mubr.f32.gmra.mrb[14].mxu0 %v9584_v40  ;;  %v4136_v45 = vld [vmem:[#allocation3 + $0x109] sm:$0xff]  ;;  %v4106_v40 = vld [vmem:[#allocation3 + $0x120] sm:$0xff] }
 0x4e7   : > { %4374 = vmatprep.mubr.f32.mxu0 %v4134_v9  ;;  %v4138_v9 = vld [vmem:[#allocation3 + $0x121] sm:$0xff] }
 0x4e8   : > { %v8836_v1 = vpop.f32.mrb[216].mxu1 }
 0x4e9   : > { %v3091_v44 = vpop.f32.mrb[166].mxu0  ;;  %v3681_v53 = vpop.f32.mrb[217].mxu1 }
 0x4ea   : > { %v8833_v27 = vadd.f32 %v8736_v26, %v3091_v44  ;;  %v3093_v21 = vpop.f32.mrb[167].mxu0  ;;  %4375 = vmatmul.mubr.f32.gmra.mrb[16].mxu0 %v4102_v10  ;;  %v4137_v26 = vld [vmem:[#allocation3 + $0x111] sm:$0xff]  ;;  %v4140_v53 = vld [vmem:[#allocation3 + $0x139] sm:$0xff] }
 0x4eb   : > { %4379 = vmatprep.mubr.f32.mxu0 %v9585_v37 }
 0x4ec   : > { %v8841_v6 = vpop.f32.mrb[218].mxu1 }
 0x4ed   : > { %v3096_v62 = vpop.f32.mrb[168].mxu0  ;;  %v3686_v29 = vpop.f32.mrb[219].mxu1 }
 0x4ee   : > { %v3098_v54 = vpop.f32.mrb[169].mxu0  ;;  %v8839_v43 = vadd.f32 %v8742_v25, %v3096_v62  ;;  %4380 = vmatmul.mubr.f32.gmra.mrb[18].mxu0 %v4103_v17  ;;  %v4107_v17 = vld [vmem:[#allocation3 + $0x128] sm:$0xff] }
 0x4ef   : > { %4384 = vmatprep.mubr.f32.mxu0 %v4136_v45 }
 0x4f0   : > { %v8846_v59 = vpop.f32.mrb[220].mxu1 }
 0x4f1   : > { %v3101_v30 = vpop.f32.mrb[170].mxu0  ;;  %v3691_v25 = vpop.f32.mrb[221].mxu1 }
 0x4f2   : > { %v8844_v56 = vadd.f32 %v8740_v19, %v3101_v30  ;;  %v3103_v42 = vpop.f32.mrb[171].mxu0  ;;  %4385 = vmatmul.mubr.f32.gmra.mrb[20].mxu0 %v4104_v60  ;;  %v4139_v19 = vld [vmem:[#allocation3 + $0x129] sm:$0xff]  ;;  %v4109_v25 = vld [vmem:[#allocation3 + $0x140] sm:$0xff] }
 0x4f3   : > { %4389 = vmatprep.mubr.f32.mxu0 %v4137_v26  ;;  %v4108_v26 = vld [vmem:[#allocation3 + $0x138] sm:$0xff] }
 0x4f4   : > { %v8851_v10 = vpop.f32.mrb[222].mxu1 }
 0x4f5   : > { %v3106_v35 = vpop.f32.mrb[172].mxu0  ;;  %v3696_v18 = vpop.f32.mrb[223].mxu1 }
 0x4f6   : > { %v3108_v3 = vpop.f32.mrb[173].mxu0  ;;  %v8849_v47 = vadd.f32 %v8749_v46, %v3106_v35  ;;  %4390 = vmatmul.mubr.f32.gmra.mrb[22].mxu0 %v4105_v16 }
 0x4f7   : > { %4394 = vmatprep.mubr.f32.mxu0 %v4138_v9  ;;  %v4142_v3 = vld [vmem:[#allocation3 + $0x151] sm:$0xff] }
 0x4f8   : > { %v8856_v45 = vpop.f32.mrb[224].mxu1 }
 0x4f9   : > { %v3111_v44 = vpop.f32.mrb[174].mxu0  ;;  %v3701_v46 = vpop.f32.mrb[225].mxu1 }
 0x4fa   : > { %v8854_v21 = vadd.f32 %v8747_v2, %v3111_v44  ;;  %v3113_v37 = vpop.f32.mrb[175].mxu0  ;;  %4395 = vmatmul.mubr.f32.gmra.mrb[24].mxu0 %v4106_v40  ;;  %v4141_v2 = vld [vmem:[#allocation3 + $0x141] sm:$0xff]  ;;  %v4110_v44 = vld [vmem:[#allocation3 + $0x150] sm:$0xff] }
 0x4fb   : > { %4399 = vmatprep.mubr.f32.mxu0 %v4139_v19 }
 0x4fc   : > { %v8861_v29 = vpop.f32.mrb[226].mxu1 }
 0x4fd   : > { %v3116_v62 = vpop.f32.mrb[176].mxu0  ;;  %v3706_v30 = vpop.f32.mrb[227].mxu1 }
 0x4fe   : > { %v3118_v54 = vpop.f32.mrb[177].mxu0  ;;  %v8859_v60 = vadd.f32 %v8756_v15, %v3116_v62  ;;  %4400 = vmatmul.mubr.f32.gmra.mrb[26].mxu0 %v4107_v17 }
 0x4ff   : > { %4404 = vmatprep.mubr.f32.mxu0 %v4140_v53  ;;  %v4111_v54 = vld [vmem:[#allocation3 + $0x158] sm:$0xff] }
 0x500   : > { %v8866_v35 = vpop.f32.mrb[228].mxu1 }
 0x501   : > { %v3121_v42 = vpop.f32.mrb[178].mxu0  ;;  %v3711_v15 = vpop.f32.mrb[229].mxu1 }
 0x502   : > { %v8864_v16 = vadd.f32 %v8754_v33, %v3121_v42  ;;  %v3123_v9 = vpop.f32.mrb[179].mxu0  ;;  %4405 = vmatmul.mubr.f32.gmra.mrb[28].mxu0 %v4108_v26  ;;  %v4143_v33 = vld [vmem:[#allocation3 + $0x159] sm:$0xff] }
 0x503   : > { %4409 = vmatprep.mubr.f32.mxu0 %v4141_v2  ;;  %v4144_v2 = vld [vmem:[#allocation3 + $0x169] sm:$0xff] }
 0x504   : > { %v8871_v37 = vpop.f32.mrb[230].mxu1 }
 0x505   : > { %v3126_v40 = vpop.f32.mrb[180].mxu0  ;;  %v3716_v17 = vpop.f32.mrb[231].mxu1 }
 0x506   : > { %v3128_v19 = vpop.f32.mrb[181].mxu0  ;;  %v8869_v18 = vadd.f32 %v8764_v14, %v3126_v40  ;;  %4410 = vmatmul.mubr.f32.gmra.mrb[30].mxu0 %v4109_v25  ;;  %v4112_v25 = vld [vmem:[#allocation3 + $0x168] sm:$0xff] }
 0x507   : > { %4414 = vmatprep.mubr.f32.mxu0 %v4142_v3 }
 0x508   : > { %v8876_v26 = vpop.f32.mrb[232].mxu1 }
 0x509   : > { %v3131_v53 = vpop.f32.mrb[182].mxu0  ;;  %v3721_v14 = vpop.f32.mrb[233].mxu1 }
 0x50a   : > { %v8874_v46 = vadd.f32 %v8762_v61, %v3131_v53  ;;  %v3133_v62 = vpop.f32.mrb[183].mxu0  ;;  %4415 = vmatmul.mubr.f32.gmra.mrb[32].mxu0 %v4110_v44  ;;  %v4145_v61 = vld [vmem:[#allocation3 + $0x171] sm:$0xff] }
 0x50b   : > { %4419 = vmatprep.mubr.f32.mxu0 %v4143_v33  ;;  %v4113_v33 = vld [vmem:[#allocation3 + $0x170] sm:$0xff] }
 0x50c   : > { %v8881_v3 = vpop.f32.mrb[234].mxu1 }
 0x50d   : > { %v3136_v30 = vpop.f32.mrb[184].mxu0  ;;  %v3726_v15 = vpop.f32.mrb[235].mxu1 }
 0x50e   : > { %v3138_v42 = vpop.f32.mrb[185].mxu0  ;;  %v8879_v9 = vadd.f32 %v8773_v20, %v3136_v30  ;;  %4420 = vmatmul.mubr.f32.gmra.mrb[34].mxu0 %v4111_v54 }
 0x50f   : > { %4424 = vmatprep.mubr.f32.mxu0 %v4144_v2 }
 0x510   : > { %v8886_v17 = vpop.f32.mrb[236].mxu1 }
 0x511   : > { %v3141_v40 = vpop.f32.mrb[186].mxu0  ;;  %v3731_v53 = vpop.f32.mrb[237].mxu1 }
 0x512   : > { %v8884_v19 = vadd.f32 %v8771_v34, %v3141_v40  ;;  %v3143_v44 = vpop.f32.mrb[187].mxu0  ;;  %4425 = vmatmul.mubr.f32.gmra.mrb[36].mxu0 %v4112_v25 }
 0x513   : > { %4429 = vmatprep.mubr.f32.mxu0 %v4145_v61  ;;  %v4148_v61 = vld [vmem:[#allocation3 + $0x199] sm:$0xff] }
 0x514   : > { %v8892_v2 = vpop.f32.mrb[238].mxu1  ;;  %v4116_v44 = vld [vmem:[#allocation3 + $0x198] sm:$0xff] }
 0x515   : > { %v3146_v20 = vpop.f32.mrb[188].mxu0  ;;  %v3736_v14 = vpop.f32.mrb[239].mxu1 }
 0x516   : > { %v3148_v62 = vpop.f32.mrb[189].mxu0  ;;  %v8889_v54 = vadd.f32 %v8781_v48, %v3146_v20  ;;  %4430 = vmatmul.mubr.f32.gmra.mrb[38].mxu0 %v4113_v33  ;;  %v4149_v33 = vld [vmem:[#allocation3 + $0x1a1] sm:$0xff] }
 0x517   : > { %4434 = vmatprep.mubr.f32.mxu0 %v8672_v51  ;;  %v4117_v62 = vld [vmem:[#allocation3 + $0x1a0] sm:$0xff] }
 0x518   : > { %v8899_v25 = vpop.f32.mrb[240].mxu1 }
 0x519   : > { %v3151_v34 = vpop.f32.mrb[190].mxu0  ;;  %v3741_v48 = vpop.f32.mrb[241].mxu1 }
 0x51a   : > { %v8895_v30 = vadd.f32 %v8779_v38, %v3151_v34  ;;  %v3153_v42 = vpop.f32.mrb[191].mxu0  ;;  %4435 = vmatmul.mubr.f32.gmra.mrb[40].mxu0 %v8678_v22 }
 0x51b   : > { %4439 = vmatprep.mubr.f32.mxu0 %v8681_v13 }
 0x51c   : > { %v8905_v38 = vpop.f32.mrb[242].mxu1 }
 0x51d   : > { %v3156_v15 = vpop.f32.mrb[192].mxu0  ;;  %v3746_v53 = vpop.f32.mrb[243].mxu1 }
 0x51e   : > { %v3158_v40 = vpop.f32.mrb[193].mxu0  ;;  %v8902_v51 = vadd.f32 %v8790_v63, %v3156_v15  ;;  %4440 = vmatmul.mubr.f32.gmra.mrb[42].mxu0 %v8687_v58 }
 0x51f   : > { %4444 = vmatprep.mubr.f32.mxu0 %v4148_v61 }
 0x520   : > { %v8910_v14 = vpop.f32.mrb[244].mxu1 }
 0x521   : > { %v3161_v22 = vpop.f32.mrb[194].mxu0  ;;  %v3751_v63 = vpop.f32.mrb[245].mxu1 }
 0x522   : > { %v8908_v13 = vadd.f32 %v8788_v57, %v3161_v22  ;;  %v3163_v20 = vpop.f32.mrb[195].mxu0  ;;  %4445 = vmatmul.mubr.f32.gmra.mrb[44].mxu0 %v4116_v44 }
 0x523   : > { %4449 = vmatprep.mubr.f32.mxu0 %v4149_v33 }
 0x524   : > { %v8915_v61 = vpop.f32.mrb[246].mxu1 }
 0x525   : > { %v3166_v34 = vpop.f32.mrb[196].mxu0  ;;  %v3756_v48 = vpop.f32.mrb[247].mxu1 }
 0x526   : > { %v3168_v42 = vpop.f32.mrb[197].mxu0  ;;  %v8913_v58 = vadd.f32 %v8799_v8, %v3166_v34  ;;  %4450 = vmatmul.mubr.f32.gmra.mrb[46].mxu0 %v4117_v62 }
 0x528   : > { %9586 = vst [vmem:[#allocation38_spill] sm:$0xff] %v8913_v58  ;;  %v8920_v44 = vpop.f32.mrb[248].mxu1 }
 0x529   : > { %v3171_v15 = vpop.f32.mrb[198].mxu0  ;;  %v3761_v33 = vpop.f32.mrb[249].mxu1 }
 0x52a   : > { %v8918_v57 = vadd.f32 %v8797_v52, %v3171_v15  ;;  %v3173_v40 = vpop.f32.mrb[199].mxu0 }
 0x52c   : > { %v8925_v63 = vpop.f32.mrb[250].mxu1 }
 0x52d   : > { %v3176_v53 = vpop.f32.mrb[200].mxu0  ;;  %v3766_v8 = vpop.f32.mrb[251].mxu1 }
 0x52e   : > { %v3178_v22 = vpop.f32.mrb[201].mxu0  ;;  %v8923_v20 = vadd.f32 %v8808_v32, %v3176_v53 }
 0x530   : > { %9587 = vst [vmem:[#allocation41_spill] sm:$0xff] %v8923_v20  ;;  %v8930_v48 = vpop.f32.mrb[252].mxu1 }
 0x531   : > { %v3181_v62 = vpop.f32.mrb[202].mxu0  ;;  %v3771_v52 = vpop.f32.mrb[253].mxu1 }
 0x532   : > { %v8928_v34 = vadd.f32 %v8806_v11, %v3181_v62  ;;  %v3183_v42 = vpop.f32.mrb[203].mxu0  ;;  %v8945_v11 = vld [vmem:[%s9590_s1] ss:$0 sm:$0xff] }
 0x534   : > { %v8935_v22 = vpop.f32.mrb[254].mxu1 }
 0x535   : > { %v3186_v15 = vpop.f32.mrb[204].mxu0  ;;  %v3776_v32 = vpop.f32.mrb[255].mxu1 }
 0x536   : > { %v3188_v40 = vpop.f32.mrb[205].mxu0  ;;  %v8933_v33 = vadd.f32 %v8817_v41, %v3186_v15  ;;  %v3427_v41 = vadd.f32 %v8945_v11, %v8752_v28 }
 0x538   : > { %9588 = vst [vmem:[#allocation40_spill] sm:$0xff] %v8933_v33  ;;  %v8940_v58 = vpop.f32.mrb[0].mxu1 }
 0x539   : > { %v3191_v53 = vpop.f32.mrb[206].mxu0  ;;  %v3781_v62 = vpop.f32.mrb[1].mxu1 }
 0x53a   : > { %v8938_v20 = vadd.f32 %v8815_v39, %v3191_v53  ;;  %v3193_v8 = vpop.f32.mrb[207].mxu0  ;;  %v3426_v39 = vadd.f32 %v8945_v11, %v8745_v5 }
 0x53c   : > { %9589 = vst [vmem:[#allocation43_spill] sm:$0xff] %v8938_v20  ;;  %v8953_v32 = vpop.f32.mrb[2].mxu1  ;;  %v3429_v20 = vadd.f32 %v8945_v11, %v8768_v50 }
 0x53d   : > { %v5715_v42 = vpop.f32.mrb[208].mxu0  ;;  %v3786_v8 = vpop.f32.mrb[3].mxu1 }
 0x53e   : > { %v3900_v52 = vadd.f32 %v5715_v42, %v8830_v0  ;;  %v3894_v15 = vpop.f32.mrb[209].mxu0  ;;  %v3428_v42 = vadd.f32 %v8945_v11, %v8760_v55  ;;  %v3430_v8 = vadd.f32 %v8945_v11, %v8776_v23 }
 0x53f   : > { %v3895_v40 = vadd.f32 %v3894_v15, %v8824_v49 }
 0x540   : > { %v8955_v53 = vadd.f32 %v3900_v52, %v3427_v41  ;;  %v8965_v49 = vpop.f32.mrb[4].mxu1 }
 0x541   : > { %v8957_v33 = vadd.f32 %v3895_v40, %v3426_v39  ;;  %v5718_v62 = vpop.f32.mrb[210].mxu0  ;;  %v3791_v41 = vpop.f32.mrb[5].mxu1  ;;  %v3431_v40 = vadd.f32 %v8945_v11, %v8784_v24 }
 0x542   : > { %v3910_v28 = vadd.f32 %v5718_v62, %v8841_v6  ;;  %v3904_v0 = vpop.f32.mrb[211].mxu0 }
 0x543   : > { %v3905_v5 = vadd.f32 %v3904_v0, %v8836_v1 }
 0x544   : > { %v8967_v15 = vadd.f32 %v3910_v28, %v3429_v20  ;;  %v8977_v1 = vpop.f32.mrb[6].mxu1 }
 0x545   : > { %v8969_v52 = vadd.f32 %v3905_v5, %v3428_v42  ;;  %v5721_v39 = vpop.f32.mrb[212].mxu0  ;;  %v3796_v20 = vpop.f32.mrb[7].mxu1  ;;  %v3433_v42 = vadd.f32 %v8945_v11, %v8802_v12  ;;  %v3432_v5 = vadd.f32 %v8945_v11, %v8793_v36 }
 0x546   : > { %v3920_v50 = vadd.f32 %v5721_v39, %v8851_v10  ;;  %v3914_v6 = vpop.f32.mrb[213].mxu0 }
 0x547   : > { %v3915_v55 = vadd.f32 %v3914_v6, %v8846_v59  ;;  %v3435_v6 = vadd.f32 %v8945_v11, %v8820_v4 }
 0x548   : > { %v8979_v62 = vadd.f32 %v3920_v50, %v3431_v40  ;;  %v8989_v59 = vpop.f32.mrb[8].mxu1 }
 0x549   : > { %v8981_v28 = vadd.f32 %v3915_v55, %v3430_v8  ;;  %v5724_v0 = vpop.f32.mrb[214].mxu0  ;;  %v3801_v39 = vpop.f32.mrb[9].mxu1  ;;  %v3434_v8 = vadd.f32 %v8945_v11, %v8811_v7 }
 0x54a   : > { %v3930_v24 = vadd.f32 %v5724_v0, %v8861_v29  ;;  %v3924_v10 = vpop.f32.mrb[215].mxu0 }
 0x54b   : > { %v3925_v23 = vadd.f32 %v3924_v10, %v8856_v45  ;;  %v3436_v10 = vadd.f32 %v8945_v11, %v8827_v31 }
 0x54c   : > { %v8991_v41 = vadd.f32 %v3930_v24, %v3433_v42  ;;  %v9001_v45 = vpop.f32.mrb[10].mxu1  ;;  %v3437_v24 = vadd.f32 %v8945_v11, %v8833_v27 }
 0x54d   : > { %v8993_v40 = vadd.f32 %v3925_v23, %v3432_v5  ;;  %v5727_v50 = vpop.f32.mrb[216].mxu0  ;;  %v3806_v20 = vpop.f32.mrb[11].mxu1 }
 0x54e   : > { %v3940_v12 = vadd.f32 %v5727_v50, %v8871_v37  ;;  %v3934_v29 = vpop.f32.mrb[217].mxu0 }
 0x54f   : > { %v3935_v36 = vadd.f32 %v3934_v29, %v8866_v35 }
 0x550   : > { %v9003_v55 = vadd.f32 %v3940_v12, %v3435_v6  ;;  %v9013_v35 = vpop.f32.mrb[12].mxu1  ;;  %v3439_v6 = vadd.f32 %v8945_v11, %v8844_v56  ;;  %v3438_v12 = vadd.f32 %v8945_v11, %v8839_v43 }
 0x551   : > { %v9005_v0 = vadd.f32 %v3935_v36, %v3434_v8  ;;  %v5730_v42 = vpop.f32.mrb[218].mxu0  ;;  %v3811_v23 = vpop.f32.mrb[13].mxu1 }
 0x552   : > { %v3950_v4 = vadd.f32 %v5730_v42, %v8881_v3  ;;  %v3944_v37 = vpop.f32.mrb[219].mxu0  ;;  %v3441_v42 = vadd.f32 %v8945_v11, %v8854_v21  ;;  %v3443_v23 = vadd.f32 %v8945_v11, %v8864_v16 }
 0x553   : > { %v3945_v7 = vadd.f32 %v3944_v37, %v8876_v26 }
 0x554   : > { %v9015_v5 = vadd.f32 %v3950_v4, %v3437_v24  ;;  %v9025_v26 = vpop.f32.mrb[14].mxu1  ;;  %v3440_v24 = vadd.f32 %v8945_v11, %v8849_v47 }
 0x555   : > { %v9017_v39 = vadd.f32 %v3945_v7, %v3436_v10  ;;  %v5733_v50 = vpop.f32.mrb[220].mxu0  ;;  %v3816_v8 = vpop.f32.mrb[15].mxu1 }
 0x556   : > { %v3960_v27 = vadd.f32 %v5733_v50, %v8892_v2  ;;  %v3954_v3 = vpop.f32.mrb[221].mxu0  ;;  %v3442_v50 = vadd.f32 %v8945_v11, %v8859_v60  ;;  %v3444_v8 = vadd.f32 %v8945_v11, %v8869_v18  ;;  %v3446_v18 = vadd.f32 %v8945_v11, %v8879_v9 }
 0x557   : > { %v3955_v31 = vadd.f32 %v3954_v3, %v8886_v17  ;;  %v3448_v9 = vadd.f32 %v8945_v11, %v8889_v54  ;;  %v3450_v54 = vadd.f32 %v8945_v11, %v8902_v51 }
 0x558   : > { %v9027_v29 = vadd.f32 %v3960_v27, %v3439_v6  ;;  %v9037_v17 = vpop.f32.mrb[16].mxu1 }
 0x559   : > { %v9029_v36 = vadd.f32 %v3955_v31, %v3438_v12  ;;  %v5736_v20 = vpop.f32.mrb[222].mxu0  ;;  %v3821_v37 = vpop.f32.mrb[17].mxu1  ;;  %v3445_v31 = vadd.f32 %v8945_v11, %v8874_v46  ;;  %v3447_v46 = vadd.f32 %v8945_v11, %v8884_v19  ;;  %v3449_v19 = vadd.f32 %v8945_v11, %v8895_v30 }
 0x55a   : > { %v3970_v56 = vadd.f32 %v5736_v20, %v8905_v38  ;;  %v3964_v2 = vpop.f32.mrb[223].mxu0  ;;  %v3451_v30 = vadd.f32 %v8945_v11, %v8908_v13  ;;  %v3453_v13 = vadd.f32 %v8945_v11, %v8918_v57  ;;  %v3455_v57 = vadd.f32 %v8945_v11, %v8928_v34 }
 0x55b   : > { %v3965_v43 = vadd.f32 %v3964_v2, %v8899_v25 }
 0x55c   : > { %v9039_v4 = vadd.f32 %v3970_v56, %v3441_v42  ;;  %v9049_v25 = vpop.f32.mrb[18].mxu1 }
 0x55d   : > { %v9041_v10 = vadd.f32 %v3965_v43, %v3440_v24  ;;  %v5739_v7 = vpop.f32.mrb[224].mxu0  ;;  %v3826_v27 = vpop.f32.mrb[19].mxu1 }
 0x55e   : > { %v3980_v21 = vadd.f32 %v5739_v7, %v8915_v61  ;;  %v3974_v38 = vpop.f32.mrb[225].mxu0 }
 0x55f   : > { %v3975_v47 = vadd.f32 %v3974_v38, %v8910_v14 }
 0x560   : > { %v9051_v6 = vadd.f32 %v3980_v21, %v3443_v23  ;;  %v9061_v14 = vpop.f32.mrb[20].mxu1 }
 0x561   : > { %v9053_v3 = vadd.f32 %v3975_v47, %v3442_v50  ;;  %v5742_v12 = vpop.f32.mrb[226].mxu0  ;;  %v9065_v42 = vpop.f32.mrb[21].mxu1 }
 0x562   : > { %v3990_v16 = vadd.f32 %v5742_v12, %v8925_v63  ;;  %v3984_v61 = vpop.f32.mrb[227].mxu0 }
 0x563   : > { %v3985_v60 = vadd.f32 %v3984_v61, %v8920_v44 }
 0x564   : > { %v9063_v20 = vadd.f32 %v3990_v16, %v3445_v31  ;;  %v9075_v43 = vpop.f32.mrb[22].mxu1 }
 0x565   : > { %v9067_v56 = vadd.f32 %v3985_v60, %v3444_v8  ;;  %v5745_v2 = vpop.f32.mrb[228].mxu0  ;;  %v9079_v7 = vpop.f32.mrb[23].mxu1 }
 0x566   : > { %v4000_v63 = vadd.f32 %v5745_v2, %v8935_v22  ;;  %v3994_v24 = vpop.f32.mrb[229].mxu0 }
 0x567   : > { %v3995_v44 = vadd.f32 %v3994_v24, %v8930_v48  ;;  %v9591_v24 = vld [vmem:[#allocation38_spill] sm:$0xff] }
 0x568   : > { %v9077_v37 = vadd.f32 %v4000_v63, %v3447_v46  ;;  %v9089_v50 = vpop.f32.mrb[24].mxu1  ;;  %v3452_v51 = vadd.f32 %v8945_v11, %v9591_v24 }
 0x569   : > { %v9081_v23 = vadd.f32 %v3995_v44, %v3446_v18  ;;  %v5748_v21 = vpop.f32.mrb[230].mxu0  ;;  %v9093_v27 = vpop.f32.mrb[25].mxu1 }
 0x56a   : > { %v4010_v22 = vadd.f32 %v5748_v21, %v8953_v32  ;;  %v4004_v38 = vpop.f32.mrb[231].mxu0 }
 0x56b   : > { %v4005_v48 = vadd.f32 %v4004_v38, %v8940_v58 }
 0x56c   : > { %v9091_v47 = vadd.f32 %v4010_v22, %v3449_v19  ;;  %v9103_v61 = vpop.f32.mrb[26].mxu1 }
 0x56d   : > { %v9095_v12 = vadd.f32 %v4005_v48, %v3448_v9  ;;  %v5751_v31 = vpop.f32.mrb[232].mxu0  ;;  %v9107_v60 = vpop.f32.mrb[27].mxu1  ;;  %v9592_v9 = vld [vmem:[#allocation41_spill] sm:$0xff] }
 0x56e   : > { %v4020_v32 = vadd.f32 %v5751_v31, %v8977_v1  ;;  %v4014_v16 = vpop.f32.mrb[233].mxu0  ;;  %v3454_v48 = vadd.f32 %v8945_v11, %v9592_v9 }
 0x56f   : > { %v4015_v58 = vadd.f32 %v4014_v16, %v8965_v49 }
 0x570   : > { %v9105_v8 = vadd.f32 %v4020_v32, %v3451_v30  ;;  %v9117_v18 = vpop.f32.mrb[28].mxu1 }
 0x571   : > { %v9109_v2 = vadd.f32 %v4015_v58, %v3450_v54  ;;  %v5754_v46 = vpop.f32.mrb[234].mxu0  ;;  %v9121_v21 = vpop.f32.mrb[29].mxu1  ;;  %v9593_v58 = vld [vmem:[#allocation43_spill] sm:$0xff] }
 0x572   : > { %v4030_v1 = vadd.f32 %v5754_v46, %v9001_v45  ;;  %v4024_v63 = vpop.f32.mrb[235].mxu0  ;;  %v3457_v34 = vadd.f32 %v8945_v11, %v9593_v58  ;;  %v4713_v58 = vld [vmem:[%s7265_s8 + $0x8] sm:$0xff] }
 0x573   : > { %v4025_v49 = vadd.f32 %v4024_v63, %v8989_v59 }
 0x574   : > { %v9119_v44 = vadd.f32 %v4030_v1, %v3453_v13  ;;  %v9131_v31 = vpop.f32.mrb[30].mxu1  ;;  %v9594_v13 = vld [vmem:[#allocation40_spill] sm:$0xff] }
 0x575   : > { %v9123_v19 = vadd.f32 %v4025_v49, %v3452_v51  ;;  %v5757_v22 = vpop.f32.mrb[236].mxu0  ;;  %v9135_v32 = vpop.f32.mrb[31].mxu1  ;;  %v3456_v1 = vadd.f32 %v8945_v11, %v9594_v13 }
 0x576   : > { %v4040_v45 = vadd.f32 %v5757_v22, %v9025_v26  ;;  %v4034_v38 = vpop.f32.mrb[237].mxu0 }
 0x577   : > { %v4035_v59 = vadd.f32 %v4034_v38, %v9013_v35 }
 0x578   : > { %v9133_v30 = vadd.f32 %v4040_v45, %v3455_v57  ;;  %v9145_v63 = vpop.f32.mrb[32].mxu1  ;;  %v4712_v45 = vld [vmem:[%s7265_s8] sm:$0xff] }
 0x579   : > { %v9137_v16 = vadd.f32 %v4035_v59, %v3454_v48  ;;  %v5760_v54 = vpop.f32.mrb[238].mxu0  ;;  %v9149_v51 = vpop.f32.mrb[33].mxu1 }
 0x57a   : > { %v4050_v26 = vadd.f32 %v5760_v54, %v9049_v25  ;;  %v4044_v46 = vpop.f32.mrb[239].mxu0 }
 0x57b   : > { %v4045_v35 = vadd.f32 %v4044_v46, %v9037_v17 }
 0x57c   : > { %v9147_v24 = vadd.f32 %v4050_v26, %v3457_v34  ;;  %v9155_v38 = vpop.f32.mrb[34].mxu1 }
 0x57d   : > { %v9151_v49 = vadd.f32 %v4045_v35, %v3456_v1  ;;  %v4296_v22 = vpop.f32.mrb[240].mxu0  ;;  %v9158_v17 = vpop.f32.mrb[35].mxu1  ;;  %v4714_v35 = vld [vmem:[%s7265_s8 + $0x10] sm:$0xff] }
 0x57e   : > { %v4522_v57 = vadd.f32 %v9065_v42, %v4296_v22  ;;  %v4298_v25 = vpop.f32.mrb[241].mxu0 }
 0x580   : > { %v4680_v11 = vadd.f32 %v4522_v57, %v8957_v33  ;;  %v9162_v34 = vpop.f32.mrb[36].mxu1 }
 0x581   : > { %v4301_v9 = vpop.f32.mrb[242].mxu0  ;;  %v9166_v26 = vpop.f32.mrb[37].mxu1 }
 0x582   : > { %v4744_v48 = vadd.f32 %v4712_v45, %v4680_v11  ;;  %v4527_v59 = vadd.f32 %v9061_v14, %v4301_v9  ;;  %v4303_v54 = vpop.f32.mrb[243].mxu0  ;;  %v4715_v9 = vld [vmem:[%s7265_s8 + $0x18] sm:$0xff] }
 0x584   : > { %4776 = vst [vmem:[%s7363_s15] sm:$0xff] %v4744_v48  ;;  %v4681_v42 = vadd.f32 %v4527_v59, %v8955_v53  ;;  %v9170_v22 = vpop.f32.mrb[38].mxu1 }
 0x585   : > { %v4306_v46 = vpop.f32.mrb[244].mxu0  ;;  %v9174_v57 = vpop.f32.mrb[39].mxu1 }
 0x586   : > { %v4745_v33 = vadd.f32 %v4713_v58, %v4681_v42  ;;  %v4532_v13 = vadd.f32 %v9079_v7, %v4306_v46  ;;  %v4308_v1 = vpop.f32.mrb[245].mxu0  ;;  %v4716_v46 = vld [vmem:[%s7265_s8 + $0x20] sm:$0xff] }
 0x588   : > { %4777 = vst [vmem:[%s7363_s15 + $0x8] sm:$0xff] %v4745_v33  ;;  %v4682_v14 = vadd.f32 %v4532_v13, %v8969_v52  ;;  %v9178_v48 = vpop.f32.mrb[40].mxu1 }
 0x589   : > { %v4311_v25 = vpop.f32.mrb[246].mxu0  ;;  %v9182_v59 = vpop.f32.mrb[41].mxu1 }
 0x58a   : > { %v4746_v53 = vadd.f32 %v4714_v35, %v4682_v14  ;;  %v4537_v45 = vadd.f32 %v9075_v43, %v4311_v25  ;;  %v4313_v11 = vpop.f32.mrb[247].mxu0  ;;  %v4717_v25 = vld [vmem:[%s7265_s8 + $0x28] sm:$0xff] }
 0x58c   : > { %4778 = vst [vmem:[%s7363_s15 + $0x10] sm:$0xff] %v4746_v53  ;;  %v4683_v7 = vadd.f32 %v4537_v45, %v8967_v15  ;;  %v9186_v33 = vpop.f32.mrb[42].mxu1 }
 0x58d   : > { %v4316_v54 = vpop.f32.mrb[248].mxu0  ;;  %v9190_v13 = vpop.f32.mrb[43].mxu1 }
 0x58e   : > { %v4747_v52 = vadd.f32 %v4715_v9, %v4683_v7  ;;  %v4542_v58 = vadd.f32 %v9093_v27, %v4316_v54  ;;  %v4318_v42 = vpop.f32.mrb[249].mxu0  ;;  %v4718_v54 = vld [vmem:[%s7265_s8 + $0x30] sm:$0xff] }
 0x590   : > { %4779 = vst [vmem:[%s7363_s15 + $0x18] sm:$0xff] %v4747_v52  ;;  %v4684_v43 = vadd.f32 %v4542_v58, %v8981_v28  ;;  %v9194_v53 = vpop.f32.mrb[44].mxu1 }
 0x591   : > { %v4321_v1 = vpop.f32.mrb[250].mxu0  ;;  %v9198_v45 = vpop.f32.mrb[45].mxu1 }
 0x592   : > { %v4748_v15 = vadd.f32 %v4716_v46, %v4684_v43  ;;  %v4547_v35 = vadd.f32 %v9089_v50, %v4321_v1  ;;  %v4323_v14 = vpop.f32.mrb[251].mxu0  ;;  %v4719_v1 = vld [vmem:[%s7265_s8 + $0x38] sm:$0xff] }
 0x594   : > { %4780 = vst [vmem:[%s7363_s15 + $0x20] sm:$0xff] %v4748_v15  ;;  %v4685_v27 = vadd.f32 %v4547_v35, %v8979_v62  ;;  %v9202_v52 = vpop.f32.mrb[46].mxu1 }
 0x595   : > { %v4326_v11 = vpop.f32.mrb[252].mxu0  ;;  %v9206_v58 = vpop.f32.mrb[47].mxu1 }
 0x596   : > { %v4749_v28 = vadd.f32 %v4717_v25, %v4685_v27  ;;  %v4552_v9 = vadd.f32 %v9107_v60, %v4326_v11  ;;  %v4328_v7 = vpop.f32.mrb[253].mxu0  ;;  %v4720_v11 = vld [vmem:[%s7265_s8 + $0x40] sm:$0xff] }
 0x598   : > { %4781 = vst [vmem:[%s7363_s15 + $0x28] sm:$0xff] %v4749_v28  ;;  %v4686_v50 = vadd.f32 %v4552_v9, %v8993_v40  ;;  %v9210_v15 = vpop.f32.mrb[48].mxu1 }
 0x599   : > { %v4331_v42 = vpop.f32.mrb[254].mxu0  ;;  %v9214_v35 = vpop.f32.mrb[49].mxu1 }
 0x59a   : > { %v4750_v62 = vadd.f32 %v4718_v54, %v4686_v50  ;;  %v4557_v46 = vadd.f32 %v9103_v61, %v4331_v42  ;;  %v4333_v43 = vpop.f32.mrb[255].mxu0  ;;  %v4721_v42 = vld [vmem:[%s7265_s8 + $0x48] sm:$0xff] }
 0x59c   : > { %4782 = vst [vmem:[%s7363_s15 + $0x30] sm:$0xff] %v4750_v62  ;;  %v4687_v60 = vadd.f32 %v4557_v46, %v8991_v41  ;;  %v9218_v28 = vpop.f32.mrb[50].mxu1 }
 0x59d   : > { %v4336_v14 = vpop.f32.mrb[0].mxu0  ;;  %v9222_v9 = vpop.f32.mrb[51].mxu1 }
 0x59e   : > { %v4751_v40 = vadd.f32 %v4719_v1, %v4687_v60  ;;  %v4562_v25 = vadd.f32 %v9121_v21, %v4336_v14  ;;  %v4338_v27 = vpop.f32.mrb[1].mxu0 }
 0x59f   : > { %v4723_v27 = vld [vmem:[%s7265_s8 + $0x58] sm:$0xff] }
 0x5a0   : > { %4783 = vst [vmem:[%s7363_s15 + $0x38] sm:$0xff] %v4751_v40  ;;  %v4688_v61 = vadd.f32 %v4562_v25, %v9005_v0  ;;  %v4722_v0 = vld [vmem:[%s7265_s8 + $0x50] sm:$0xff] }
 0x5a1   : > { %v4341_v7 = vpop.f32.mrb[2].mxu0 }
 0x5a2   : > { %v4752_v41 = vadd.f32 %v4720_v11, %v4688_v61  ;;  %v4567_v54 = vadd.f32 %v9117_v18, %v4341_v7  ;;  %v4343_v50 = vpop.f32.mrb[3].mxu0 }
 0x5a4   : > { %4784 = vst [vmem:[%s7363_s15 + $0x40] sm:$0xff] %v4752_v41  ;;  %v4689_v21 = vadd.f32 %v4567_v54, %v9003_v55  ;;  %v4724_v41 = vld [vmem:[%s7265_s8 + $0x60] sm:$0xff] }
 0x5a5   : > { %v4346_v62 = vpop.f32.mrb[4].mxu0 }
 0x5a6   : > { %v4753_v46 = vadd.f32 %v4721_v42, %v4689_v21  ;;  %v4572_v43 = vadd.f32 %v9135_v32, %v4346_v62  ;;  %v4348_v1 = vpop.f32.mrb[5].mxu0  ;;  %v4725_v21 = vld [vmem:[%s7265_s8 + $0x68] sm:$0xff] }
 0x5a7   : > { %v4726_v1 = vld [vmem:[%s7265_s8 + $0x70] sm:$0xff] }
 0x5a8   : > { %4785 = vst [vmem:[%s7363_s15 + $0x48] sm:$0xff] %v4753_v46  ;;  %v4690_v60 = vadd.f32 %v4572_v43, %v9017_v39 }
 0x5a9   : > { %v4351_v14 = vpop.f32.mrb[6].mxu0 }
 0x5aa   : > { %v4754_v18 = vadd.f32 %v4722_v0, %v4690_v60  ;;  %v4577_v40 = vadd.f32 %v9131_v31, %v4351_v14  ;;  %v4353_v25 = vpop.f32.mrb[7].mxu0 }
 0x5ac   : > { %4786 = vst [vmem:[%s7363_s15 + $0x50] sm:$0xff] %v4754_v18  ;;  %v4691_v55 = vadd.f32 %v4577_v40, %v9015_v5  ;;  %v4727_v18 = vld [vmem:[%s7265_s8 + $0x78] sm:$0xff] }
 0x5ad   : > { %v4356_v11 = vpop.f32.mrb[8].mxu0 }
 0x5ae   : > { %v4755_v32 = vadd.f32 %v4723_v27, %v4691_v55  ;;  %v4582_v61 = vadd.f32 %v9149_v51, %v4356_v11  ;;  %v4358_v7 = vpop.f32.mrb[9].mxu0  ;;  %v4728_v55 = vld [vmem:[%s7265_s8 + $0x80] sm:$0xff] }
 0x5af   : > { %v4729_v7 = vld [vmem:[%s7265_s8 + $0x88] sm:$0xff] }
 0x5b0   : > { %4787 = vst [vmem:[%s7363_s15 + $0x58] sm:$0xff] %v4755_v32  ;;  %v4692_v39 = vadd.f32 %v4582_v61, %v9029_v36 }
 0x5b1   : > { %v4361_v54 = vpop.f32.mrb[10].mxu0 }
 0x5b2   : > { %v4756_v31 = vadd.f32 %v4724_v41, %v4692_v39  ;;  %v4587_v50 = vadd.f32 %v9145_v63, %v4361_v54  ;;  %v4363_v42 = vpop.f32.mrb[11].mxu0 }
 0x5b4   : > { %4788 = vst [vmem:[%s7363_s15 + $0x60] sm:$0xff] %v4756_v31  ;;  %v4693_v5 = vadd.f32 %v4587_v50, %v9027_v29  ;;  %v4730_v31 = vld [vmem:[%s7265_s8 + $0x90] sm:$0xff] }
 0x5b5   : > { %v4366_v62 = vpop.f32.mrb[12].mxu0 }
 0x5b6   : > { %v4757_v51 = vadd.f32 %v4725_v21, %v4693_v5  ;;  %v4592_v46 = vadd.f32 %v9158_v17, %v4366_v62  ;;  %v4368_v43 = vpop.f32.mrb[13].mxu0  ;;  %v4731_v5 = vld [vmem:[%s7265_s8 + $0x98] sm:$0xff] }
 0x5b7   : > { %v4732_v43 = vld [vmem:[%s7265_s8 + $0xa0] sm:$0xff] }
 0x5b8   : > { %4789 = vst [vmem:[%s7363_s15 + $0x68] sm:$0xff] %v4757_v51  ;;  %v4694_v36 = vadd.f32 %v4592_v46, %v9041_v10 }
 0x5b9   : > { %v4371_v0 = vpop.f32.mrb[14].mxu0 }
 0x5ba   : > { %v4758_v63 = vadd.f32 %v4726_v1, %v4694_v36  ;;  %v4597_v60 = vadd.f32 %v9155_v38, %v4371_v0  ;;  %v4373_v14 = vpop.f32.mrb[15].mxu0 }
 0x5bc   : > { %4790 = vst [vmem:[%s7363_s15 + $0x70] sm:$0xff] %v4758_v63  ;;  %v4695_v29 = vadd.f32 %v4597_v60, %v9039_v4  ;;  %v4733_v63 = vld [vmem:[%s7265_s8 + $0xa8] sm:$0xff] }
 0x5bd   : > { %v4376_v40 = vpop.f32.mrb[16].mxu0 }
 0x5be   : > { %v4759_v17 = vadd.f32 %v4727_v18, %v4695_v29  ;;  %v4602_v25 = vadd.f32 %v9166_v26, %v4376_v40  ;;  %v4378_v27 = vpop.f32.mrb[17].mxu0  ;;  %v4734_v29 = vld [vmem:[%s7265_s8 + $0xb0] sm:$0xff] }
 0x5bf   : > { %v4735_v27 = vld [vmem:[%s7265_s8 + $0xb8] sm:$0xff] }
 0x5c0   : > { %4791 = vst [vmem:[%s7363_s15 + $0x78] sm:$0xff] %v4759_v17  ;;  %v4696_v10 = vadd.f32 %v4602_v25, %v9053_v3 }
 0x5c1   : > { %v4381_v11 = vpop.f32.mrb[18].mxu0 }
 0x5c2   : > { %v4760_v38 = vadd.f32 %v4728_v55, %v4696_v10  ;;  %v4607_v32 = vadd.f32 %v9162_v34, %v4381_v11  ;;  %v4383_v61 = vpop.f32.mrb[19].mxu0 }
 0x5c4   : > { %4792 = vst [vmem:[%s7363_s15 + $0x80] sm:$0xff] %v4760_v38  ;;  %v4697_v4 = vadd.f32 %v4607_v32, %v9051_v6  ;;  %v4736_v38 = vld [vmem:[%s7265_s8 + $0xc0] sm:$0xff] }
 0x5c5   : > { %v4386_v41 = vpop.f32.mrb[20].mxu0 }
 0x5c6   : > { %v4761_v26 = vadd.f32 %v4729_v7, %v4697_v4  ;;  %v4612_v39 = vadd.f32 %v9174_v57, %v4386_v41  ;;  %v4388_v54 = vpop.f32.mrb[21].mxu0  ;;  %v4737_v4 = vld [vmem:[%s7265_s8 + $0xc8] sm:$0xff] }
 0x5c7   : > { %v4738_v54 = vld [vmem:[%s7265_s8 + $0xd0] sm:$0xff] }
 0x5c8   : > { %4793 = vst [vmem:[%s7363_s15 + $0x88] sm:$0xff] %v4761_v26  ;;  %v4698_v3 = vadd.f32 %v4612_v39, %v9067_v56 }
 0x5c9   : > { %v4391_v50 = vpop.f32.mrb[22].mxu0 }
 0x5ca   : > { %v4762_v34 = vadd.f32 %v4730_v31, %v4698_v3  ;;  %v4617_v42 = vadd.f32 %v9170_v22, %v4391_v50  ;;  %v4393_v21 = vpop.f32.mrb[23].mxu0 }
 0x5cc   : > { %4794 = vst [vmem:[%s7363_s15 + $0x90] sm:$0xff] %v4762_v34  ;;  %v4699_v6 = vadd.f32 %v4617_v42, %v9063_v20  ;;  %v4739_v34 = vld [vmem:[%s7265_s8 + $0xd8] sm:$0xff] }
 0x5cd   : > { %v4396_v62 = vpop.f32.mrb[24].mxu0 }
 0x5ce   : > { %v4763_v57 = vadd.f32 %v4731_v5, %v4699_v6  ;;  %v4622_v51 = vadd.f32 %v9182_v59, %v4396_v62  ;;  %v4398_v46 = vpop.f32.mrb[25].mxu0  ;;  %v4740_v6 = vld [vmem:[%s7265_s8 + $0xe0] sm:$0xff] }
 0x5cf   : > { %v4741_v46 = vld [vmem:[%s7265_s8 + $0xe8] sm:$0xff] }
 0x5d0   : > { %4795 = vst [vmem:[%s7363_s15 + $0x98] sm:$0xff] %v4763_v57  ;;  %v4700_v56 = vadd.f32 %v4622_v51, %v9081_v23 }
 0x5d1   : > { %v4401_v1 = vpop.f32.mrb[26].mxu0 }
 0x5d2   : > { %v4764_v22 = vadd.f32 %v4732_v43, %v4700_v56  ;;  %v4627_v36 = vadd.f32 %v9178_v48, %v4401_v1  ;;  %v4403_v0 = vpop.f32.mrb[27].mxu0  ;;  %v4742_v1 = vld [vmem:[%s7265_s8 + $0xf0] sm:$0xff] }
 0x5d4   : > { %4796 = vst [vmem:[%s7363_s15 + $0xa0] sm:$0xff] %v4764_v22  ;;  %v4701_v20 = vadd.f32 %v4627_v36, %v9077_v37 }
 0x5d5   : > { %v4406_v60 = vpop.f32.mrb[28].mxu0 }
 0x5d6   : > { %v4765_v59 = vadd.f32 %v4733_v63, %v4701_v20  ;;  %v4632_v14 = vadd.f32 %v9190_v13, %v4406_v60  ;;  %v4408_v18 = vpop.f32.mrb[29].mxu0  ;;  %v4743_v63 = vld [vmem:[%s7265_s8 + $0xf8] sm:$0xff]  ;;  %s6807_s8 = smov [#allocation13]  }
 0x5d7   : > { %s6638_s19 = sshll.u32 %s6807_s8, 4  ;;  %s6639_s19 = int_to_ptr.vmem [resolvable:$false] %s6638_s19 }
 0x5d8   : > { %4797 = vst [vmem:[%s7363_s15 + $0xa8] sm:$0xff] %v4765_v59  ;;  %v4702_v23 = vadd.f32 %v4632_v14, %v9095_v12  ;;  %s6640_s1 = scalar_lea.vmem %s6639_s19, 8192  ;;  %p6641_p3 = scmp.lt.s32.totalorder %s9324_s21, %s6639_s19 }
 0x5d9   : > { %v4411_v40 = vpop.f32.mrb[30].mxu0  ;;  %p6642_p5 = scmp.lt.s32.totalorder %s6640_s1, %s6634_s18 }
 0x5da   : > { %v4766_v48 = vadd.f32 %v4734_v29, %v4702_v23  ;;  %v4637_v17 = vadd.f32 %v9186_v33, %v4411_v40  ;;  %v4413_v25 = vpop.f32.mrb[31].mxu0 }
 0x5db   : > { %p6643_p4 = por %p6642_p5, %p6641_p3 }
 0x5dc   : > { %4798 = vst [vmem:[%s7363_s15 + $0xb0] sm:$0xff] %v4766_v48  ;;  %v4703_v37 = vadd.f32 %v4637_v17, %v9091_v47 }
 0x5dd   : > { %v4416_v55 = vpop.f32.mrb[32].mxu0  ;;  %p6644_p11 = pnand %p6643_p4, %p6637_p13 }
 0x5de   : > { %v4767_v13 = vadd.f32 %v4735_v27, %v4703_v37  ;;  %v4642_v10 = vadd.f32 %v9198_v45, %v4416_v55  ;;  %v4418_v11 = vpop.f32.mrb[33].mxu0 }
 0x5e0   : > { %4799 = vst [vmem:[%s7363_s15 + $0xb8] sm:$0xff] %v4767_v13  ;;  %v4704_v12 = vadd.f32 %v4642_v10, %v9109_v2 }
 0x5e1   : > { %v4421_v32 = vpop.f32.mrb[34].mxu0 }
 0x5e2   : > { %v4768_v33 = vadd.f32 %v4736_v38, %v4704_v12  ;;  %v4647_v61 = vadd.f32 %v9194_v53, %v4421_v32  ;;  %v4423_v7 = vpop.f32.mrb[35].mxu0 }
 0x5e4   : > { %4800 = vst [vmem:[%s7363_s15 + $0xc0] sm:$0xff] %v4768_v33  ;;  %v4705_v47 = vadd.f32 %v4647_v61, %v9105_v8 }
 0x5e5   : > { %v4426_v41 = vpop.f32.mrb[36].mxu0 }
 0x5e6   : > { %v4769_v45 = vadd.f32 %v4737_v4, %v4705_v47  ;;  %v4652_v26 = vadd.f32 %v9206_v58, %v4426_v41  ;;  %v4428_v39 = vpop.f32.mrb[37].mxu0 }
 0x5e8   : > { %4801 = vst [vmem:[%s7363_s15 + $0xc8] sm:$0xff] %v4769_v45  ;;  %v4706_v2 = vadd.f32 %v4652_v26, %v9123_v19 }
 0x5e9   : > { %v4431_v31 = vpop.f32.mrb[38].mxu0 }
 0x5ea   : > { %v4770_v53 = vadd.f32 %v4738_v54, %v4706_v2  ;;  %v4657_v3 = vadd.f32 %v9202_v52, %v4431_v31  ;;  %v4433_v50 = vpop.f32.mrb[39].mxu0 }
 0x5ec   : > { %4802 = vst [vmem:[%s7363_s15 + $0xd0] sm:$0xff] %v4770_v53  ;;  %v4707_v8 = vadd.f32 %v4657_v3, %v9119_v44 }
 0x5ed   : > { %v4436_v58 = vpop.f32.mrb[40].mxu0 }
 0x5ee   : > { %v4771_v42 = vadd.f32 %v4739_v34, %v4707_v8  ;;  %v4662_v21 = vadd.f32 %v9214_v35, %v4436_v58  ;;  %v4438_v5 = vpop.f32.mrb[41].mxu0 }
 0x5f0   : > { %4803 = vst [vmem:[%s7363_s15 + $0xd8] sm:$0xff] %v4771_v42  ;;  %v4708_v19 = vadd.f32 %v4662_v21, %v9137_v16 }
 0x5f1   : > { %v4441_v52 = vpop.f32.mrb[42].mxu0 }
 0x5f2   : > { %v4772_v62 = vadd.f32 %v4740_v6, %v4708_v19  ;;  %v4667_v57 = vadd.f32 %v9210_v15, %v4441_v52  ;;  %v4443_v51 = vpop.f32.mrb[43].mxu0 }
 0x5f4   : > { %4804 = vst [vmem:[%s7363_s15 + $0xe0] sm:$0xff] %v4772_v62  ;;  %v4709_v44 = vadd.f32 %v4667_v57, %v9133_v30 }
 0x5f5   : > { %v4446_v35 = vpop.f32.mrb[44].mxu0 }
 0x5f6   : > { %v4773_v43 = vadd.f32 %v4741_v46, %v4709_v44  ;;  %v4672_v56 = vadd.f32 %v9222_v9, %v4446_v35  ;;  %v4448_v16 = vpop.f32.mrb[45].mxu0 }
 0x5f8   : > { %4805 = vst [vmem:[%s7363_s15 + $0xe8] sm:$0xff] %v4773_v43  ;;  %v4710_v15 = vadd.f32 %v4672_v56, %v9151_v49 }
 0x5f9   : > { %v4451_v22 = vpop.f32.mrb[46].mxu0 }
 0x5fa   : > { %v4774_v30 = vadd.f32 %v4742_v1, %v4710_v15  ;;  %v4677_v36 = vadd.f32 %v9218_v28, %v4451_v22  ;;  %v4453_v0 = vpop.f32.mrb[47].mxu0 }
 0x5fc   : > { %4806 = vst [vmem:[%s7363_s15 + $0xf0] sm:$0xff] %v4774_v30  ;;  %v4711_v9 = vadd.f32 %v4677_v36, %v9147_v24 }
 0x5fe   : > { %v4775_v49 = vadd.f32 %v4743_v63, %v4711_v9 }
 0x600   : > { %4807 = vst [vmem:[%s7363_s15 + $0xf8] sm:$0xff] %v4775_v49 }
 0x601   : > { %6647 = shalt.err (!%p6644_p11)
}
 0x602   : > { %s6648_s11 = scalar_lea.hbm %s9322_s7, 4096  ;;  %s6652_s13 = scalar_lea.hbm %s9600_s22, 16384 }
 0x603   : > { %p6649_p6 = scmp.ne.s32.totalorder %s9322_s7, %s6648_s11  ;;  %p6653_p2 = scmp.lt.u32.totalorder %s9322_s7, %s9600_s22 }
 0x604   : > { %p6654_p10 = scmp.lt.u32.totalorder %s6652_s13, %s6648_s11  ;;  %p6656_p0 = scmp.lt.u32.totalorder %s6648_s11, %s9322_s7 }
 0x605   : > { %p6650_p9 = pnand %p6649_p6, %p9601_p12 }
 0x606   : > { %p6655_p8 = por %p6654_p10, %p6653_p2 }
 0x607   : > { %p6651_p7 = pneg %p6650_p9 }
 0x608   : > { %p6657_p1 = por %p6656_p0, %p6655_p8 }
 0x60a   : > { %p6658_p13 = pnand %p6657_p1, %p6651_p7 }
 0x60c   : > { %6661 = shalt.err (!%p6658_p13)
}
 0x60d   : > { %s6808_s6 = smov 128   ;;  %s6809_s27 = smov 8  }
 0x60e   : > { %6335 = dma.vmem_to_hbm [thread:$0]  (%p9601_p12), %s9324_s21, 4096, %s9322_s7, %s9329_s23, %s6808_s6, %s6808_s6, %s6809_s27  }
 0x60f PF: > { %s9602_s4 = sld [smem:[#allocation19_spill]]  ;;  %s9603_s10 = sld [smem:[#allocation30_spill]] }
 0x610   : > { %p6363_p3 = scmp.ge.s32.totalorder %s6792_s14, 2 }
 0x615   : > { %s4840_s24 = sand.u32 1, %s9602_s4   ;;  %p9604_p5 = scmp.ne.s32.totalorder %s9603_s10, 0 }
 0x616   : > { %s4841_s28 = scalar_lea.sflag [#allocation6], %s4840_s24 }
 0x617   : > { %p6355_p4 = pnand %p6363_p3, %p9604_p5 }
 0x619   : > { %6735 = dma.done.wait (!%p6355_p4), %s4841_s28, 4096  }
 0x61a   : > { %6737 = vsyncadd (!%p6355_p4), %s4841_s28, 4294963200  ;;  %s27_s14 = sadd.s32 1, %s6792_s14   ;;  %s9606_s27 = sld [smem:[#allocation20_spill]] }
 0x61b   : > { %p9358_p11 = scmp.ge.s32.totalorder %s27_s14, 6   ;;  %s9607_s12 = sld [smem:[#allocation21_spill]] }
 0x61c   : > { %s9608_s21 = smov %s7117_s30  ;;  %s9609_s10 = sld [smem:[#allocation24_spill]] }
 0x61d   : > { %s9610_s11 = sld [smem:[#allocation25_spill]]  ;;  %s9611_s7 = sld [smem:[#allocation27_spill]] }
 0x61e   : > { %s9612_s13 = sld [smem:[#allocation32_spill]]  ;;  %s9613_s24 = smov %s6744_s25 }
 0x61f   : > { %s9614_s25 = smov %s6748_s26  ;;  %s9615_s26 = smov %s7202_s17 }
 0x620   : > { %s9616_s28 = smov %s6760_s29  ;;  %s9617_s29 = smov %s7126_s20 }
 0x621   : > { %s9618_s30 = smov %s9607_s12  ;;  %s9619_s8 = smov %s6772_s9 }
 0x622   : > { %s9620_s9 = smov %s9608_s21  ;;  %26 = sbr.rel (!%p9358_p11) target bundleno = 21 (0x15), region = 147 }
 0x623   : > { %s9621_s12 = smov %s9611_s7 }
 0x629   :  { %4846 = vsyncpa [#allocation5], 1 }
 0x62a   :  { %4848 = vsyncpa [#allocation5 + $0x1], 1 }
 0x62b   :  { %4849 = vsyncpa [#allocation8], 1 }
 0x62c   :  { %4851 = vsyncpa [#allocation8 + $0x1], 1 }
 0x62d   :  { %4852 = vsyncpa [#allocation11], 1 }
 0x62e   :  { %4853 = vsyncpa [#allocation6], 1 }
 0x62f   :  { %4855 = vsyncpa [#allocation6 + $0x1], 1 }

</bundles_post_ra>
